<compile_context>
chip_gen: v7x
topology: tpu7x:2x2x1
jax: 0.10.0
libtpu: 0.0.40
codegen_flags: <defaults>
</compile_context>

<pallas_src>
import math
import functools

import jax
import jax.numpy as jnp
from jax.experimental import pallas as pl
from jax.experimental.pallas import tpu as pltpu

BN_EPS = 1e-5
LRELU_SLOPE = 0.1
CPAD = 128            # every channel dim padded to one full lane register


def _round_up(x, m):
    return (x + m - 1) // m * m


def _leaky(y, slope):
    return jnp.where(y > 0, y, slope * y)


# ----------------------------- Pallas kernels ------------------------------

def _conv_kernel(x_ref, w_ref, b_ref, o_ref, *, slope):
    """o = LeakyReLU(x @ w + b)  (BN scale pre-folded into w)."""
    y = jnp.dot(x_ref[...], w_ref[...], preferred_element_type=jnp.float32)
    y = _leaky(y + b_ref[...], slope)
    o_ref[...] = y.astype(o_ref.dtype)


def _conv_pw_kernel(x_ref, w1_ref, b1_ref, w2_ref, b2_ref, o_ref, *, slope):
    """Fused 4x4/s2 conv followed by a 1x1 conv (interior positions)."""
    y = jnp.dot(x_ref[...], w1_ref[...], preferred_element_type=jnp.float32)
    y = _leaky(y + b1_ref[...], slope)
    z = jnp.dot(y.astype(jnp.bfloat16), w2_ref[...],
                preferred_element_type=jnp.float32)
    z = _leaky(z + b2_ref[...], slope)
    o_ref[...] = z.astype(o_ref.dtype)


def _head_kernel(x_ref, w_ref, b_ref, p_ref, wfc_ref, bfc_ref, o_ref, *, slope):
    """Fused last conv + global avg-pool (pooling matmul) + fc + sigmoid."""
    y = jnp.dot(x_ref[...], w_ref[...], preferred_element_type=jnp.float32)
    y = _leaky(y + b_ref[...], slope)                                   # (Mp, C)
    pooled = jnp.dot(p_ref[...], y, preferred_element_type=jnp.float32)  # (Np, C)
    z = jnp.dot(pooled, wfc_ref[...], preferred_element_type=jnp.float32)
    o_ref[...] = jax.nn.sigmoid(z + bfc_ref[...]).astype(o_ref.dtype)


# ----------------------------- kernel wrappers ------------------------------

def _m_tiles(M):
    """Pad M and pick a row tile; >= 2 grid blocks when possible (v7x: 2 TCs)."""
    if M >= 16:
        Mp = _round_up(M, 16)
        return Mp, Mp // 2
    Mp = _round_up(M, 8)
    return Mp, Mp


def pallas_conv(patches, pa, pb=None):
    """patches:(M, K) bf16 -> (M, CPAD) bf16 via fused GEMM(+pointwise GEMM)."""
    M, K = patches.shape
    Mp, tm = _m_tiles(M)
    if Mp != M:   # only a handful of zero rows at these shapes
        patches = jnp.pad(patches, ((0, Mp - M), (0, 0)))
    x_spec = pl.BlockSpec((tm, K), lambda i: (i, 0))
    b_spec = pl.BlockSpec((1, CPAD), lambda i: (0, 0))
    o_spec = pl.BlockSpec((tm, CPAD), lambda i: (i, 0))
    if pb is None:
        kernel = functools.partial(_conv_kernel, slope=LRELU_SLOPE)
        in_specs = [x_spec, pl.BlockSpec((K, CPAD), lambda i: (0, 0)), b_spec]
        args = (patches, pa["wm"], pa["b"])
    else:
        kernel = functools.partial(_conv_pw_kernel, slope=LRELU_SLOPE)
        in_specs = [x_spec,
                    pl.BlockSpec((K, CPAD), lambda i: (0, 0)), b_spec,
                    pl.BlockSpec((CPAD, CPAD), lambda i: (0, 0)), b_spec]
        args = (patches, pa["wm"], pa["b"], pb["wm"], pb["b"])
    out = pl.pallas_call(
        kernel,
        out_shape=jax.ShapeDtypeStruct((Mp, CPAD), jnp.bfloat16),
        grid=(Mp // tm,),
        in_specs=in_specs,
        out_specs=o_spec,
        compiler_params=pltpu.CompilerParams(dimension_semantics=("parallel",)),
    )(*args)
    return out[:M]


def pallas_head(patches, pool, p7, fc):
    Mp, K = patches.shape
    Np = pool.shape[0]
    return pl.pallas_call(
        functools.partial(_head_kernel, slope=LRELU_SLOPE),
        out_shape=jax.ShapeDtypeStruct((Np, CPAD), jnp.float32),
        grid=(1,),
        in_specs=[
            pl.BlockSpec((Mp, K), lambda i: (0, 0)),
            pl.BlockSpec((K, CPAD), lambda i: (0, 0)),
            pl.BlockSpec((1, CPAD), lambda i: (0, 0)),
            pl.BlockSpec((Np, Mp), lambda i: (0, 0)),
            pl.BlockSpec((CPAD, CPAD), lambda i: (0, 0)),
            pl.BlockSpec((1, CPAD), lambda i: (0, 0)),
        ],
        out_specs=pl.BlockSpec((Np, CPAD), lambda i: (0, 0)),
    )(patches, p7["wm"], p7["b"], pool, fc["w"], fc["b"])


# ----------------------------- parameter init ------------------------------

class KeyGen:
    def __init__(self, key):
        self.key = key

    def __call__(self):
        self.key, sub = jax.random.split(self.key)
        return sub


def _xavier_normal(key, shape, fan_in, fan_out):
    std = math.sqrt(2.0 / (fan_in + fan_out))
    return std * jax.random.normal(key, shape, dtype=jnp.float32)


def make_disconv(kg, c1, c2, k, s, p):
    """Conv2d(c1,c2,k,s,p,bias=False) + BN(eval, init stats) + LeakyReLU, BN folded."""
    assert c1 <= CPAD and c2 <= CPAD
    w = _xavier_normal(kg(), (c2, c1, k, k), fan_in=c1 * k * k, fan_out=c2 * k * k)
    # eval-mode BN at init: gamma=1, beta=0, running_mean=0, running_var=1
    scale = 1.0 / math.sqrt(1.0 + BN_EPS)
    bias = jnp.zeros((c2,), jnp.float32)                  # beta - mean * scale
    w = jnp.transpose(w * scale, (2, 3, 1, 0))            # (k, k, c1, c2), scale folded
    w = jnp.pad(w, ((0, 0), (0, 0), (0, CPAD - c1), (0, CPAD - c2)))
    return dict(wm=w.reshape(k * k * CPAD, CPAD).astype(jnp.bfloat16),
                b=jnp.pad(bias, (0, CPAD - c2)).reshape(1, CPAD),
                k=k, s=s, p=p)


def make_fc(kg, c1, c2=1):
    w = _xavier_normal(kg(), (c2, c1), fan_in=c1, fan_out=c2)
    w = jnp.pad(w.T, ((0, CPAD - c1), (0, CPAD - c2)))    # (CPAD, CPAD) f32
    return dict(w=w, b=jnp.zeros((1, CPAD), jnp.float32))


def init_discriminator(key, depth=1):
    kg = KeyGen(key)
    c8, c16, c32, c64 = 8 * depth, 16 * depth, 32 * depth, 64 * depth
    return dict(
        conv1=make_disconv(kg, 3, c8, 4, 2, 1),
        conv2a=make_disconv(kg, c8, c16, 4, 2, 1),
        conv2b=make_disconv(kg, c16, c16, 1, 1, 1),
        conv3a=make_disconv(kg, c16, c32, 4, 2, 1),
        conv3b=make_disconv(kg, c32, c32, 1, 1, 1),
        conv4a=make_disconv(kg, c32, c64, 4, 2, 1),
        conv4b=make_disconv(kg, c64, c64, 4, 2, 1),
        fc=make_fc(kg, c64, 1),
    )


# ----------------------------- glue + forward ------------------------------

def _im2col(x, k, s, p):
    """x:(N,H,W,CPAD) bf16 -> (N*Ho*Wo, k*k*CPAD) patch matrix (tiny at these shapes)."""
    N, H, W, C = x.shape
    Ho = (H + 2 * p - k) // s + 1
    Wo = (W + 2 * p - k) // s + 1
    if p:
        x = jnp.pad(x, ((0, 0), (p, p), (p, p), (0, 0)))
    cols = [x[:, ky:ky + s * (Ho - 1) + 1:s, kx:kx + s * (Wo - 1) + 1:s, :]
            for ky in range(k) for kx in range(k)]
    pat = jnp.concatenate(cols, axis=-1) if len(cols) > 1 else cols[0]
    return pat.reshape(N * Ho * Wo, k * k * C), (N, Ho, Wo)


def conv_block(x, pa, pb=None):
    """Disconv(4,2,1), optionally fused with a following Disconv(1,1,1)."""
    patches, (N, Ho, Wo) = _im2col(x, pa["k"], pa["s"], pa["p"])
    y = pallas_conv(patches, pa, pb).reshape(N, Ho, Wo, CPAD)
    if pb is not None:
        # The fused 1x1 conv has padding=1: its border ring sees only zero
        # input, so each border pixel equals LeakyReLU(folded BN bias).
        assert pb["k"] == 1 and pb["s"] == 1 and pb["p"] == 1
        border = _leaky(pb["b"][0], LRELU_SLOPE).astype(y.dtype)
        ring = jnp.broadcast_to(border.reshape(1, 1, 1, CPAD),
                                (N, Ho + 2, Wo + 2, CPAD))
        y = jax.lax.dynamic_update_slice(ring, y, (0, 1, 1, 0))
    return y


def head_block(x, p7, fc):
    """Last Disconv + AdaptiveAvgPool2d((1,1)) + Linear + Sigmoid, one kernel."""
    patches, (N, Ho, Wo) = _im2col(x, p7["k"], p7["s"], p7["p"])
    M = N * Ho * Wo
    Mp = _round_up(M, 8)
    Np = _round_up(max(N, 8), 8)
    if Mp != M:
        patches = jnp.pad(patches, ((0, Mp - M), (0, 0)))
    rows = jnp.arange(Mp) // (Ho * Wo)             # sample id of each patch row
    pool = (rows[None, :] == jnp.arange(Np)[:, None]).astype(jnp.float32)
    pool = pool / float(Ho * Wo)                   # (Np, Mp) mean-pool matrix
    out = pallas_head(patches, pool, p7, fc)       # (Np, CPAD) f32
    return out[:N, :1]


def discriminator_forward(params, x_nchw):
    x = jnp.transpose(x_nchw, (0, 2, 3, 1)).astype(jnp.float32)    # NCHW -> NHWC
    x = jnp.pad(x, ((0, 0), (0, 0), (0, 0), (0, CPAD - x.shape[-1])))
    x = x.astype(jnp.bfloat16)                                     # lane-dense, bf16
    x = conv_block(x, params["conv1"])
    x = conv_block(x, params["conv2a"], params["conv2b"])
    x = conv_block(x, params["conv3a"], params["conv3b"])
    x = conv_block(x, params["conv4a"])
    return head_block(x, params["conv4b"], params["fc"])           # (N, 1) f32


if __name__ == "__main__":
    key = jax.random.PRNGKey(0)
    pkey, xkey = jax.random.split(key)
    params = init_discriminator(pkey, depth=1)
    x = jax.random.normal(xkey, (2, 3, 16, 16), dtype=jnp.float32)

    fwd = jax.jit(lambda inp: discriminator_forward(params, inp))
    y = fwd(x)
    jax.block_until_ready(y)
    assert y.shape == (2, 1), y.shape
    assert bool(jnp.all(jnp.isfinite(y)))
    assert bool(jnp.all((y >= 0) & (y <= 1)))
    print("KERNEL_OK")
</pallas_src>

<mosaic_0001>
module attributes {stable_mosaic.version = 11 : i64} {
  func.func @_conv_kernel(%arg0: i32, %arg1: memref<64x2048xbf16, #tpu.memory_space<vmem>>, %arg2: memref<2048x128xbf16, #tpu.memory_space<vmem>>, %arg3: memref<1x128xf32, #tpu.memory_space<vmem>>, %arg4: memref<64x128xbf16, #tpu.memory_space<vmem>>) attributes {dimension_semantics = [#tpu.dimension_semantics<parallel>], iteration_bounds = array<i64: 2>, scalar_prefetch = 0 : i64, scratch_operands = 0 : i64, tpu.core_type = #tpu.core_type<tc>, window_params = [{transform_indices = @transform_0, window_bounds = array<i64: 64, 2048>}, {pipeline_mode = #tpu.pipeline_mode<synchronous>, transform_indices = @transform_1, window_bounds = array<i64: 2048, 128>}, {pipeline_mode = #tpu.pipeline_mode<synchronous>, transform_indices = @transform_2, window_bounds = array<i64: 1, 128>}, {transform_indices = @transform_3, window_bounds = array<i64: 64, 128>}]} {
    %c0 = arith.constant 0 : index
    %c0_0 = arith.constant 0 : index
    %0 = vector.load %arg1[%c0, %c0_0] : memref<64x2048xbf16, #tpu.memory_space<vmem>>, vector<64x2048xbf16>
    %c0_1 = arith.constant 0 : index
    %c0_2 = arith.constant 0 : index
    %1 = vector.load %arg2[%c0_1, %c0_2] : memref<2048x128xbf16, #tpu.memory_space<vmem>>, vector<2048x128xbf16>
    %cst = arith.constant dense<0.000000e+00> : vector<64x128xf32>
    %2 = tpu.matmul %0, %1, %cst {dimension_numbers = #tpu.dot_dimension_numbers<[1], [0], [0], [1], [0, 0, 1, 1], [], []>} : vector<64x2048xbf16>, vector<2048x128xbf16>, vector<64x128xf32> -> vector<64x128xf32>
    %c0_3 = arith.constant 0 : index
    %c0_4 = arith.constant 0 : index
    %3 = vector.load %arg3[%c0_3, %c0_4] : memref<1x128xf32, #tpu.memory_space<vmem>>, vector<1x128xf32>
    %4 = vector.broadcast %3 : vector<1x128xf32> to vector<64x128xf32>
    %5 = arith.addf %2, %4 : vector<64x128xf32>
    %cst_5 = arith.constant 0.000000e+00 : f32
    %6 = vector.broadcast %cst_5 : f32 to vector<64x128xf32>
    %7 = arith.cmpf ogt, %5, %6 : vector<64x128xf32>
    %cst_6 = arith.constant 1.000000e-01 : f32
    %8 = vector.broadcast %cst_6 : f32 to vector<64x128xf32>
    %9 = arith.mulf %8, %5 : vector<64x128xf32>
    %10 = arith.select %7, %5, %9 : vector<64x128xi1>, vector<64x128xf32>
    %11 = arith.truncf %10 : vector<64x128xf32> to vector<64x128xbf16>
    %c0_7 = arith.constant 0 : index
    %c0_8 = arith.constant 0 : index
    %12 = vector.load %arg4[%c0_7, %c0_8] : memref<64x128xbf16, #tpu.memory_space<vmem>>, vector<64x128xbf16>
    tpu.vector_store %arg4[%c0_7, %c0_8], %11 {strides = array<i32>} : memref<64x128xbf16, #tpu.memory_space<vmem>>, vector<64x128xbf16>,
    return
  }
  func.func @transform_0(%arg0: i32) -> (i32, i32) {
    %c0_i32 = arith.constant 0 : i32
    %c0_i32_0 = arith.constant 0 : i32
    return %arg0, %c0_i32 : i32, i32
  }
  func.func @transform_1(%arg0: i32) -> (i32, i32) {
    %c0_i32 = arith.constant 0 : i32
    %c0_i32_0 = arith.constant 0 : i32
    %c0_i32_1 = arith.constant 0 : i32
    return %c0_i32, %c0_i32_0 : i32, i32
  }
  func.func @transform_2(%arg0: i32) -> (i32, i32) {
    %c0_i32 = arith.constant 0 : i32
    %c0_i32_0 = arith.constant 0 : i32
    %c0_i32_1 = arith.constant 0 : i32
    return %c0_i32, %c0_i32_0 : i32, i32
  }
  func.func @transform_3(%arg0: i32) -> (i32, i32) {
    %c0_i32 = arith.constant 0 : i32
    %c0_i32_0 = arith.constant 0 : i32
    return %arg0, %c0_i32 : i32, i32
  }
}

module attributes {stable_mosaic.version = 11 : i64} {
  func.func @_conv_pw_kernel(%arg0: i32, %arg1: memref<16x2048xbf16, #tpu.memory_space<vmem>>, %arg2: memref<2048x128xbf16, #tpu.memory_space<vmem>>, %arg3: memref<1x128xf32, #tpu.memory_space<vmem>>, %arg4: memref<128x128xbf16, #tpu.memory_space<vmem>>, %arg5: memref<1x128xf32, #tpu.memory_space<vmem>>, %arg6: memref<16x128xbf16, #tpu.memory_space<vmem>>) attributes {dimension_semantics = [#tpu.dimension_semantics<parallel>], iteration_bounds = array<i64: 2>, scalar_prefetch = 0 : i64, scratch_operands = 0 : i64, tpu.core_type = #tpu.core_type<tc>, window_params = [{transform_indices = @transform_0, window_bounds = array<i64: 16, 2048>}, {pipeline_mode = #tpu.pipeline_mode<synchronous>, transform_indices = @transform_1, window_bounds = array<i64: 2048, 128>}, {pipeline_mode = #tpu.pipeline_mode<synchronous>, transform_indices = @transform_2, window_bounds = array<i64: 1, 128>}, {pipeline_mode = #tpu.pipeline_mode<synchronous>, transform_indices = @transform_3, window_bounds = array<i64: 128, 128>}, {pipeline_mode = #tpu.pipeline_mode<synchronous>, transform_indices = @transform_4, window_bounds = array<i64: 1, 128>}, {transform_indices = @transform_5, window_bounds = array<i64: 16, 128>}]} {
    %c0 = arith.constant 0 : index
    %c0_0 = arith.constant 0 : index
    %0 = vector.load %arg1[%c0, %c0_0] : memref<16x2048xbf16, #tpu.memory_space<vmem>>, vector<16x2048xbf16>
    %c0_1 = arith.constant 0 : index
    %c0_2 = arith.constant 0 : index
    %1 = vector.load %arg2[%c0_1, %c0_2] : memref<2048x128xbf16, #tpu.memory_space<vmem>>, vector<2048x128xbf16>
    %cst = arith.constant dense<0.000000e+00> : vector<16x128xf32>
    %2 = tpu.matmul %0, %1, %cst {dimension_numbers = #tpu.dot_dimension_numbers<[1], [0], [0], [1], [0, 0, 1, 1], [], []>} : vector<16x2048xbf16>, vector<2048x128xbf16>, vector<16x128xf32> -> vector<16x128xf32>
    %c0_3 = arith.constant 0 : index
    %c0_4 = arith.constant 0 : index
    %3 = vector.load %arg3[%c0_3, %c0_4] : memref<1x128xf32, #tpu.memory_space<vmem>>, vector<1x128xf32>
    %4 = vector.broadcast %3 : vector<1x128xf32> to vector<16x128xf32>
    %5 = arith.addf %2, %4 : vector<16x128xf32>
    %cst_5 = arith.constant 0.000000e+00 : f32
    %6 = vector.broadcast %cst_5 : f32 to vector<16x128xf32>
    %7 = arith.cmpf ogt, %5, %6 : vector<16x128xf32>
    %cst_6 = arith.constant 1.000000e-01 : f32
    %8 = vector.broadcast %cst_6 : f32 to vector<16x128xf32>
    %9 = arith.mulf %8, %5 : vector<16x128xf32>
    %10 = arith.select %7, %5, %9 : vector<16x128xi1>, vector<16x128xf32>
    %11 = arith.truncf %10 : vector<16x128xf32> to vector<16x128xbf16>
    %c0_7 = arith.constant 0 : index
    %c0_8 = arith.constant 0 : index
    %12 = vector.load %arg4[%c0_7, %c0_8] : memref<128x128xbf16, #tpu.memory_space<vmem>>, vector<128x128xbf16>
    %cst_9 = arith.constant dense<0.000000e+00> : vector<16x128xf32>
    %13 = tpu.matmul %11, %12, %cst_9 {dimension_numbers = #tpu.dot_dimension_numbers<[1], [0], [0], [1], [0, 0, 1, 1], [], []>} : vector<16x128xbf16>, vector<128x128xbf16>, vector<16x128xf32> -> vector<16x128xf32>
    %c0_10 = arith.constant 0 : index
    %c0_11 = arith.constant 0 : index
    %14 = vector.load %arg5[%c0_10, %c0_11] : memref<1x128xf32, #tpu.memory_space<vmem>>, vector<1x128xf32>
    %15 = vector.broadcast %14 : vector<1x128xf32> to vector<16x128xf32>
    %16 = arith.addf %13, %15 : vector<16x128xf32>
    %cst_12 = arith.constant 0.000000e+00 : f32
    %17 = vector.broadcast %cst_12 : f32 to vector<16x128xf32>
    %18 = arith.cmpf ogt, %16, %17 : vector<16x128xf32>
    %cst_13 = arith.constant 1.000000e-01 : f32
    %19 = vector.broadcast %cst_13 : f32 to vector<16x128xf32>
    %20 = arith.mulf %19, %16 : vector<16x128xf32>
    %21 = arith.select %18, %16, %20 : vector<16x128xi1>, vector<16x128xf32>
    %22 = arith.truncf %21 : vector<16x128xf32> to vector<16x128xbf16>
    %c0_14 = arith.constant 0 : index
    %c0_15 = arith.constant 0 : index
    %23 = vector.load %arg6[%c0_14, %c0_15] : memref<16x128xbf16, #tpu.memory_space<vmem>>, vector<16x128xbf16>
    tpu.vector_store %arg6[%c0_14, %c0_15], %22 {strides = array<i32>} : memref<16x128xbf16, #tpu.memory_space<vmem>>, vector<16x128xbf16>,
    return
  }
  func.func @transform_0(%arg0: i32) -> (i32, i32) {
    %c0_i32 = arith.constant 0 : i32
    %c0_i32_0 = arith.constant 0 : i32
    return %arg0, %c0_i32 : i32, i32
  }
  func.func @transform_1(%arg0: i32) -> (i32, i32) {
    %c0_i32 = arith.constant 0 : i32
    %c0_i32_0 = arith.constant 0 : i32
    %c0_i32_1 = arith.constant 0 : i32
    return %c0_i32, %c0_i32_0 : i32, i32
  }
  func.func @transform_2(%arg0: i32) -> (i32, i32) {
    %c0_i32 = arith.constant 0 : i32
    %c0_i32_0 = arith.constant 0 : i32
    %c0_i32_1 = arith.constant 0 : i32
    return %c0_i32, %c0_i32_0 : i32, i32
  }
  func.func @transform_3(%arg0: i32) -> (i32, i32) {
    %c0_i32 = arith.constant 0 : i32
    %c0_i32_0 = arith.constant 0 : i32
    %c0_i32_1 = arith.constant 0 : i32
    return %c0_i32, %c0_i32_0 : i32, i32
  }
  func.func @transform_4(%arg0: i32) -> (i32, i32) {
    %c0_i32 = arith.constant 0 : i32
    %c0_i32_0 = arith.constant 0 : i32
    %c0_i32_1 = arith.constant 0 : i32
    return %c0_i32, %c0_i32_0 : i32, i32
  }
  func.func @transform_5(%arg0: i32) -> (i32, i32) {
    %c0_i32 = arith.constant 0 : i32
    %c0_i32_0 = arith.constant 0 : i32
    return %arg0, %c0_i32 : i32, i32
  }
}

module attributes {stable_mosaic.version = 11 : i64} {
  func.func @_conv_kernel(%arg0: i32, %arg1: memref<8x2048xbf16, #tpu.memory_space<vmem>>, %arg2: memref<2048x128xbf16, #tpu.memory_space<vmem>>, %arg3: memref<1x128xf32, #tpu.memory_space<vmem>>, %arg4: memref<8x128xbf16, #tpu.memory_space<vmem>>) attributes {dimension_semantics = [#tpu.dimension_semantics<parallel>], iteration_bounds = array<i64: 1>, scalar_prefetch = 0 : i64, scratch_operands = 0 : i64, tpu.core_type = #tpu.core_type<tc>, window_params = [{transform_indices = @transform_0, window_bounds = array<i64: 8, 2048>}, {pipeline_mode = #tpu.pipeline_mode<synchronous>, transform_indices = @transform_1, window_bounds = array<i64: 2048, 128>}, {pipeline_mode = #tpu.pipeline_mode<synchronous>, transform_indices = @transform_2, window_bounds = array<i64: 1, 128>}, {transform_indices = @transform_3, window_bounds = array<i64: 8, 128>}]} {
    %c0 = arith.constant 0 : index
    %c0_0 = arith.constant 0 : index
    %0 = vector.load %arg1[%c0, %c0_0] : memref<8x2048xbf16, #tpu.memory_space<vmem>>, vector<8x2048xbf16>
    %c0_1 = arith.constant 0 : index
    %c0_2 = arith.constant 0 : index
    %1 = vector.load %arg2[%c0_1, %c0_2] : memref<2048x128xbf16, #tpu.memory_space<vmem>>, vector<2048x128xbf16>
    %cst = arith.constant dense<0.000000e+00> : vector<8x128xf32>
    %2 = tpu.matmul %0, %1, %cst {dimension_numbers = #tpu.dot_dimension_numbers<[1], [0], [0], [1], [0, 0, 1, 1], [], []>} : vector<8x2048xbf16>, vector<2048x128xbf16>, vector<8x128xf32> -> vector<8x128xf32>
    %c0_3 = arith.constant 0 : index
    %c0_4 = arith.constant 0 : index
    %3 = vector.load %arg3[%c0_3, %c0_4] : memref<1x128xf32, #tpu.memory_space<vmem>>, vector<1x128xf32>
    %4 = vector.broadcast %3 : vector<1x128xf32> to vector<8x128xf32>
    %5 = arith.addf %2, %4 : vector<8x128xf32>
    %cst_5 = arith.constant 0.000000e+00 : f32
    %6 = vector.broadcast %cst_5 : f32 to vector<8x128xf32>
    %7 = arith.cmpf ogt, %5, %6 : vector<8x128xf32>
    %cst_6 = arith.constant 1.000000e-01 : f32
    %8 = vector.broadcast %cst_6 : f32 to vector<8x128xf32>
    %9 = arith.mulf %8, %5 : vector<8x128xf32>
    %10 = arith.select %7, %5, %9 : vector<8x128xi1>, vector<8x128xf32>
    %11 = arith.truncf %10 : vector<8x128xf32> to vector<8x128xbf16>
    %c0_7 = arith.constant 0 : index
    %c0_8 = arith.constant 0 : index
    %12 = vector.load %arg4[%c0_7, %c0_8] : memref<8x128xbf16, #tpu.memory_space<vmem>>, vector<8x128xbf16>
    tpu.vector_store %arg4[%c0_7, %c0_8], %11 {strides = array<i32>} : memref<8x128xbf16, #tpu.memory_space<vmem>>, vector<8x128xbf16>,
    return
  }
  func.func @transform_0(%arg0: i32) -> (i32, i32) {
    %c0_i32 = arith.constant 0 : i32
    %c0_i32_0 = arith.constant 0 : i32
    return %arg0, %c0_i32 : i32, i32
  }
  func.func @transform_1(%arg0: i32) -> (i32, i32) {
    %c0_i32 = arith.constant 0 : i32
    %c0_i32_0 = arith.constant 0 : i32
    %c0_i32_1 = arith.constant 0 : i32
    return %c0_i32, %c0_i32_0 : i32, i32
  }
  func.func @transform_2(%arg0: i32) -> (i32, i32) {
    %c0_i32 = arith.constant 0 : i32
    %c0_i32_0 = arith.constant 0 : i32
    %c0_i32_1 = arith.constant 0 : i32
    return %c0_i32, %c0_i32_0 : i32, i32
  }
  func.func @transform_3(%arg0: i32) -> (i32, i32) {
    %c0_i32 = arith.constant 0 : i32
    %c0_i32_0 = arith.constant 0 : i32
    return %arg0, %c0_i32 : i32, i32
  }
}

module attributes {stable_mosaic.version = 11 : i64} {
  func.func @_head_kernel(%arg0: i32, %arg1: memref<8x2048xbf16, #tpu.memory_space<vmem>>, %arg2: memref<2048x128xbf16, #tpu.memory_space<vmem>>, %arg3: memref<1x128xf32, #tpu.memory_space<vmem>>, %arg4: memref<8x8xf32, #tpu.memory_space<vmem>>, %arg5: memref<128x128xf32, #tpu.memory_space<vmem>>, %arg6: memref<1x128xf32, #tpu.memory_space<vmem>>, %arg7: memref<8x128xf32, #tpu.memory_space<vmem>>) attributes {dimension_semantics = [#tpu.dimension_semantics<arbitrary>], iteration_bounds = array<i64: 1>, scalar_prefetch = 0 : i64, scratch_operands = 0 : i64, tpu.core_type = #tpu.core_type<tc>, window_params = [{pipeline_mode = #tpu.pipeline_mode<synchronous>, transform_indices = @transform_0, window_bounds = array<i64: 8, 2048>}, {pipeline_mode = #tpu.pipeline_mode<synchronous>, transform_indices = @transform_1, window_bounds = array<i64: 2048, 128>}, {pipeline_mode = #tpu.pipeline_mode<synchronous>, transform_indices = @transform_2, window_bounds = array<i64: 1, 128>}, {pipeline_mode = #tpu.pipeline_mode<synchronous>, transform_indices = @transform_3, window_bounds = array<i64: 8, 8>}, {pipeline_mode = #tpu.pipeline_mode<synchronous>, transform_indices = @transform_4, window_bounds = array<i64: 128, 128>}, {pipeline_mode = #tpu.pipeline_mode<synchronous>, transform_indices = @transform_5, window_bounds = array<i64: 1, 128>}, {pipeline_mode = #tpu.pipeline_mode<synchronous>, transform_indices = @transform_6, window_bounds = array<i64: 8, 128>}]} {
    %c0 = arith.constant 0 : index
    %c0_0 = arith.constant 0 : index
    %0 = vector.load %arg1[%c0, %c0_0] : memref<8x2048xbf16, #tpu.memory_space<vmem>>, vector<8x2048xbf16>
    %c0_1 = arith.constant 0 : index
    %c0_2 = arith.constant 0 : index
    %1 = vector.load %arg2[%c0_1, %c0_2] : memref<2048x128xbf16, #tpu.memory_space<vmem>>, vector<2048x128xbf16>
    %cst = arith.constant dense<0.000000e+00> : vector<8x128xf32>
    %2 = tpu.matmul %0, %1, %cst {dimension_numbers = #tpu.dot_dimension_numbers<[1], [0], [0], [1], [0, 0, 1, 1], [], []>} : vector<8x2048xbf16>, vector<2048x128xbf16>, vector<8x128xf32> -> vector<8x128xf32>
    %c0_3 = arith.constant 0 : index
    %c0_4 = arith.constant 0 : index
    %3 = vector.load %arg3[%c0_3, %c0_4] : memref<1x128xf32, #tpu.memory_space<vmem>>, vector<1x128xf32>
    %4 = vector.broadcast %3 : vector<1x128xf32> to vector<8x128xf32>
    %5 = arith.addf %2, %4 : vector<8x128xf32>
    %cst_5 = arith.constant 0.000000e+00 : f32
    %6 = vector.broadcast %cst_5 : f32 to vector<8x128xf32>
    %7 = arith.cmpf ogt, %5, %6 : vector<8x128xf32>
    %cst_6 = arith.constant 1.000000e-01 : f32
    %8 = vector.broadcast %cst_6 : f32 to vector<8x128xf32>
    %9 = arith.mulf %8, %5 : vector<8x128xf32>
    %10 = arith.select %7, %5, %9 : vector<8x128xi1>, vector<8x128xf32>
    %c0_7 = arith.constant 0 : index
    %c0_8 = arith.constant 0 : index
    %11 = vector.load %arg4[%c0_7, %c0_8] : memref<8x8xf32, #tpu.memory_space<vmem>>, vector<8x8xf32>
    %cst_9 = arith.constant dense<0.000000e+00> : vector<8x128xf32>
    %12 = tpu.matmul %11, %10, %cst_9 {dimension_numbers = #tpu.dot_dimension_numbers<[1], [0], [0], [1], [0, 0, 1, 1], [], []>} : vector<8x8xf32>, vector<8x128xf32>, vector<8x128xf32> -> vector<8x128xf32>
    %c0_10 = arith.constant 0 : index
    %c0_11 = arith.constant 0 : index
    %13 = vector.load %arg5[%c0_10, %c0_11] : memref<128x128xf32, #tpu.memory_space<vmem>>, vector<128x128xf32>
    %cst_12 = arith.constant dense<0.000000e+00> : vector<8x128xf32>
    %14 = tpu.matmul %12, %13, %cst_12 {dimension_numbers = #tpu.dot_dimension_numbers<[1], [0], [0], [1], [0, 0, 1, 1], [], []>} : vector<8x128xf32>, vector<128x128xf32>, vector<8x128xf32> -> vector<8x128xf32>
    %c0_13 = arith.constant 0 : index
    %c0_14 = arith.constant 0 : index
    %15 = vector.load %arg6[%c0_13, %c0_14] : memref<1x128xf32, #tpu.memory_space<vmem>>, vector<1x128xf32>
    %16 = vector.broadcast %15 : vector<1x128xf32> to vector<8x128xf32>
    %17 = arith.addf %14, %16 : vector<8x128xf32>
    %18 = arith.negf %17 : vector<8x128xf32>
    %19 = math.exp %18 : vector<8x128xf32>
    %cst_15 = arith.constant 1.000000e+00 : f32
    %20 = vector.broadcast %cst_15 : f32 to vector<8x128xf32>
    %21 = arith.addf %20, %19 : vector<8x128xf32>
    %22 = arith.divf %20, %21 : vector<8x128xf32>
    %c0_16 = arith.constant 0 : index
    %c0_17 = arith.constant 0 : index
    %23 = vector.load %arg7[%c0_16, %c0_17] : memref<8x128xf32, #tpu.memory_space<vmem>>, vector<8x128xf32>
    tpu.vector_store %arg7[%c0_16, %c0_17], %22 {strides = array<i32>} : memref<8x128xf32, #tpu.memory_space<vmem>>, vector<8x128xf32>,
    return
  }
  func.func @transform_0(%arg0: i32) -> (i32, i32) {
    %c0_i32 = arith.constant 0 : i32
    %c0_i32_0 = arith.constant 0 : i32
    %c0_i32_1 = arith.constant 0 : i32
    return %c0_i32, %c0_i32_0 : i32, i32
  }
  func.func @transform_1(%arg0: i32) -> (i32, i32) {
    %c0_i32 = arith.constant 0 : i32
    %c0_i32_0 = arith.constant 0 : i32
    %c0_i32_1 = arith.constant 0 : i32
    return %c0_i32, %c0_i32_0 : i32, i32
  }
  func.func @transform_2(%arg0: i32) -> (i32, i32) {
    %c0_i32 = arith.constant 0 : i32
    %c0_i32_0 = arith.constant 0 : i32
    %c0_i32_1 = arith.constant 0 : i32
    return %c0_i32, %c0_i32_0 : i32, i32
  }
  func.func @transform_3(%arg0: i32) -> (i32, i32) {
    %c0_i32 = arith.constant 0 : i32
    %c0_i32_0 = arith.constant 0 : i32
    %c0_i32_1 = arith.constant 0 : i32
    return %c0_i32, %c0_i32_0 : i32, i32
  }
  func.func @transform_4(%arg0: i32) -> (i32, i32) {
    %c0_i32 = arith.constant 0 : i32
    %c0_i32_0 = arith.constant 0 : i32
    %c0_i32_1 = arith.constant 0 : i32
    return %c0_i32, %c0_i32_0 : i32, i32
  }
  func.func @transform_5(%arg0: i32) -> (i32, i32) {
    %c0_i32 = arith.constant 0 : i32
    %c0_i32_0 = arith.constant 0 : i32
    %c0_i32_1 = arith.constant 0 : i32
    return %c0_i32, %c0_i32_0 : i32, i32
  }
  func.func @transform_6(%arg0: i32) -> (i32, i32) {
    %c0_i32 = arith.constant 0 : i32
    %c0_i32_0 = arith.constant 0 : i32
    %c0_i32_1 = arith.constant 0 : i32
    return %c0_i32, %c0_i32_0 : i32, i32
  }
}

</mosaic_0001>

<bundles_post_ra>
// kernel: _lambda_.5
= control target key start
LH: loop header
LB: loop body
LE: loop exit
PB: predicated region body
PF: predicated region fallthrough
CT: control target
= control target key end

     0   :  { %s2962_s12 = smov 0   ;;  %s3489_s0 = inlined_call_operand.vmem [shape: bf16[128,2048], index: 0, kind: input, shape index: {}]   ;;  %s3490_s1 = inlined_call_operand.vmem [shape: bf16[2048,128], index: 1, kind: input, shape index: {}]   ;;  %s3491_s2 = inlined_call_operand.vmem [shape: f32[1,128], index: 2, kind: input, shape index: {}]   ;;  %s3492_s3 = inlined_call_operand.vmem [shape: bf16[128,128], index: 3, kind: output, shape index: {}]  }
   0x1 LB: > { %s2233_s13 = sadd.s32 4294967295, %s2940_s12   ;;  %p2237_p0 = scmp.ge.s32.totalorder %s2940_s12, 1  ;;  %s2940_s12 = sphi %s2962_s12, %s13_s12  }
   0x2   : > { %p139_p1 = scmp.lt.s32.totalorder %s2940_s12, 3 }
   0x4   : > { %p140_p2 = pnand %p2237_p0, %p139_p1 }
   0x5   : > { %v2806_v0 = vld [vmem:[%s3490_s1 + $0x40] sm:$0xff] (!%p140_p2)   ;;  %v2810_v4 = vld [vmem:[%s3490_s1 + $0x48] sm:$0xff] (!%p140_p2)   ;;  %v2814_v8 = vld [vmem:[%s3490_s1 + $0x50] sm:$0xff] (!%p140_p2)   ;;  %s2238_s21 = sshll.u32 (!%p140_p2), %s2233_s13, 3 }
   0x6   : > { %143 = sbr.rel (%p140_p2) target bundleno = 386 (0x182), region = 32  ;;  %v2807_v1 = vld [vmem:[%s3490_s1 + $0xc0] sm:$0xff] (!%p140_p2)   ;;  %2478 = vmatprep.subr.bf16.mxu0 (!%p140_p2), %v2806_v0  ;;  %v2811_v5 = vld [vmem:[%s3490_s1 + $0xc8] sm:$0xff] (!%p140_p2)   ;;  %v2815_v9 = vld [vmem:[%s3490_s1 + $0xd0] sm:$0xff] (!%p140_p2)   ;;  %p165_p3 = scmp.lt.s32.totalorder (!%p140_p2), %s2238_s21, 15 }
   0x7   : > { %v2808_v2 = vld [vmem:[%s3490_s1] sm:$0xff] (!%p140_p2)   ;;  %2518 = vmatprep.subr.bf16.mxu1 (!%p140_p2), %v2807_v1  ;;  %v2812_v6 = vld [vmem:[%s3490_s1 + $0x8] sm:$0xff] (!%p140_p2)   ;;  %v2816_v10 = vld [vmem:[%s3490_s1 + $0x10] sm:$0xff] (!%p140_p2)  }
   0x8   : > { %v2809_v3 = vld [vmem:[%s3490_s1 + $0x80] sm:$0xff] (!%p140_p2)   ;;  %2479 = vmatpush3.bf16.msra.mxu0 (!%p140_p2), %v2808_v2  ;;  %v2813_v7 = vld [vmem:[%s3490_s1 + $0x88] sm:$0xff] (!%p140_p2)   ;;  %v2817_v11 = vld [vmem:[%s3490_s1 + $0x90] sm:$0xff] (!%p140_p2)  }
   0x9   : > { %2519 = vmatpush3.bf16.msra.mxu1 (!%p140_p2), %v2809_v3  ;;  %2480 = vmatprep.subr.bf16.mxu0 (!%p140_p2), %v2810_v4  ;;  %v2818_v12 = vld [vmem:[%s3490_s1 + $0x58] sm:$0xff] (!%p140_p2)   ;;  %v2822_v16 = vld [vmem:[%s3490_s1 + $0x60] sm:$0xff] (!%p140_p2)   ;;  %v2826_v20 = vld [vmem:[%s3490_s1 + $0x68] sm:$0xff] (!%p140_p2)  }
   0xa   : > { %2520 = vmatprep.subr.bf16.mxu1 (!%p140_p2), %v2811_v5  ;;  %v2819_v13 = vld [vmem:[%s3490_s1 + $0xd8] sm:$0xff] (!%p140_p2)   ;;  %v2823_v17 = vld [vmem:[%s3490_s1 + $0xe0] sm:$0xff] (!%p140_p2)   ;;  %v2827_v21 = vld [vmem:[%s3490_s1 + $0xe8] sm:$0xff] (!%p140_p2)  }
   0xb   : > { %v2820_v14 = vld [vmem:[%s3490_s1 + $0x18] sm:$0xff] (!%p140_p2)   ;;  %v2824_v18 = vld [vmem:[%s3490_s1 + $0x20] sm:$0xff] (!%p140_p2)   ;;  %v2828_v22 = vld [vmem:[%s3490_s1 + $0x28] sm:$0xff] (!%p140_p2)  }
   0xc   : > { %2481 = vmatpush3.bf16.msra.mxu0 (!%p140_p2), %v2812_v6  ;;  %v2821_v15 = vld [vmem:[%s3490_s1 + $0x98] sm:$0xff] (!%p140_p2)   ;;  %v2825_v19 = vld [vmem:[%s3490_s1 + $0xa0] sm:$0xff] (!%p140_p2)   ;;  %v2829_v23 = vld [vmem:[%s3490_s1 + $0xa8] sm:$0xff] (!%p140_p2)  }
   0xd   : > { %2521 = vmatpush3.bf16.msra.mxu1 %v2813_v7  ;;  %2482 = vmatprep.subr.bf16.mxu0 %v2814_v8  ;;  %s3494_s21 = smov (!%p165_p3, %s2238_s21), 15  ;;  %v2830_v24 = vld [vmem:[%s3490_s1 + $0x70] sm:$0xff]   ;;  %v2834_v28 = vld [vmem:[%s3490_s1 + $0x78] sm:$0xff]   ;;  %v2838_v40 = vld [vmem:[%s3490_s1 + $0x140] sm:$0xff]  }
   0xe   : > { %2522 = vmatprep.subr.bf16.mxu1 %v2815_v9  ;;  %v2831_v25 = vld [vmem:[%s3490_s1 + $0xf0] sm:$0xff]   ;;  %s2446_s18 = sshll.u32 %s3494_s21, 6  ;;  %v2835_v29 = vld [vmem:[%s3490_s1 + $0xf8] sm:$0xff]   ;;  %v2839_v41 = vld [vmem:[%s3490_s1 + $0x1c0] sm:$0xff]  }
   0xf   : > { %v2832_v26 = vld [vmem:[%s3490_s1 + $0x30] sm:$0xff]   ;;  %s3068_s28 = scalar_lea.vmem %s3489_s0, %s2446_s18  ;;  %v2836_v30 = vld [vmem:[%s3490_s1 + $0x38] sm:$0xff]   ;;  %v2840_v42 = vld [vmem:[%s3490_s1 + $0x100] sm:$0xff]  }
  0x10   : > { %2483 = vmatpush3.bf16.msra.mxu0 %v2816_v10  ;;  %v2833_v27 = vld [vmem:[%s3490_s1 + $0xb0] sm:$0xff]   ;;  %v2837_v31 = vld [vmem:[%s3490_s1 + $0xb8] sm:$0xff]   ;;  %v178_v32 = vld [vmem:[%s3068_s28] sm:$0xff] }
  0x11   : > { %2523 = vmatpush3.bf16.msra.mxu1 %v2817_v11  ;;  %2484 = vmatprep.subr.bf16.mxu0 %v2818_v12  ;;  %v186_v33 = vld [vmem:[%s3068_s28 + $0x40] sm:$0xff]  ;;  %v179_v34 = vld [vmem:[%s3068_s28 + $0x8] sm:$0xff]  ;;  %v2846_v56 = vld [vmem:[%s3490_s1 + $0x150] sm:$0xff]  }
  0x12   : > { %2524 = vmatprep.subr.bf16.mxu1 %v2819_v13  ;;  %v2244_v35 = vcombine.low %v178_v32, %v186_v33  ;;  %v2245_v36 = vcombine.high %v178_v32, %v186_v33  ;;  %v187_v37 = vld [vmem:[%s3068_s28 + $0x48] sm:$0xff]  ;;  %v2841_v43 = vld [vmem:[%s3490_s1 + $0x180] sm:$0xff]   ;;  %v2847_v57 = vld [vmem:[%s3490_s1 + $0x1d0] sm:$0xff]  }
  0x13   : > { %v2246_v38 = vcombine.low %v179_v34, %v187_v37  ;;  %v2247_v39 = vcombine.high %v179_v34, %v187_v37  ;;  %v2842_v44 = vld [vmem:[%s3490_s1 + $0x148] sm:$0xff]   ;;  %v194_v48 = vld [vmem:[%s3068_s28 + $0x80] sm:$0xff]  ;;  %v2848_v58 = vld [vmem:[%s3490_s1 + $0x110] sm:$0xff]  }
  0x14   : > { %2485 = vmatpush3.bf16.msra.mxu0 %v2820_v14  ;;  %1625 = vmatprep.mubr.bf16.mxu0 %v2245_v36  ;;  %v2843_v45 = vld [vmem:[%s3490_s1 + $0x1c8] sm:$0xff]   ;;  %v202_v49 = vld [vmem:[%s3068_s28 + $0xc0] sm:$0xff]  ;;  %v2849_v59 = vld [vmem:[%s3490_s1 + $0x190] sm:$0xff]  }
  0x15   : > { %2525 = vmatpush3.bf16.msra.mxu1 %v2821_v15  ;;  %2486 = vmatprep.subr.bf16.mxu0 %v2822_v16  ;;  %v2844_v46 = vld [vmem:[%s3490_s1 + $0x108] sm:$0xff]   ;;  %v2261_v50 = vcombine.high %v194_v48, %v202_v49  ;;  %v2260_v53 = vcombine.low %v194_v48, %v202_v49  ;;  %v2850_v60 = vld [vmem:[%s3490_s1 + $0x158] sm:$0xff]   ;;  %v210_v0 = vld [vmem:[%s3068_s28 + $0x100] sm:$0xff] }
  0x16   : > { %2526 = vmatprep.subr.bf16.mxu1 %v2823_v17  ;;  %1690 = vmatprep.mubr.bf16.mxu1 %v2247_v39  ;;  %v2845_v47 = vld [vmem:[%s3490_s1 + $0x188] sm:$0xff]   ;;  %v2851_v61 = vld [vmem:[%s3490_s1 + $0x1d8] sm:$0xff]   ;;  %v218_v1 = vld [vmem:[%s3068_s28 + $0x140] sm:$0xff] }
  0x17   : > { %v195_v51 = vld [vmem:[%s3068_s28 + $0x88] sm:$0xff]  ;;  %v2852_v62 = vld [vmem:[%s3490_s1 + $0x118] sm:$0xff]   ;;  %v2277_v4 = vcombine.high %v210_v0, %v218_v1  ;;  %v2276_v6 = vcombine.low %v210_v0, %v218_v1  ;;  %v2854_v8 = vld [vmem:[%s3490_s1 + $0x160] sm:$0xff]  }
  0x18   : > { %2487 = vmatpush3.bf16.msra.mxu0 %v2824_v18  ;;  %v203_v52 = vld [vmem:[%s3068_s28 + $0xc8] sm:$0xff]  ;;  %v2853_v63 = vld [vmem:[%s3490_s1 + $0x198] sm:$0xff]   ;;  %v2855_v9 = vld [vmem:[%s3490_s1 + $0x1e0] sm:$0xff]  }
  0x19   : > { %2527 = vmatpush3.bf16.msra.mxu1 %v2825_v19  ;;  %2488 = vmatprep.subr.bf16.mxu0 %v2826_v20  ;;  %v2263_v54 = vcombine.high %v195_v51, %v203_v52  ;;  %v2262_v55 = vcombine.low %v195_v51, %v203_v52  ;;  %v211_v2 = vld [vmem:[%s3068_s28 + $0x108] sm:$0xff]  ;;  %v2856_v10 = vld [vmem:[%s3490_s1 + $0x120] sm:$0xff]   ;;  %v180_v32 = vld [vmem:[%s3068_s28 + $0x10] sm:$0xff] }
  0x1a   : > { %2528 = vmatprep.subr.bf16.mxu1 %v2827_v21  ;;  %v219_v3 = vld [vmem:[%s3068_s28 + $0x148] sm:$0xff]  ;;  %v2857_v11 = vld [vmem:[%s3490_s1 + $0x1a0] sm:$0xff]   ;;  %v188_v33 = vld [vmem:[%s3068_s28 + $0x50] sm:$0xff] }
  0x1b   : > { %v2279_v5 = vcombine.high %v211_v2, %v219_v3  ;;  %v2278_v7 = vcombine.low %v211_v2, %v219_v3  ;;  %v2858_v12 = vld [vmem:[%s3490_s1 + $0x168] sm:$0xff]   ;;  %v226_v16 = vld [vmem:[%s3068_s28 + $0x180] sm:$0xff]  ;;  %v2248_v34 = vcombine.low %v180_v32, %v188_v33  ;;  %v181_v36 = vld [vmem:[%s3068_s28 + $0x18] sm:$0xff] }
  0x1c   : > { %2489 = vmatpush3.bf16.msra.mxu0 %v2828_v22  ;;  %v2859_v13 = vld [vmem:[%s3490_s1 + $0x1e8] sm:$0xff]   ;;  %v234_v17 = vld [vmem:[%s3068_s28 + $0x1c0] sm:$0xff]  ;;  %v189_v37 = vld [vmem:[%s3068_s28 + $0x58] sm:$0xff] }
  0x1d   : > { %2529 = vmatpush3.bf16.msra.mxu1 %v2829_v23  ;;  %2490 = vmatprep.subr.bf16.mxu0 %v2830_v24  ;;  %v2860_v14 = vld [vmem:[%s3490_s1 + $0x128] sm:$0xff]   ;;  %v2293_v19 = vcombine.high %v226_v16, %v234_v17  ;;  %v2292_v21 = vcombine.low %v226_v16, %v234_v17  ;;  %v2862_v24 = vld [vmem:[%s3490_s1 + $0x170] sm:$0xff]   ;;  %v2251_v39 = vcombine.high %v181_v36, %v189_v37  ;;  %v205_v51 = vld [vmem:[%s3068_s28 + $0xd8] sm:$0xff] }
  0x1e   : > { %2530 = vmatprep.subr.bf16.mxu1 %v2831_v25  ;;  %v2861_v15 = vld [vmem:[%s3490_s1 + $0x1a8] sm:$0xff]   ;;  %v2863_v25 = vld [vmem:[%s3490_s1 + $0x1f0] sm:$0xff]   ;;  %v213_v2 = vld [vmem:[%s3068_s28 + $0x118] sm:$0xff] }
  0x1f   : > { %v227_v18 = vld [vmem:[%s3068_s28 + $0x188] sm:$0xff]  ;;  %v196_v48 = vld [vmem:[%s3068_s28 + $0x90] sm:$0xff] }
  0x20   : > { %2491 = vmatpush3.bf16.msra.mxu0 %v2832_v26  ;;  %v235_v20 = vld [vmem:[%s3068_s28 + $0x1c8] sm:$0xff]  ;;  %v2864_v26 = vld [vmem:[%s3490_s1 + $0x130] sm:$0xff]  }
  0x21   : > { %2531 = vmatpush3.bf16.msra.mxu1 %v2833_v27  ;;  %2492 = vmatprep.subr.bf16.mxu0 %v2834_v28  ;;  %v2295_v22 = vcombine.high %v227_v18, %v235_v20  ;;  %v2294_v23 = vcombine.low %v227_v18, %v235_v20  ;;  %v2865_v27 = vld [vmem:[%s3490_s1 + $0x1b0] sm:$0xff]   ;;  %v2866_v28 = vld [vmem:[%s3490_s1 + $0x178] sm:$0xff]  }
  0x22   : > { %2532 = vmatprep.subr.bf16.mxu1 %v2835_v29  ;;  %v2867_v29 = vld [vmem:[%s3490_s1 + $0x1f8] sm:$0xff]   ;;  %v204_v49 = vld [vmem:[%s3068_s28 + $0xd0] sm:$0xff] }
  0x23   : > { %v2265_v52 = vcombine.high %v196_v48, %v204_v49  ;;  %v212_v0 = vld [vmem:[%s3068_s28 + $0x110] sm:$0xff]  ;;  %v237_v20 = vld [vmem:[%s3068_s28 + $0x1d8] sm:$0xff] }
  0x24   : > { %2493 = vmatpush3.bf16.msra.mxu0 %v2836_v30  ;;  %v2868_v30 = vld [vmem:[%s3490_s1 + $0x138] sm:$0xff]   ;;  %v220_v1 = vld [vmem:[%s3068_s28 + $0x150] sm:$0xff] }
  0x25   : > { %2533 = vmatpush3.bf16.msra.mxu1 %v2837_v31  ;;  %2558 = vmatprep.subr.bf16.mxu0 %v2838_v40  ;;  %v2869_v31 = vld [vmem:[%s3490_s1 + $0x1b8] sm:$0xff]   ;;  %v2870_v40 = vld [vmem:[%s3490_s1 + $0x240] sm:$0xff]   ;;  %v2281_v3 = vcombine.high %v212_v0, %v220_v1  ;;  %v228_v16 = vld [vmem:[%s3068_s28 + $0x190] sm:$0xff] }
  0x26   : > { %2598 = vmatprep.subr.bf16.mxu1 %v2839_v41  ;;  %v2871_v41 = vld [vmem:[%s3490_s1 + $0x2c0] sm:$0xff]   ;;  %v236_v17 = vld [vmem:[%s3068_s28 + $0x1d0] sm:$0xff] }
  0x27   : > { %1626 = vmatmul.mubr.bf16.vlgmr.msra.gmra.mrb[0].mxu0 %v2244_v35  ;;  %v2249_v35 = vcombine.high %v180_v32, %v188_v33  ;;  %v2297_v18 = vcombine.high %v228_v16, %v236_v17  ;;  %v182_v32 = vld [vmem:[%s3068_s28 + $0x20] sm:$0xff] }
  0x28   : > { %1691 = vmatmul.mubr.bf16.vlgmr.msra.gmra.mrb[0].mxu1 %v2246_v38  ;;  %2559 = vmatpush3.bf16.msra.mxu0 %v2840_v42  ;;  %v2250_v38 = vcombine.low %v181_v36, %v189_v37  ;;  %v2872_v42 = vld [vmem:[%s3490_s1 + $0x200] sm:$0xff]  }
  0x29   : > { %2599 = vmatpush3.bf16.msra.mxu1 %v2841_v43  ;;  %2560 = vmatprep.subr.bf16.mxu0 %v2842_v44  ;;  %v2873_v43 = vld [vmem:[%s3490_s1 + $0x280] sm:$0xff]   ;;  %v2874_v44 = vld [vmem:[%s3490_s1 + $0x248] sm:$0xff]  }
  0x2a   : > { %2600 = vmatprep.subr.bf16.mxu1 %v2843_v45  ;;  %1633 = vmatprep.mubr.bf16.mxu0 %v2261_v50  ;;  %v2875_v45 = vld [vmem:[%s3490_s1 + $0x2c8] sm:$0xff]   ;;  %v197_v50 = vld [vmem:[%s3068_s28 + $0x98] sm:$0xff]  ;;  %v190_v33 = vld [vmem:[%s3068_s28 + $0x60] sm:$0xff] }
  0x2b   : > { %1698 = vmatprep.mubr.bf16.mxu1 %v2263_v54  ;;  %v2264_v54 = vcombine.low %v196_v48, %v204_v49  ;;  %v2252_v36 = vcombine.low %v182_v32, %v190_v33  ;;  %v2253_v37 = vcombine.high %v182_v32, %v190_v33  ;;  %v198_v48 = vld [vmem:[%s3068_s28 + $0xa0] sm:$0xff]  ;;  %v184_v32 = vld [vmem:[%s3068_s28 + $0x30] sm:$0xff] }
  0x2c   : > { %2561 = vmatpush3.bf16.msra.mxu0 %v2844_v46  ;;  %v2876_v46 = vld [vmem:[%s3490_s1 + $0x208] sm:$0xff]   ;;  %v206_v49 = vld [vmem:[%s3068_s28 + $0xe0] sm:$0xff]  ;;  %v192_v33 = vld [vmem:[%s3068_s28 + $0x70] sm:$0xff] }
  0x2d   : > { %2601 = vmatpush3.bf16.msra.mxu1 %v2845_v47  ;;  %2562 = vmatprep.subr.bf16.mxu0 %v2846_v56  ;;  %v2877_v47 = vld [vmem:[%s3490_s1 + $0x288] sm:$0xff]   ;;  %v2878_v56 = vld [vmem:[%s3490_s1 + $0x250] sm:$0xff]  }
  0x2e   : > { %2602 = vmatprep.subr.bf16.mxu1 %v2847_v57  ;;  %v2879_v57 = vld [vmem:[%s3490_s1 + $0x2d0] sm:$0xff]  }
  0x2f   : > { %1634 = vmatmul.mubr.bf16.gmra.mrb[4].mxu0 %v2260_v53  ;;  %v2267_v53 = vcombine.high %v197_v50, %v205_v51 }
  0x30   : > { %1699 = vmatmul.mubr.bf16.gmra.mrb[4].mxu1 %v2262_v55  ;;  %2563 = vmatpush3.bf16.msra.mxu0 %v2848_v58  ;;  %v2266_v55 = vcombine.low %v197_v50, %v205_v51  ;;  %v2880_v58 = vld [vmem:[%s3490_s1 + $0x210] sm:$0xff]   ;;  %v199_v50 = vld [vmem:[%s3068_s28 + $0xa8] sm:$0xff]  ;;  %v2269_v51 = vcombine.high %v198_v48, %v206_v49 }
  0x31   : > { %2603 = vmatpush3.bf16.msra.mxu1 %v2849_v59  ;;  %2564 = vmatprep.subr.bf16.mxu0 %v2850_v60  ;;  %v2881_v59 = vld [vmem:[%s3490_s1 + $0x290] sm:$0xff]   ;;  %v2882_v60 = vld [vmem:[%s3490_s1 + $0x258] sm:$0xff]  }
  0x32   : > { %2604 = vmatprep.subr.bf16.mxu1 %v2851_v61  ;;  %1641 = vmatprep.mubr.bf16.mxu0 %v2277_v4  ;;  %v2883_v61 = vld [vmem:[%s3490_s1 + $0x2d8] sm:$0xff]  }
  0x33   : > { %1706 = vmatprep.mubr.bf16.mxu1 %v2279_v5  ;;  %v221_v4 = vld [vmem:[%s3068_s28 + $0x158] sm:$0xff]  ;;  %v2280_v5 = vcombine.low %v212_v0, %v220_v1  ;;  %v214_v0 = vld [vmem:[%s3068_s28 + $0x120] sm:$0xff] }
  0x34   : > { %2565 = vmatpush3.bf16.msra.mxu0 %v2852_v62  ;;  %v2884_v62 = vld [vmem:[%s3490_s1 + $0x218] sm:$0xff]   ;;  %v222_v1 = vld [vmem:[%s3068_s28 + $0x160] sm:$0xff] }
  0x35   : > { %2605 = vmatpush3.bf16.msra.mxu1 %v2853_v63  ;;  %2566 = vmatprep.subr.bf16.mxu0 %v2854_v8  ;;  %v2885_v63 = vld [vmem:[%s3490_s1 + $0x298] sm:$0xff]   ;;  %v2886_v8 = vld [vmem:[%s3490_s1 + $0x260] sm:$0xff]  }
  0x36   : > { %2606 = vmatprep.subr.bf16.mxu1 %v2855_v9  ;;  %v2887_v9 = vld [vmem:[%s3490_s1 + $0x2e0] sm:$0xff]  }
  0x37   : > { %1642 = vmatmul.mubr.bf16.gmra.mrb[8].mxu0 %v2276_v6  ;;  %v2283_v6 = vcombine.high %v213_v2, %v221_v4 }
  0x38   : > { %1707 = vmatmul.mubr.bf16.gmra.mrb[8].mxu1 %v2278_v7  ;;  %2567 = vmatpush3.bf16.msra.mxu0 %v2856_v10  ;;  %v2282_v7 = vcombine.low %v213_v2, %v221_v4  ;;  %v2888_v10 = vld [vmem:[%s3490_s1 + $0x220] sm:$0xff]   ;;  %v2285_v2 = vcombine.high %v214_v0, %v222_v1  ;;  %v223_v4 = vld [vmem:[%s3068_s28 + $0x168] sm:$0xff] }
  0x39   : > { %2607 = vmatpush3.bf16.msra.mxu1 %v2857_v11  ;;  %2568 = vmatprep.subr.bf16.mxu0 %v2858_v12  ;;  %v2889_v11 = vld [vmem:[%s3490_s1 + $0x2a0] sm:$0xff]   ;;  %v2890_v12 = vld [vmem:[%s3490_s1 + $0x268] sm:$0xff]  }
  0x3a   : > { %2608 = vmatprep.subr.bf16.mxu1 %v2859_v13  ;;  %1649 = vmatprep.mubr.bf16.mxu0 %v2293_v19  ;;  %v2891_v13 = vld [vmem:[%s3490_s1 + $0x2e8] sm:$0xff]   ;;  %v229_v19 = vld [vmem:[%s3068_s28 + $0x198] sm:$0xff] }
  0x3b   : > { %1714 = vmatprep.mubr.bf16.mxu1 %v2295_v22  ;;  %v2299_v22 = vcombine.high %v229_v19, %v237_v20 }
  0x3c   : > { %2569 = vmatpush3.bf16.msra.mxu0 %v2860_v14  ;;  %v2892_v14 = vld [vmem:[%s3490_s1 + $0x228] sm:$0xff]  }
  0x3d   : > { %2609 = vmatpush3.bf16.msra.mxu1 %v2861_v15  ;;  %2570 = vmatprep.subr.bf16.mxu0 %v2862_v24  ;;  %v2893_v15 = vld [vmem:[%s3490_s1 + $0x2a8] sm:$0xff]   ;;  %v2894_v24 = vld [vmem:[%s3490_s1 + $0x270] sm:$0xff]  }
  0x3e   : > { %2610 = vmatprep.subr.bf16.mxu1 %v2863_v25  ;;  %v2895_v25 = vld [vmem:[%s3490_s1 + $0x2f0] sm:$0xff]  }
  0x3f   : > { %1650 = vmatmul.mubr.bf16.gmra.mrb[12].mxu0 %v2292_v21  ;;  %v2296_v21 = vcombine.low %v228_v16, %v236_v17  ;;  %v230_v16 = vld [vmem:[%s3068_s28 + $0x1a0] sm:$0xff] }
  0x40   : > { %1715 = vmatmul.mubr.bf16.gmra.mrb[12].mxu1 %v2294_v23  ;;  %2571 = vmatpush3.bf16.msra.mxu0 %v2864_v26  ;;  %v2298_v23 = vcombine.low %v229_v19, %v237_v20  ;;  %v2896_v26 = vld [vmem:[%s3490_s1 + $0x230] sm:$0xff]   ;;  %v238_v17 = vld [vmem:[%s3068_s28 + $0x1e0] sm:$0xff]  ;;  %v239_v19 = vld [vmem:[%s3068_s28 + $0x1e8] sm:$0xff] }
  0x41   : > { %2611 = vmatpush3.bf16.msra.mxu1 %v2865_v27  ;;  %2572 = vmatprep.subr.bf16.mxu0 %v2866_v28  ;;  %v2897_v27 = vld [vmem:[%s3490_s1 + $0x2b0] sm:$0xff]   ;;  %v2898_v28 = vld [vmem:[%s3490_s1 + $0x278] sm:$0xff]   ;;  %v2301_v20 = vcombine.high %v230_v16, %v238_v17 }
  0x42   : > { %2612 = vmatprep.subr.bf16.mxu1 %v2867_v29  ;;  %1755 = vmatprep.mubr.bf16.mxu0 %v2249_v35  ;;  %v2899_v29 = vld [vmem:[%s3490_s1 + $0x2f8] sm:$0xff]   ;;  %v191_v35 = vld [vmem:[%s3068_s28 + $0x68] sm:$0xff] }
  0x43   : > { %1820 = vmatprep.mubr.bf16.mxu1 %v2251_v39 }
  0x44   : > { %2573 = vmatpush3.bf16.msra.mxu0 %v2868_v30  ;;  %v2900_v30 = vld [vmem:[%s3490_s1 + $0x238] sm:$0xff]  }
  0x45   : > { %2613 = vmatpush3.bf16.msra.mxu1 %v2869_v31  ;;  %2638 = vmatprep.subr.bf16.mxu0 %v2870_v40  ;;  %v2901_v31 = vld [vmem:[%s3490_s1 + $0x2b8] sm:$0xff]   ;;  %v2902_v40 = vld [vmem:[%s3490_s1 + $0x340] sm:$0xff]  }
  0x46   : > { %2678 = vmatprep.subr.bf16.mxu1 %v2871_v41  ;;  %v2903_v41 = vld [vmem:[%s3490_s1 + $0x3c0] sm:$0xff]  }
  0x47   : > { %1756 = vmatmul.mubr.bf16.vlgmr.msra.gmra.mrb[16].mxu0 %v2248_v34  ;;  %v183_v34 = vld [vmem:[%s3068_s28 + $0x28] sm:$0xff] }
  0x48   : > { %1821 = vmatmul.mubr.bf16.vlgmr.msra.gmra.mrb[16].mxu1 %v2250_v38  ;;  %2639 = vmatpush3.bf16.msra.mxu0 %v2872_v42  ;;  %v2254_v38 = vcombine.low %v183_v34, %v191_v35  ;;  %v2255_v39 = vcombine.high %v183_v34, %v191_v35  ;;  %v2904_v42 = vld [vmem:[%s3490_s1 + $0x300] sm:$0xff]   ;;  %v185_v34 = vld [vmem:[%s3068_s28 + $0x38] sm:$0xff]  ;;  %v2256_v35 = vcombine.low %v184_v32, %v192_v33 }
  0x49   : > { %2679 = vmatpush3.bf16.msra.mxu1 %v2873_v43  ;;  %2640 = vmatprep.subr.bf16.mxu0 %v2874_v44  ;;  %v2905_v43 = vld [vmem:[%s3490_s1 + $0x380] sm:$0xff]   ;;  %v2906_v44 = vld [vmem:[%s3490_s1 + $0x348] sm:$0xff]  }
  0x4a   : > { %2680 = vmatprep.subr.bf16.mxu1 %v2875_v45  ;;  %1763 = vmatprep.mubr.bf16.mxu0 %v2265_v52  ;;  %v2907_v45 = vld [vmem:[%s3490_s1 + $0x3c8] sm:$0xff]  }
  0x4b   : > { %1828 = vmatprep.mubr.bf16.mxu1 %v2267_v53  ;;  %v207_v52 = vld [vmem:[%s3068_s28 + $0xe8] sm:$0xff]  ;;  %v2268_v53 = vcombine.low %v198_v48, %v206_v49  ;;  %v217_v48 = vld [vmem:[%s3068_s28 + $0x138] sm:$0xff] }
  0x4c   : > { %2641 = vmatpush3.bf16.msra.mxu0 %v2876_v46  ;;  %v2908_v46 = vld [vmem:[%s3490_s1 + $0x308] sm:$0xff]   ;;  %v225_v49 = vld [vmem:[%s3068_s28 + $0x178] sm:$0xff] }
  0x4d   : > { %2681 = vmatpush3.bf16.msra.mxu1 %v2877_v47  ;;  %2642 = vmatprep.subr.bf16.mxu0 %v2878_v56  ;;  %v2909_v47 = vld [vmem:[%s3490_s1 + $0x388] sm:$0xff]   ;;  %v2910_v56 = vld [vmem:[%s3490_s1 + $0x350] sm:$0xff]  }
  0x4e   : > { %2682 = vmatprep.subr.bf16.mxu1 %v2879_v57  ;;  %v2911_v57 = vld [vmem:[%s3490_s1 + $0x3d0] sm:$0xff]  }
  0x4f   : > { %1764 = vmatmul.mubr.bf16.gmra.mrb[20].mxu0 %v2264_v54  ;;  %v2271_v54 = vcombine.high %v199_v50, %v207_v52 }
  0x50   : > { %1829 = vmatmul.mubr.bf16.gmra.mrb[20].mxu1 %v2266_v55  ;;  %2643 = vmatpush3.bf16.msra.mxu0 %v2880_v58  ;;  %v2270_v55 = vcombine.low %v199_v50, %v207_v52  ;;  %v2912_v58 = vld [vmem:[%s3490_s1 + $0x310] sm:$0xff]  }
  0x51   : > { %2683 = vmatpush3.bf16.msra.mxu1 %v2881_v59  ;;  %2644 = vmatprep.subr.bf16.mxu0 %v2882_v60  ;;  %v2913_v59 = vld [vmem:[%s3490_s1 + $0x390] sm:$0xff]   ;;  %v2914_v60 = vld [vmem:[%s3490_s1 + $0x358] sm:$0xff]  }
  0x52   : > { %2684 = vmatprep.subr.bf16.mxu1 %v2883_v61  ;;  %1771 = vmatprep.mubr.bf16.mxu0 %v2281_v3  ;;  %v2915_v61 = vld [vmem:[%s3490_s1 + $0x3d8] sm:$0xff]   ;;  %v215_v3 = vld [vmem:[%s3068_s28 + $0x128] sm:$0xff] }
  0x53   : > { %1836 = vmatprep.mubr.bf16.mxu1 %v2283_v6  ;;  %v2287_v6 = vcombine.high %v215_v3, %v223_v4 }
  0x54   : > { %2645 = vmatpush3.bf16.msra.mxu0 %v2884_v62  ;;  %v2916_v62 = vld [vmem:[%s3490_s1 + $0x318] sm:$0xff]  }
  0x55   : > { %2685 = vmatpush3.bf16.msra.mxu1 %v2885_v63  ;;  %2646 = vmatprep.subr.bf16.mxu0 %v2886_v8  ;;  %v2917_v63 = vld [vmem:[%s3490_s1 + $0x398] sm:$0xff]   ;;  %v2918_v8 = vld [vmem:[%s3490_s1 + $0x360] sm:$0xff]  }
  0x56   : > { %2686 = vmatprep.subr.bf16.mxu1 %v2887_v9  ;;  %v2919_v9 = vld [vmem:[%s3490_s1 + $0x3e0] sm:$0xff]  }
  0x57   : > { %1772 = vmatmul.mubr.bf16.gmra.mrb[24].mxu0 %v2280_v5  ;;  %v2284_v5 = vcombine.low %v214_v0, %v222_v1 }
  0x58   : > { %1837 = vmatmul.mubr.bf16.gmra.mrb[24].mxu1 %v2282_v7  ;;  %2647 = vmatpush3.bf16.msra.mxu0 %v2888_v10  ;;  %v2286_v7 = vcombine.low %v215_v3, %v223_v4  ;;  %v2920_v10 = vld [vmem:[%s3490_s1 + $0x320] sm:$0xff]  }
  0x59   : > { %2687 = vmatpush3.bf16.msra.mxu1 %v2889_v11  ;;  %2648 = vmatprep.subr.bf16.mxu0 %v2890_v12  ;;  %v2921_v11 = vld [vmem:[%s3490_s1 + $0x3a0] sm:$0xff]   ;;  %v2922_v12 = vld [vmem:[%s3490_s1 + $0x368] sm:$0xff]  }
  0x5a   : > { %2688 = vmatprep.subr.bf16.mxu1 %v2891_v13  ;;  %1779 = vmatprep.mubr.bf16.mxu0 %v2297_v18  ;;  %v2923_v13 = vld [vmem:[%s3490_s1 + $0x3e8] sm:$0xff]  }
  0x5b   : > { %1844 = vmatprep.mubr.bf16.mxu1 %v2299_v22  ;;  %v231_v18 = vld [vmem:[%s3068_s28 + $0x1a8] sm:$0xff]  ;;  %v2300_v22 = vcombine.low %v230_v16, %v238_v17 }
  0x5c   : > { %2649 = vmatpush3.bf16.msra.mxu0 %v2892_v14  ;;  %v2924_v14 = vld [vmem:[%s3490_s1 + $0x328] sm:$0xff]  }
  0x5d   : > { %2689 = vmatpush3.bf16.msra.mxu1 %v2893_v15  ;;  %2650 = vmatprep.subr.bf16.mxu0 %v2894_v24  ;;  %v2925_v15 = vld [vmem:[%s3490_s1 + $0x3a8] sm:$0xff]   ;;  %v2926_v24 = vld [vmem:[%s3490_s1 + $0x370] sm:$0xff]  }
  0x5e   : > { %2690 = vmatprep.subr.bf16.mxu1 %v2895_v25  ;;  %v2927_v25 = vld [vmem:[%s3490_s1 + $0x3f0] sm:$0xff]  }
  0x5f   : > { %1780 = vmatmul.mubr.bf16.gmra.mrb[28].mxu0 %v2296_v21  ;;  %v2303_v21 = vcombine.high %v231_v18, %v239_v19 }
  0x60   : > { %1845 = vmatmul.mubr.bf16.gmra.mrb[28].mxu1 %v2298_v23  ;;  %2651 = vmatpush3.bf16.msra.mxu0 %v2896_v26  ;;  %v2302_v23 = vcombine.low %v231_v18, %v239_v19  ;;  %v2928_v26 = vld [vmem:[%s3490_s1 + $0x330] sm:$0xff]  }
  0x61   : > { %2691 = vmatpush3.bf16.msra.mxu1 %v2897_v27  ;;  %2652 = vmatprep.subr.bf16.mxu0 %v2898_v28  ;;  %v2929_v27 = vld [vmem:[%s3490_s1 + $0x3b0] sm:$0xff]   ;;  %v2930_v28 = vld [vmem:[%s3490_s1 + $0x378] sm:$0xff]  }
  0x62   : > { %2692 = vmatprep.subr.bf16.mxu1 %v2899_v29  ;;  %1885 = vmatprep.mubr.bf16.mxu0 %v2253_v37  ;;  %v2931_v29 = vld [vmem:[%s3490_s1 + $0x3f8] sm:$0xff]  }
  0x63   : > { %1950 = vmatprep.mubr.bf16.mxu1 %v2255_v39  ;;  %v193_v37 = vld [vmem:[%s3068_s28 + $0x78] sm:$0xff]  ;;  %v208_v39 = vld [vmem:[%s3068_s28 + $0xf0] sm:$0xff] }
  0x64   : > { %2653 = vmatpush3.bf16.msra.mxu0 %v2900_v30  ;;  %v2932_v30 = vld [vmem:[%s3490_s1 + $0x338] sm:$0xff]  }
  0x65   : > { %2693 = vmatpush3.bf16.msra.mxu1 %v2901_v31  ;;  %2718 = vmatprep.subr.bf16.mxu0 %v2902_v40  ;;  %v2933_v31 = vld [vmem:[%s3490_s1 + $0x3b8] sm:$0xff]   ;;  %v2258_v40 = vcombine.low %v185_v34, %v193_v37 }
  0x66   : > { %2758 = vmatprep.subr.bf16.mxu1 %v2903_v41  ;;  %v2259_v41 = vcombine.high %v185_v34, %v193_v37 }
  0x67   : > { %1886 = vmatmul.mubr.bf16.vlgmr.msra.gmra.mrb[32].mxu0 %v2252_v36  ;;  %v2257_v36 = vcombine.high %v184_v32, %v192_v33 }
  0x68   : > { %1951 = vmatmul.mubr.bf16.vlgmr.msra.gmra.mrb[32].mxu1 %v2254_v38  ;;  %2719 = vmatpush3.bf16.msra.mxu0 %v2904_v42  ;;  %v200_v38 = vld [vmem:[%s3068_s28 + $0xb0] sm:$0xff] }
  0x69   : > { %2759 = vmatpush3.bf16.msra.mxu1 %v2905_v43  ;;  %2720 = vmatprep.subr.bf16.mxu0 %v2906_v44  ;;  %v2273_v42 = vcombine.high %v200_v38, %v208_v39  ;;  %v201_v43 = vld [vmem:[%s3068_s28 + $0xb8] sm:$0xff]  ;;  %v2272_v50 = vcombine.low %v200_v38, %v208_v39 }
  0x6a   : > { %2760 = vmatprep.subr.bf16.mxu1 %v2907_v45  ;;  %1893 = vmatprep.mubr.bf16.mxu0 %v2269_v51  ;;  %v209_v44 = vld [vmem:[%s3068_s28 + $0xf8] sm:$0xff] }
  0x6b   : > { %1958 = vmatprep.mubr.bf16.mxu1 %v2271_v54  ;;  %v2275_v45 = vcombine.high %v201_v43, %v209_v44  ;;  %v2274_v51 = vcombine.low %v201_v43, %v209_v44  ;;  %v232_v54 = vld [vmem:[%s3068_s28 + $0x1b0] sm:$0xff] }
  0x6c   : > { %2721 = vmatpush3.bf16.msra.mxu0 %v2908_v46  ;;  %v216_v46 = vld [vmem:[%s3068_s28 + $0x130] sm:$0xff] }
  0x6d   : > { %2761 = vmatpush3.bf16.msra.mxu1 %v2909_v47  ;;  %2722 = vmatprep.subr.bf16.mxu0 %v2910_v56  ;;  %v224_v47 = vld [vmem:[%s3068_s28 + $0x170] sm:$0xff]  ;;  %v233_v56 = vld [vmem:[%s3068_s28 + $0x1b8] sm:$0xff] }
  0x6e   : > { %2762 = vmatprep.subr.bf16.mxu1 %v2911_v57  ;;  %v2289_v52 = vcombine.high %v216_v46, %v224_v47  ;;  %v241_v57 = vld [vmem:[%s3068_s28 + $0x1f8] sm:$0xff] }
  0x6f   : > { %1894 = vmatmul.mubr.bf16.gmra.mrb[36].mxu0 %v2268_v53  ;;  %v2291_v53 = vcombine.high %v217_v48, %v225_v49 }
  0x70   : > { %1959 = vmatmul.mubr.bf16.gmra.mrb[36].mxu1 %v2270_v55  ;;  %2723 = vmatpush3.bf16.msra.mxu0 %v2912_v58  ;;  %v240_v55 = vld [vmem:[%s3068_s28 + $0x1f0] sm:$0xff]  ;;  %v2288_v58 = vcombine.low %v216_v46, %v224_v47  ;;  %s2242_s28 = sshll.u32 %s3494_s21, 2 }
  0x71   : > { %2763 = vmatpush3.bf16.msra.mxu1 %v2913_v59  ;;  %2724 = vmatprep.subr.bf16.mxu0 %v2914_v60  ;;  %v2290_v59 = vcombine.low %v217_v48, %v225_v49  ;;  %v2305_v60 = vcombine.high %v232_v54, %v240_v55  ;;  %s3474_s9 = scalar_lea.vmem %s3492_s3, %s2242_s28 }
  0x72   : > { %2764 = vmatprep.subr.bf16.mxu1 %v2915_v61  ;;  %1901 = vmatprep.mubr.bf16.mxu0 %v2285_v2  ;;  %v2307_v61 = vcombine.high %v233_v56, %v241_v57  ;;  %v2243_v2 = vld [vmem:[%s3491_s2] ss:$0 sm:$0xff] }
  0x73   : > { %1966 = vmatprep.mubr.bf16.mxu1 %v2287_v6 }
  0x74   : > { %2725 = vmatpush3.bf16.msra.mxu0 %v2916_v62  ;;  %v2304_v62 = vcombine.low %v232_v54, %v240_v55 }
  0x75   : > { %2765 = vmatpush3.bf16.msra.mxu1 %v2917_v63  ;;  %2726 = vmatprep.subr.bf16.mxu0 %v2918_v8  ;;  %v2306_v63 = vcombine.low %v233_v56, %v241_v57 }
  0x76   : > { %2766 = vmatprep.subr.bf16.mxu1 %v2919_v9 }
  0x77   : > { %1902 = vmatmul.mubr.bf16.gmra.mrb[40].mxu0 %v2284_v5 }
  0x78   : > { %1967 = vmatmul.mubr.bf16.gmra.mrb[40].mxu1 %v2286_v7  ;;  %2727 = vmatpush3.bf16.msra.mxu0 %v2920_v10 }
  0x79   : > { %2767 = vmatpush3.bf16.msra.mxu1 %v2921_v11  ;;  %2728 = vmatprep.subr.bf16.mxu0 %v2922_v12 }
  0x7a   : > { %2768 = vmatprep.subr.bf16.mxu1 %v2923_v13  ;;  %1909 = vmatprep.mubr.bf16.mxu0 %v2301_v20 }
  0x7b   : > { %1974 = vmatprep.mubr.bf16.mxu1 %v2303_v21 }
  0x7c   : > { %2729 = vmatpush3.bf16.msra.mxu0 %v2924_v14 }
  0x7d   : > { %2769 = vmatpush3.bf16.msra.mxu1 %v2925_v15  ;;  %2730 = vmatprep.subr.bf16.mxu0 %v2926_v24 }
  0x7e   : > { %2770 = vmatprep.subr.bf16.mxu1 %v2927_v25 }
  0x7f   : > { %1910 = vmatmul.mubr.bf16.gmra.mrb[44].mxu0 %v2300_v22 }
  0x80   : > { %1975 = vmatmul.mubr.bf16.gmra.mrb[44].mxu1 %v2302_v23  ;;  %2731 = vmatpush3.bf16.msra.mxu0 %v2928_v26 }
  0x81   : > { %2771 = vmatpush3.bf16.msra.mxu1 %v2929_v27  ;;  %2732 = vmatprep.subr.bf16.mxu0 %v2930_v28 }
  0x82   : > { %2772 = vmatprep.subr.bf16.mxu1 %v2931_v29  ;;  %2015 = vmatprep.mubr.bf16.mxu0 %v2257_v36 }
  0x83   : > { %2080 = vmatprep.mubr.bf16.mxu1 %v2259_v41 }
  0x84   : > { %2733 = vmatpush3.bf16.msra.mxu0 %v2932_v30 }
  0x85   : > { %2773 = vmatpush3.bf16.msra.mxu1 %v2933_v31 }
  0x87   : > { %2016 = vmatmul.mubr.bf16.vlgmr.msra.gmra.mrb[48].mxu0 %v2256_v35 }
  0x88   : > { %2081 = vmatmul.mubr.bf16.vlgmr.msra.gmra.mrb[48].mxu1 %v2258_v40  ;;  %2023 = vmatprep.mubr.bf16.mxu0 %v2273_v42 }
  0x89   : > { %2088 = vmatprep.mubr.bf16.mxu1 %v2275_v45 }
  0x8f   : > { %2024 = vmatmul.mubr.bf16.gmra.mrb[52].mxu0 %v2272_v50 }
  0x90   : > { %2089 = vmatmul.mubr.bf16.gmra.mrb[52].mxu1 %v2274_v51  ;;  %2031 = vmatprep.mubr.bf16.mxu0 %v2289_v52 }
  0x91   : > { %2096 = vmatprep.mubr.bf16.mxu1 %v2291_v53 }
  0x97   : > { %2032 = vmatmul.mubr.bf16.gmra.mrb[56].mxu0 %v2288_v58 }
  0x98   : > { %2097 = vmatmul.mubr.bf16.gmra.mrb[56].mxu1 %v2290_v59  ;;  %2039 = vmatprep.mubr.bf16.mxu0 %v2305_v60 }
  0x99   : > { %2104 = vmatprep.mubr.bf16.mxu1 %v2307_v61 }
  0x9f   : > { %2040 = vmatmul.mubr.bf16.gmra.mrb[60].mxu0 %v2304_v62 }
  0xa0   : > { %2105 = vmatmul.mubr.bf16.gmra.mrb[60].mxu1 %v2306_v63 }
  0xfa   : > { %v2494_v0 = vpop.f32.mrb[0].mxu0 }
  0xfb   : > { %v2534_v1 = vpop.f32.mrb[0].mxu1  ;;  %v2495_v3 = vpop.f32.mrb[1].mxu0 }
  0xfc   : > { %v2496_v4 = vadd.f32 %v2495_v3, %v2494_v0  ;;  %v2535_v5 = vpop.f32.mrb[1].mxu1  ;;  %v2497_v6 = vpop.f32.mrb[2].mxu0 }
  0xfd   : > { %v2536_v7 = vadd.f32 %v2535_v5, %v2534_v1  ;;  %v2537_v8 = vpop.f32.mrb[2].mxu1  ;;  %v2498_v9 = vpop.f32.mrb[3].mxu0 }
  0xfe   : > { %v1628_v10 = vadd.f32 %v2496_v4, %v2243_v2  ;;  %v2499_v11 = vadd.f32 %v2498_v9, %v2497_v6  ;;  %v2538_v12 = vpop.f32.mrb[3].mxu1 }
  0xff   : > { %v2539_v13 = vadd.f32 %v2538_v12, %v2537_v8 }
 0x100   : > { %v1693_v14 = vadd.f32 %v2536_v7, %v1628_v10  ;;  %v1631_v15 = vadd.f32 %v2499_v11, %v2243_v2 }
 0x102   : > { %v3431_v16 = vadd.f32 %v2539_v13, %v1631_v15  ;;  %v2500_v17 = vpop.f32.mrb[4].mxu0 }
 0x103   : > { %v2540_v18 = vpop.f32.mrb[4].mxu1  ;;  %v2501_v19 = vpop.f32.mrb[5].mxu0 }
 0x104   : > { %v2502_v20 = vadd.f32 %v2501_v19, %v2500_v17  ;;  %v2541_v21 = vpop.f32.mrb[5].mxu1  ;;  %v2503_v22 = vpop.f32.mrb[6].mxu0 }
 0x105   : > { %v2542_v23 = vadd.f32 %v2541_v21, %v2540_v18  ;;  %v2543_v24 = vpop.f32.mrb[6].mxu1  ;;  %v2504_v25 = vpop.f32.mrb[7].mxu0 }
 0x106   : > { %v1636_v26 = vadd.f32 %v2502_v20, %v2243_v2  ;;  %v2505_v27 = vadd.f32 %v2504_v25, %v2503_v22  ;;  %v2544_v28 = vpop.f32.mrb[7].mxu1 }
 0x107   : > { %v2545_v29 = vadd.f32 %v2544_v28, %v2543_v24 }
 0x108   : > { %v1701_v30 = vadd.f32 %v2542_v23, %v1636_v26  ;;  %v1639_v31 = vadd.f32 %v2505_v27, %v2243_v2 }
 0x10a   : > { %v3433_v32 = vadd.f32 %v2545_v29, %v1639_v31  ;;  %v2506_v33 = vpop.f32.mrb[8].mxu0 }
 0x10b   : > { %v2546_v34 = vpop.f32.mrb[8].mxu1  ;;  %v2507_v35 = vpop.f32.mrb[9].mxu0 }
 0x10c   : > { %v2547_v36 = vpop.f32.mrb[9].mxu1  ;;  %v2508_v37 = vadd.f32 %v2507_v35, %v2506_v33  ;;  %v2509_v39 = vpop.f32.mrb[10].mxu0 }
 0x10d   : > { %v2548_v38 = vadd.f32 %v2547_v36, %v2546_v34  ;;  %v2549_v40 = vpop.f32.mrb[10].mxu1  ;;  %v2510_v41 = vpop.f32.mrb[11].mxu0 }
 0x10e   : > { %v2550_v42 = vpop.f32.mrb[11].mxu1  ;;  %v1644_v43 = vadd.f32 %v2508_v37, %v2243_v2  ;;  %v2511_v44 = vadd.f32 %v2510_v41, %v2509_v39 }
 0x10f   : > { %v2551_v45 = vadd.f32 %v2550_v42, %v2549_v40 }
 0x110   : > { %v1709_v46 = vadd.f32 %v2548_v38, %v1644_v43  ;;  %v1647_v47 = vadd.f32 %v2511_v44, %v2243_v2 }
 0x112   : > { %v3435_v48 = vadd.f32 %v2551_v45, %v1647_v47  ;;  %v2512_v49 = vpop.f32.mrb[12].mxu0 }
 0x113   : > { %v2552_v50 = vpop.f32.mrb[12].mxu1  ;;  %v2513_v51 = vpop.f32.mrb[13].mxu0 }
 0x114   : > { %v2514_v52 = vadd.f32 %v2513_v51, %v2512_v49  ;;  %v2553_v53 = vpop.f32.mrb[13].mxu1  ;;  %v2515_v54 = vpop.f32.mrb[14].mxu0 }
 0x115   : > { %v2554_v55 = vadd.f32 %v2553_v53, %v2552_v50  ;;  %v2555_v56 = vpop.f32.mrb[14].mxu1  ;;  %v2516_v57 = vpop.f32.mrb[15].mxu0 }
 0x116   : > { %v1652_v58 = vadd.f32 %v2514_v52, %v2243_v2  ;;  %v2517_v59 = vadd.f32 %v2516_v57, %v2515_v54  ;;  %v2556_v60 = vpop.f32.mrb[15].mxu1 }
 0x117   : > { %v2557_v61 = vadd.f32 %v2556_v60, %v2555_v56 }
 0x118   : > { %v1717_v62 = vadd.f32 %v2554_v55, %v1652_v58  ;;  %v1655_v63 = vadd.f32 %v2517_v59, %v2243_v2 }
 0x11a   : > { %v3437_v0 = vadd.f32 %v2557_v61, %v1655_v63  ;;  %v2574_v1 = vpop.f32.mrb[16].mxu0 }
 0x11b   : > { %v2614_v3 = vpop.f32.mrb[16].mxu1  ;;  %v2575_v4 = vpop.f32.mrb[17].mxu0 }
 0x11c   : > { %v2576_v5 = vadd.f32 %v2575_v4, %v2574_v1  ;;  %v2615_v6 = vpop.f32.mrb[17].mxu1  ;;  %v2577_v7 = vpop.f32.mrb[18].mxu0 }
 0x11d   : > { %v2616_v8 = vadd.f32 %v2615_v6, %v2614_v3  ;;  %v2617_v9 = vpop.f32.mrb[18].mxu1  ;;  %v2578_v10 = vpop.f32.mrb[19].mxu0 }
 0x11e   : > { %v1758_v11 = vadd.f32 %v2576_v5, %v1693_v14  ;;  %v2579_v12 = vadd.f32 %v2578_v10, %v2577_v7  ;;  %v2618_v13 = vpop.f32.mrb[19].mxu1 }
 0x11f   : > { %v2619_v15 = vadd.f32 %v2618_v13, %v2617_v9 }
 0x120   : > { %v1823_v17 = vadd.f32 %v2616_v8, %v1758_v11  ;;  %v1761_v18 = vadd.f32 %v2579_v12, %v3431_v16 }
 0x122   : > { %v3440_v19 = vadd.f32 %v2619_v15, %v1761_v18  ;;  %v2580_v2 = vpop.f32.mrb[20].mxu0 }
 0x123   : > { %v2620_v20 = vpop.f32.mrb[20].mxu1  ;;  %v2581_v21 = vpop.f32.mrb[21].mxu0 }
 0x124   : > { %v2621_v22 = vpop.f32.mrb[21].mxu1  ;;  %v2582_v23 = vadd.f32 %v2581_v21, %v2580_v2  ;;  %v2583_v25 = vpop.f32.mrb[22].mxu0 }
 0x125   : > { %v2622_v24 = vadd.f32 %v2621_v22, %v2620_v20  ;;  %v2623_v26 = vpop.f32.mrb[22].mxu1  ;;  %v2584_v27 = vpop.f32.mrb[23].mxu0 }
 0x126   : > { %v2624_v28 = vpop.f32.mrb[23].mxu1  ;;  %v1766_v29 = vadd.f32 %v2582_v23, %v1701_v30  ;;  %v2585_v14 = vadd.f32 %v2584_v27, %v2583_v25 }
 0x127   : > { %v2625_v31 = vadd.f32 %v2624_v28, %v2623_v26 }
 0x128   : > { %v1831_v33 = vadd.f32 %v2622_v24, %v1766_v29  ;;  %v1769_v34 = vadd.f32 %v2585_v14, %v3433_v32 }
 0x12a   : > { %v3443_v35 = vadd.f32 %v2625_v31, %v1769_v34  ;;  %v2586_v16 = vpop.f32.mrb[24].mxu0 }
 0x12b   : > { %v2626_v36 = vpop.f32.mrb[24].mxu1  ;;  %v2587_v37 = vpop.f32.mrb[25].mxu0 }
 0x12c   : > { %v2588_v38 = vadd.f32 %v2587_v37, %v2586_v16  ;;  %v2627_v39 = vpop.f32.mrb[25].mxu1  ;;  %v2589_v40 = vpop.f32.mrb[26].mxu0 }
 0x12d   : > { %v2628_v41 = vadd.f32 %v2627_v39, %v2626_v36  ;;  %v2629_v42 = vpop.f32.mrb[26].mxu1  ;;  %v2590_v43 = vpop.f32.mrb[27].mxu0 }
 0x12e   : > { %v1774_v44 = vadd.f32 %v2588_v38, %v1709_v46  ;;  %v2591_v45 = vadd.f32 %v2590_v43, %v2589_v40  ;;  %v2630_v47 = vpop.f32.mrb[27].mxu1 }
 0x12f   : > { %v2631_v30 = vadd.f32 %v2630_v47, %v2629_v42 }
 0x130   : > { %v1839_v49 = vadd.f32 %v2628_v41, %v1774_v44  ;;  %v1777_v50 = vadd.f32 %v2591_v45, %v3435_v48 }
 0x132   : > { %v3446_v51 = vadd.f32 %v2631_v30, %v1777_v50  ;;  %v2592_v32 = vpop.f32.mrb[28].mxu0 }
 0x133   : > { %v2632_v52 = vpop.f32.mrb[28].mxu1  ;;  %v2593_v53 = vpop.f32.mrb[29].mxu0 }
 0x134   : > { %v2594_v54 = vadd.f32 %v2593_v53, %v2592_v32  ;;  %v2633_v55 = vpop.f32.mrb[29].mxu1  ;;  %v2595_v56 = vpop.f32.mrb[30].mxu0 }
 0x135   : > { %v2634_v57 = vadd.f32 %v2633_v55, %v2632_v52  ;;  %v2635_v58 = vpop.f32.mrb[30].mxu1  ;;  %v2596_v59 = vpop.f32.mrb[31].mxu0 }
 0x136   : > { %v1782_v60 = vadd.f32 %v2594_v54, %v1717_v62  ;;  %v2597_v61 = vadd.f32 %v2596_v59, %v2595_v56  ;;  %v2636_v46 = vpop.f32.mrb[31].mxu1 }
 0x137   : > { %v2637_v63 = vadd.f32 %v2636_v46, %v2635_v58 }
 0x138   : > { %v1847_v1 = vadd.f32 %v2634_v57, %v1782_v60  ;;  %v1785_v3 = vadd.f32 %v2597_v61, %v3437_v0 }
 0x13a   : > { %v3449_v4 = vadd.f32 %v2637_v63, %v1785_v3  ;;  %v2654_v48 = vpop.f32.mrb[32].mxu0 }
 0x13b   : > { %v2694_v5 = vpop.f32.mrb[32].mxu1  ;;  %v2655_v6 = vpop.f32.mrb[33].mxu0 }
 0x13c   : > { %v2695_v7 = vpop.f32.mrb[33].mxu1  ;;  %v2656_v8 = vadd.f32 %v2655_v6, %v2654_v48  ;;  %v2657_v10 = vpop.f32.mrb[34].mxu0 }
 0x13d   : > { %v2696_v9 = vadd.f32 %v2695_v7, %v2694_v5  ;;  %v2697_v11 = vpop.f32.mrb[34].mxu1  ;;  %v2658_v12 = vpop.f32.mrb[35].mxu0 }
 0x13e   : > { %v2698_v13 = vpop.f32.mrb[35].mxu1  ;;  %v1888_v15 = vadd.f32 %v2656_v8, %v1823_v17  ;;  %v2659_v62 = vadd.f32 %v2658_v12, %v2657_v10 }
 0x13f   : > { %v2699_v18 = vadd.f32 %v2698_v13, %v2697_v11 }
 0x140   : > { %v1953_v2 = vadd.f32 %v2696_v9, %v1888_v15  ;;  %v1891_v20 = vadd.f32 %v2659_v62, %v3440_v19 }
 0x142   : > { %v3452_v21 = vadd.f32 %v2699_v18, %v1891_v20  ;;  %v2660_v0 = vpop.f32.mrb[36].mxu0 }
 0x143   : > { %v2700_v22 = vpop.f32.mrb[36].mxu1  ;;  %v2661_v23 = vpop.f32.mrb[37].mxu0 }
 0x144   : > { %v2662_v24 = vadd.f32 %v2661_v23, %v2660_v0  ;;  %v2701_v25 = vpop.f32.mrb[37].mxu1  ;;  %v2663_v26 = vpop.f32.mrb[38].mxu0 }
 0x145   : > { %v2702_v27 = vadd.f32 %v2701_v25, %v2700_v22  ;;  %v2703_v28 = vpop.f32.mrb[38].mxu1  ;;  %v2664_v29 = vpop.f32.mrb[39].mxu0 }
 0x146   : > { %v1896_v14 = vadd.f32 %v2662_v24, %v1831_v33  ;;  %v2665_v31 = vadd.f32 %v2664_v29, %v2663_v26  ;;  %v2704_v34 = vpop.f32.mrb[39].mxu1 }
 0x147   : > { %v2705_v17 = vadd.f32 %v2704_v34, %v2703_v28 }
 0x148   : > { %v3454_v16 = vadd.f32 %v2702_v27, %v1896_v14  ;;  %v1899_v36 = vadd.f32 %v2665_v31, %v3443_v35 }
 0x14a   : > { %v3457_v19 = vadd.f32 %v2705_v17, %v1899_v36  ;;  %v2666_v37 = vpop.f32.mrb[40].mxu0 }
 0x14b   : > { %v2706_v38 = vpop.f32.mrb[40].mxu1  ;;  %v2667_v39 = vpop.f32.mrb[41].mxu0 }
 0x14c   : > { %v2668_v40 = vadd.f32 %v2667_v39, %v2666_v37  ;;  %v2707_v41 = vpop.f32.mrb[41].mxu1  ;;  %v2669_v42 = vpop.f32.mrb[42].mxu0 }
 0x14d   : > { %v2708_v43 = vadd.f32 %v2707_v41, %v2706_v38  ;;  %v2709_v44 = vpop.f32.mrb[42].mxu1  ;;  %v2670_v45 = vpop.f32.mrb[43].mxu0 }
 0x14e   : > { %v1904_v47 = vadd.f32 %v2668_v40, %v1839_v49  ;;  %v2671_v33 = vadd.f32 %v2670_v45, %v2669_v42  ;;  %v2710_v30 = vpop.f32.mrb[43].mxu1 }
 0x14f   : > { %v2711_v50 = vadd.f32 %v2710_v30, %v2709_v44 }
 0x150   : > { %v3459_v32 = vadd.f32 %v2708_v43, %v1904_v47  ;;  %v1907_v52 = vadd.f32 %v2671_v33, %v3446_v51 }
 0x152   : > { %v3462_v35 = vadd.f32 %v2711_v50, %v1907_v52  ;;  %v2672_v53 = vpop.f32.mrb[44].mxu0 }
 0x153   : > { %v2712_v54 = vpop.f32.mrb[44].mxu1  ;;  %v2673_v55 = vpop.f32.mrb[45].mxu0 }
 0x154   : > { %v2713_v56 = vpop.f32.mrb[45].mxu1  ;;  %v2674_v57 = vadd.f32 %v2673_v55, %v2672_v53  ;;  %v2675_v59 = vpop.f32.mrb[46].mxu0 }
 0x155   : > { %v2714_v58 = vadd.f32 %v2713_v56, %v2712_v54  ;;  %v2715_v60 = vpop.f32.mrb[46].mxu1  ;;  %v2676_v61 = vpop.f32.mrb[47].mxu0 }
 0x156   : > { %v2716_v46 = vpop.f32.mrb[47].mxu1  ;;  %v1912_v49 = vadd.f32 %v2674_v57, %v1847_v1  ;;  %v2677_v63 = vadd.f32 %v2676_v61, %v2675_v59 }
 0x157   : > { %v2717_v3 = vadd.f32 %v2716_v46, %v2715_v60 }
 0x158   : > { %v3464_v48 = vadd.f32 %v2714_v58, %v1912_v49  ;;  %v1915_v5 = vadd.f32 %v2677_v63, %v3449_v4 }
 0x15a   : > { %v3467_v51 = vadd.f32 %v2717_v3, %v1915_v5  ;;  %v2734_v6 = vpop.f32.mrb[48].mxu0 }
 0x15b   : > { %v2774_v7 = vpop.f32.mrb[48].mxu1  ;;  %v2735_v8 = vpop.f32.mrb[49].mxu0 }
 0x15c   : > { %v2736_v9 = vadd.f32 %v2735_v8, %v2734_v6  ;;  %v2775_v10 = vpop.f32.mrb[49].mxu1  ;;  %v2737_v11 = vpop.f32.mrb[50].mxu0 }
 0x15d   : > { %v2776_v12 = vadd.f32 %v2775_v10, %v2774_v7  ;;  %v2777_v13 = vpop.f32.mrb[50].mxu1  ;;  %v2738_v15 = vpop.f32.mrb[51].mxu0 }
 0x15e   : > { %v2018_v62 = vadd.f32 %v2736_v9, %v1953_v2  ;;  %v2739_v1 = vadd.f32 %v2738_v15, %v2737_v11  ;;  %v2778_v18 = vpop.f32.mrb[51].mxu1 }
 0x15f   : > { %v2779_v20 = vadd.f32 %v2778_v18, %v2777_v13 }
 0x160   : > { %v2083_v0 = vadd.f32 %v2776_v12, %v2018_v62  ;;  %v2021_v22 = vadd.f32 %v2739_v1, %v3452_v21 }
 0x162   : > { %v2121_v4 = vmul.f32 0.1, %v2083_v0  ;;  %v2086_v23 = vadd.f32 %v2779_v20, %v2021_v22  ;;  %v2740_v24 = vpop.f32.mrb[52].mxu0  ;;  %vm2113_vm0 = vcmp.gt.f32.partialorder %v2083_v0, 0.0 }
 0x163   : > { %v2780_v25 = vpop.f32.mrb[52].mxu1  ;;  %v2741_v26 = vpop.f32.mrb[53].mxu0 }
 0x164   : > { %vm2114_vm1 = vcmp.gt.f32.partialorder %v2086_v23, 0.0  ;;  %v2122_v27 = vmul.f32 0.1, %v2086_v23  ;;  %v2742_v28 = vadd.f32 %v2741_v26, %v2740_v24  ;;  %v2781_v29 = vpop.f32.mrb[53].mxu1  ;;  %v2743_v14 = vpop.f32.mrb[54].mxu0  ;;  %v2129_v17 = vsel %vm2113_vm0, %v2083_v0, %v2121_v4 }
 0x165   : > { %v2782_v31 = vadd.f32 %v2781_v29, %v2780_v25  ;;  %v2783_v2 = vpop.f32.mrb[54].mxu1  ;;  %v2744_v34 = vpop.f32.mrb[55].mxu0 }
 0x166   : > { %v2130_v21 = vsel %vm2114_vm1, %v2086_v23, %v2122_v27  ;;  %v2026_v36 = vadd.f32 %v2742_v28, %v3454_v16  ;;  %v2745_v37 = vadd.f32 %v2744_v34, %v2743_v14  ;;  %v2784_v38 = vpop.f32.mrb[55].mxu1 }
 0x167   : > { %v2458_v39 = vpack.c.bf16 %v2130_v21, %v2129_v17  ;;  %v2785_v40 = vadd.f32 %v2784_v38, %v2783_v2 }
 0x168   : > { %v2091_v41 = vadd.f32 %v2782_v31, %v2026_v36  ;;  %v2029_v42 = vadd.f32 %v2745_v37, %v3457_v19 }
 0x169   : > { %2459 = vst [vmem:[%s3474_s9] sm:$0xff] %v2458_v39  }
 0x16a   : > { %v2123_v43 = vmul.f32 0.1, %v2091_v41  ;;  %v2094_v44 = vadd.f32 %v2785_v40, %v2029_v42  ;;  %v2746_v45 = vpop.f32.mrb[56].mxu0  ;;  %vm2115_vm2 = vcmp.gt.f32.partialorder %v2091_v41, 0.0 }
 0x16b   : > { %v2786_v47 = vpop.f32.mrb[56].mxu1  ;;  %v2747_v33 = vpop.f32.mrb[57].mxu0 }
 0x16c   : > { %vm2116_vm3 = vcmp.gt.f32.partialorder %v2094_v44, 0.0  ;;  %v2124_v30 = vmul.f32 0.1, %v2094_v44  ;;  %v2748_v50 = vadd.f32 %v2747_v33, %v2746_v45  ;;  %v2787_v52 = vpop.f32.mrb[57].mxu1  ;;  %v2749_v16 = vpop.f32.mrb[58].mxu0  ;;  %v2131_v56 = vsel %vm2115_vm2, %v2091_v41, %v2123_v43 }
 0x16d   : > { %v2788_v53 = vadd.f32 %v2787_v52, %v2786_v47  ;;  %v2789_v54 = vpop.f32.mrb[58].mxu1  ;;  %v2750_v55 = vpop.f32.mrb[59].mxu0 }
 0x16e   : > { %v2132_v57 = vsel %vm2116_vm3, %v2094_v44, %v2124_v30  ;;  %v2034_v19 = vadd.f32 %v2748_v50, %v3459_v32  ;;  %v2751_v58 = vadd.f32 %v2750_v55, %v2749_v16  ;;  %v2790_v59 = vpop.f32.mrb[59].mxu1 }
 0x16f   : > { %v2463_v60 = vpack.c.bf16 %v2132_v57, %v2131_v56  ;;  %v2791_v61 = vadd.f32 %v2790_v59, %v2789_v54 }
 0x170   : > { %v2099_v46 = vadd.f32 %v2788_v53, %v2034_v19  ;;  %v2037_v49 = vadd.f32 %v2751_v58, %v3462_v35 }
 0x171   : > { %2475 = vst [vmem:[%s3474_s9 + $0x8] sm:$0xff] %v2463_v60  }
 0x172   : > { %v2125_v63 = vmul.f32 0.1, %v2099_v46  ;;  %v2102_v3 = vadd.f32 %v2791_v61, %v2037_v49  ;;  %v2752_v5 = vpop.f32.mrb[60].mxu0  ;;  %vm2117_vm4 = vcmp.gt.f32.partialorder %v2099_v46, 0.0 }
 0x173   : > { %v2792_v6 = vpop.f32.mrb[60].mxu1  ;;  %v2753_v7 = vpop.f32.mrb[61].mxu0 }
 0x174   : > { %vm2118_vm5 = vcmp.gt.f32.partialorder %v2102_v3, 0.0  ;;  %v2126_v8 = vmul.f32 0.1, %v2102_v3  ;;  %v2754_v9 = vadd.f32 %v2753_v7, %v2752_v5  ;;  %v2793_v10 = vpop.f32.mrb[61].mxu1  ;;  %v2755_v32 = vpop.f32.mrb[62].mxu0  ;;  %v2133_v15 = vsel %vm2117_vm4, %v2099_v46, %v2125_v63 }
 0x175   : > { %v2794_v11 = vadd.f32 %v2793_v10, %v2792_v6  ;;  %v2795_v12 = vpop.f32.mrb[62].mxu1  ;;  %v2756_v13 = vpop.f32.mrb[63].mxu0 }
 0x176   : > { %v2134_v62 = vsel %vm2118_vm5, %v2102_v3, %v2126_v8  ;;  %v2042_v35 = vadd.f32 %v2754_v9, %v3464_v48  ;;  %v2757_v1 = vadd.f32 %v2756_v13, %v2755_v32  ;;  %v2796_v18 = vpop.f32.mrb[63].mxu1 }
 0x177   : > { %v2468_v20 = vpack.c.bf16 %v2134_v62, %v2133_v15  ;;  %v2797_v0 = vadd.f32 %v2796_v18, %v2795_v12 }
 0x178   : > { %v2107_v22 = vadd.f32 %v2794_v11, %v2042_v35  ;;  %v2045_v4 = vadd.f32 %v2757_v1, %v3467_v51 }
 0x179   : > { %2476 = vst [vmem:[%s3474_s9 + $0x10] sm:$0xff] %v2468_v20  }
 0x17a   : > { %v2127_v23 = vmul.f32 0.1, %v2107_v22  ;;  %v2110_v24 = vadd.f32 %v2797_v0, %v2045_v4  ;;  %vm2119_vm6 = vcmp.gt.f32.partialorder %v2107_v22, 0.0 }
 0x17c   : > { %vm2120_vm7 = vcmp.gt.f32.partialorder %v2110_v24, 0.0  ;;  %v2128_v25 = vmul.f32 0.1, %v2110_v24  ;;  %v2135_v26 = vsel %vm2119_vm6, %v2107_v22, %v2127_v23 }
 0x17e   : > { %v2136_v27 = vsel %vm2120_vm7, %v2110_v24, %v2128_v25 }
 0x17f   : > { %v2473_v28 = vpack.c.bf16 %v2136_v27, %v2135_v26 }
 0x181   : > { %2477 = vst [vmem:[%s3474_s9 + $0x18] sm:$0xff] %v2473_v28  }
 0x182 PF: > { %s13_s12 = sadd.s32 1, %s2940_s12  }
 0x183   : > { %p10_p4 = scmp.ge.s32.totalorder %s13_s12, 4  }
 0x185   :  { %12 = sbr.rel (!%p10_p4) target bundleno = 1 (0x1), region = 62 }

// kernel: _lambda_.6
= control target key start
LH: loop header
LB: loop body
LE: loop exit
PB: predicated region body
PF: predicated region fallthrough
CT: control target
= control target key end

     0   :  { %s2445_s18 = smov 0   ;;  %s2900_s0 = inlined_call_operand.vmem [shape: bf16[32,2048], index: 0, kind: input, shape index: {}]   ;;  %s2901_s1 = inlined_call_operand.vmem [shape: bf16[2048,128], index: 1, kind: input, shape index: {}]   ;;  %s2902_s2 = inlined_call_operand.vmem [shape: f32[1,128], index: 2, kind: input, shape index: {}, may-alias: {2,4}]   ;;  %s2903_s3 = inlined_call_operand.vmem [shape: bf16[128,128], index: 3, kind: input, shape index: {}]   ;;  %s2904_s4 = inlined_call_operand.vmem [shape: f32[1,128], index: 4, kind: input, shape index: {}, may-alias: {2,4}]   ;;  %s2905_s5 = inlined_call_operand.vmem [shape: bf16[32,128], index: 5, kind: output, shape index: {}]  }
   0x1 LB: > { %s1878_s19 = sadd.s32 4294967295, %s2411_s18   ;;  %p1882_p0 = scmp.ge.s32.totalorder %s2411_s18, 1  ;;  %s2411_s18 = sphi %s2445_s18, %s15_s18  }
   0x2   : > { %p189_p1 = scmp.lt.s32.totalorder %s2411_s18, 3 }
   0x4   : > { %p190_p2 = pnand %p1882_p0, %p189_p1 }
   0x5   : > { %v2269_v0 = vld [vmem:[%s2901_s1 + $0x40] sm:$0xff] (!%p190_p2)   ;;  %v2273_v4 = vld [vmem:[%s2901_s1 + $0x48] sm:$0xff] (!%p190_p2)   ;;  %v2277_v8 = vld [vmem:[%s2901_s1 + $0x50] sm:$0xff] (!%p190_p2)   ;;  %s1883_s29 = sshll.u32 (!%p190_p2), %s1878_s19, 1  ;;  %vm2414_vm0 = vmmov (!%p190_p2), 0  }
   0x6   : > { %193 = sbr.rel (%p190_p2) target bundleno = 583 (0x247), region = 40  ;;  %v2270_v1 = vld [vmem:[%s2901_s1 + $0xc0] sm:$0xff] (!%p190_p2)   ;;  %2054 = vmatprep.subr.bf16.mxu0 (!%p190_p2), %v2269_v0  ;;  %v2274_v5 = vld [vmem:[%s2901_s1 + $0xc8] sm:$0xff] (!%p190_p2)   ;;  %v2278_v9 = vld [vmem:[%s2901_s1 + $0xd0] sm:$0xff] (!%p190_p2)   ;;  %p219_p3 = scmp.lt.s32.totalorder (!%p190_p2), %s1883_s29, 3 }
   0x7   : > { %v2271_v2 = vld [vmem:[%s2901_s1] sm:$0xff] (!%p190_p2)   ;;  %2076 = vmatprep.subr.bf16.mxu1 (!%p190_p2), %v2270_v1  ;;  %v2275_v6 = vld [vmem:[%s2901_s1 + $0x8] sm:$0xff] (!%p190_p2)   ;;  %v2279_v10 = vld [vmem:[%s2901_s1 + $0x10] sm:$0xff] (!%p190_p2)  }
   0x8   : > { %v2272_v3 = vld [vmem:[%s2901_s1 + $0x80] sm:$0xff] (!%p190_p2)   ;;  %2055 = vmatpush3.bf16.msra.mxu0 (!%p190_p2), %v2271_v2  ;;  %v2276_v7 = vld [vmem:[%s2901_s1 + $0x88] sm:$0xff] (!%p190_p2)   ;;  %v2280_v11 = vld [vmem:[%s2901_s1 + $0x90] sm:$0xff] (!%p190_p2)  }
   0x9   : > { %2077 = vmatpush3.bf16.msra.mxu1 (!%p190_p2), %v2272_v3  ;;  %2056 = vmatprep.subr.bf16.mxu0 (!%p190_p2), %v2273_v4  ;;  %v2281_v12 = vld [vmem:[%s2901_s1 + $0x58] sm:$0xff] (!%p190_p2)   ;;  %v2285_v16 = vld [vmem:[%s2901_s1 + $0x60] sm:$0xff] (!%p190_p2)   ;;  %v2289_v20 = vld [vmem:[%s2901_s1 + $0x68] sm:$0xff] (!%p190_p2)  }
   0xa   : > { %2078 = vmatprep.subr.bf16.mxu1 (!%p190_p2), %v2274_v5  ;;  %v2282_v13 = vld [vmem:[%s2901_s1 + $0xd8] sm:$0xff] (!%p190_p2)   ;;  %v2286_v17 = vld [vmem:[%s2901_s1 + $0xe0] sm:$0xff] (!%p190_p2)   ;;  %v2290_v21 = vld [vmem:[%s2901_s1 + $0xe8] sm:$0xff] (!%p190_p2)  }
   0xb   : > { %v2283_v14 = vld [vmem:[%s2901_s1 + $0x18] sm:$0xff] (!%p190_p2)   ;;  %v2287_v18 = vld [vmem:[%s2901_s1 + $0x20] sm:$0xff] (!%p190_p2)   ;;  %v2291_v22 = vld [vmem:[%s2901_s1 + $0x28] sm:$0xff] (!%p190_p2)  }
   0xc   : > { %2057 = vmatpush3.bf16.msra.mxu0 (!%p190_p2), %v2275_v6  ;;  %v2284_v15 = vld [vmem:[%s2901_s1 + $0x98] sm:$0xff] (!%p190_p2)   ;;  %v2288_v19 = vld [vmem:[%s2901_s1 + $0xa0] sm:$0xff] (!%p190_p2)   ;;  %v2292_v23 = vld [vmem:[%s2901_s1 + $0xa8] sm:$0xff] (!%p190_p2)  }
   0xd   : > { %2079 = vmatpush3.bf16.msra.mxu1 %v2276_v7  ;;  %2058 = vmatprep.subr.bf16.mxu0 %v2277_v8  ;;  %s2907_s29 = smov (!%p219_p3, %s1883_s29), 3  ;;  %v2293_v24 = vld [vmem:[%s2901_s1 + $0x70] sm:$0xff]   ;;  %v2297_v28 = vld [vmem:[%s2901_s1 + $0x78] sm:$0xff]   ;;  %v2301_v40 = vld [vmem:[%s2901_s1 + $0x140] sm:$0xff]  }
   0xe   : > { %2080 = vmatprep.subr.bf16.mxu1 %v2278_v9  ;;  %v2294_v25 = vld [vmem:[%s2901_s1 + $0xf0] sm:$0xff]   ;;  %s2046_s28 = sshll.u32 %s2907_s29, 6  ;;  %v2298_v29 = vld [vmem:[%s2901_s1 + $0xf8] sm:$0xff]   ;;  %v2302_v41 = vld [vmem:[%s2901_s1 + $0x1c0] sm:$0xff]   ;;  %s1887_s8 = sshll.u32 %s2907_s29, 2 }
   0xf   : > { %v2295_v26 = vld [vmem:[%s2901_s1 + $0x30] sm:$0xff]   ;;  %s2551_s19 = scalar_lea.vmem %s2900_s0, %s2046_s28  ;;  %v2299_v30 = vld [vmem:[%s2901_s1 + $0x38] sm:$0xff]   ;;  %v2303_v42 = vld [vmem:[%s2901_s1 + $0x100] sm:$0xff]   ;;  %s229_s11 = scalar_lea.vmem %s2905_s5, %s1887_s8 }
  0x10   : > { %2059 = vmatpush3.bf16.msra.mxu0 %v2279_v10  ;;  %v2296_v27 = vld [vmem:[%s2901_s1 + $0xb0] sm:$0xff]   ;;  %v2300_v31 = vld [vmem:[%s2901_s1 + $0xb8] sm:$0xff]   ;;  %v232_v32 = vld [vmem:[%s2551_s19] sm:$0xff] }
  0x11   : > { %2081 = vmatpush3.bf16.msra.mxu1 %v2280_v11  ;;  %2060 = vmatprep.subr.bf16.mxu0 %v2281_v12  ;;  %v240_v33 = vld [vmem:[%s2551_s19 + $0x40] sm:$0xff]  ;;  %v233_v34 = vld [vmem:[%s2551_s19 + $0x8] sm:$0xff]  ;;  %v2309_v48 = vld [vmem:[%s2901_s1 + $0x150] sm:$0xff]  }
  0x12   : > { %2082 = vmatprep.subr.bf16.mxu1 %v2282_v13  ;;  %v1889_v35 = vcombine.low %v232_v32, %v240_v33  ;;  %v1890_v36 = vcombine.high %v232_v32, %v240_v33  ;;  %v241_v37 = vld [vmem:[%s2551_s19 + $0x48] sm:$0xff]  ;;  %v2304_v43 = vld [vmem:[%s2901_s1 + $0x180] sm:$0xff]   ;;  %v2310_v49 = vld [vmem:[%s2901_s1 + $0x1d0] sm:$0xff]  }
  0x13   : > { %v1891_v38 = vcombine.low %v233_v34, %v241_v37  ;;  %v1892_v39 = vcombine.high %v233_v34, %v241_v37  ;;  %v2305_v44 = vld [vmem:[%s2901_s1 + $0x148] sm:$0xff]   ;;  %v2311_v50 = vld [vmem:[%s2901_s1 + $0x110] sm:$0xff]   ;;  %v2313_v52 = vld [vmem:[%s2901_s1 + $0x158] sm:$0xff]  }
  0x14   : > { %2061 = vmatpush3.bf16.msra.mxu0 %v2283_v14  ;;  %1391 = vmatprep.mubr.bf16.mxu0 %v1890_v36  ;;  %v2306_v45 = vld [vmem:[%s2901_s1 + $0x1c8] sm:$0xff]   ;;  %v2312_v51 = vld [vmem:[%s2901_s1 + $0x190] sm:$0xff]   ;;  %v2314_v53 = vld [vmem:[%s2901_s1 + $0x1d8] sm:$0xff]  }
  0x15   : > { %2083 = vmatpush3.bf16.msra.mxu1 %v2284_v15  ;;  %2062 = vmatprep.subr.bf16.mxu0 %v2285_v16  ;;  %v2307_v46 = vld [vmem:[%s2901_s1 + $0x108] sm:$0xff]   ;;  %v2315_v54 = vld [vmem:[%s2901_s1 + $0x118] sm:$0xff]   ;;  %v2317_v56 = vld [vmem:[%s2901_s1 + $0x160] sm:$0xff]  }
  0x16   : > { %2084 = vmatprep.subr.bf16.mxu1 %v2286_v17  ;;  %1432 = vmatprep.mubr.bf16.mxu1 %v1892_v39  ;;  %v2308_v47 = vld [vmem:[%s2901_s1 + $0x188] sm:$0xff]   ;;  %v2316_v55 = vld [vmem:[%s2901_s1 + $0x198] sm:$0xff]   ;;  %v2318_v57 = vld [vmem:[%s2901_s1 + $0x1e0] sm:$0xff]  }
  0x17   : > { %v2319_v58 = vld [vmem:[%s2901_s1 + $0x120] sm:$0xff]   ;;  %v2321_v60 = vld [vmem:[%s2901_s1 + $0x168] sm:$0xff]   ;;  %v2325_v0 = vld [vmem:[%s2901_s1 + $0x170] sm:$0xff]  }
  0x18   : > { %2063 = vmatpush3.bf16.msra.mxu0 %v2287_v18  ;;  %v2320_v59 = vld [vmem:[%s2901_s1 + $0x1a0] sm:$0xff]   ;;  %v2322_v61 = vld [vmem:[%s2901_s1 + $0x1e8] sm:$0xff]   ;;  %v2326_v1 = vld [vmem:[%s2901_s1 + $0x1f0] sm:$0xff]  }
  0x19   : > { %2085 = vmatpush3.bf16.msra.mxu1 %v2288_v19  ;;  %2064 = vmatprep.subr.bf16.mxu0 %v2289_v20  ;;  %v2323_v62 = vld [vmem:[%s2901_s1 + $0x128] sm:$0xff]   ;;  %v2327_v2 = vld [vmem:[%s2901_s1 + $0x130] sm:$0xff]   ;;  %v2329_v4 = vld [vmem:[%s2901_s1 + $0x178] sm:$0xff]  }
  0x1a   : > { %2086 = vmatprep.subr.bf16.mxu1 %v2290_v21  ;;  %v2324_v63 = vld [vmem:[%s2901_s1 + $0x1a8] sm:$0xff]   ;;  %v2328_v3 = vld [vmem:[%s2901_s1 + $0x1b0] sm:$0xff]   ;;  %v2330_v5 = vld [vmem:[%s2901_s1 + $0x1f8] sm:$0xff]  }
  0x1b   : > { %v2331_v6 = vld [vmem:[%s2901_s1 + $0x138] sm:$0xff]   ;;  %v234_v8 = vld [vmem:[%s2551_s19 + $0x10] sm:$0xff]  ;;  %v2333_v16 = vld [vmem:[%s2901_s1 + $0x240] sm:$0xff]  }
  0x1c   : > { %2065 = vmatpush3.bf16.msra.mxu0 %v2291_v22  ;;  %v2332_v7 = vld [vmem:[%s2901_s1 + $0x1b8] sm:$0xff]   ;;  %v242_v9 = vld [vmem:[%s2551_s19 + $0x50] sm:$0xff]  ;;  %v2334_v17 = vld [vmem:[%s2901_s1 + $0x2c0] sm:$0xff]  }
  0x1d   : > { %2087 = vmatpush3.bf16.msra.mxu1 %v2292_v23  ;;  %2066 = vmatprep.subr.bf16.mxu0 %v2293_v24  ;;  %v1893_v10 = vcombine.low %v234_v8, %v242_v9  ;;  %v1894_v11 = vcombine.high %v234_v8, %v242_v9  ;;  %v235_v12 = vld [vmem:[%s2551_s19 + $0x18] sm:$0xff]  ;;  %v2335_v18 = vld [vmem:[%s2901_s1 + $0x200] sm:$0xff]   ;;  %v2337_v20 = vld [vmem:[%s2901_s1 + $0x248] sm:$0xff]  }
  0x1e   : > { %2088 = vmatprep.subr.bf16.mxu1 %v2294_v25  ;;  %v243_v13 = vld [vmem:[%s2551_s19 + $0x58] sm:$0xff]  ;;  %v2336_v19 = vld [vmem:[%s2901_s1 + $0x280] sm:$0xff]   ;;  %v2338_v21 = vld [vmem:[%s2901_s1 + $0x2c8] sm:$0xff]  }
  0x1f   : > { %v1895_v14 = vcombine.low %v235_v12, %v243_v13  ;;  %v1896_v15 = vcombine.high %v235_v12, %v243_v13  ;;  %v2339_v22 = vld [vmem:[%s2901_s1 + $0x208] sm:$0xff]   ;;  %v2341_v24 = vld [vmem:[%s2901_s1 + $0x250] sm:$0xff]   ;;  %v2349_v32 = vld [vmem:[%s2901_s1 + $0x260] sm:$0xff]  }
  0x20   : > { %2067 = vmatpush3.bf16.msra.mxu0 %v2295_v26  ;;  %v2340_v23 = vld [vmem:[%s2901_s1 + $0x288] sm:$0xff]   ;;  %v2342_v25 = vld [vmem:[%s2901_s1 + $0x2d0] sm:$0xff]   ;;  %v2350_v33 = vld [vmem:[%s2901_s1 + $0x2e0] sm:$0xff]  }
  0x21   : > { %2089 = vmatpush3.bf16.msra.mxu1 %v2296_v27  ;;  %2068 = vmatprep.subr.bf16.mxu0 %v2297_v28  ;;  %v2343_v26 = vld [vmem:[%s2901_s1 + $0x210] sm:$0xff]   ;;  %v2345_v28 = vld [vmem:[%s2901_s1 + $0x258] sm:$0xff]   ;;  %v2351_v34 = vld [vmem:[%s2901_s1 + $0x220] sm:$0xff]  }
  0x22   : > { %2090 = vmatprep.subr.bf16.mxu1 %v2298_v29  ;;  %v2344_v27 = vld [vmem:[%s2901_s1 + $0x290] sm:$0xff]   ;;  %v2346_v29 = vld [vmem:[%s2901_s1 + $0x2d8] sm:$0xff]   ;;  %v2353_v36 = vld [vmem:[%s2901_s1 + $0x268] sm:$0xff]  }
  0x23   : > { %v2354_v37 = vld [vmem:[%s2901_s1 + $0x2e8] sm:$0xff]   ;;  %v2381_v8 = vld [vmem:[%s2901_s1 + $0x360] sm:$0xff]  }
  0x24   : > { %2069 = vmatpush3.bf16.msra.mxu0 %v2299_v30  ;;  %v2347_v30 = vld [vmem:[%s2901_s1 + $0x218] sm:$0xff]   ;;  %v2356_v39 = vld [vmem:[%s2901_s1 + $0x2a8] sm:$0xff]   ;;  %v2382_v9 = vld [vmem:[%s2901_s1 + $0x3e0] sm:$0xff]  }
  0x25   : > { %2091 = vmatpush3.bf16.msra.mxu1 %v2300_v31  ;;  %2098 = vmatprep.subr.bf16.mxu0 %v2301_v40  ;;  %v2348_v31 = vld [vmem:[%s2901_s1 + $0x298] sm:$0xff]   ;;  %v2357_v40 = vld [vmem:[%s2901_s1 + $0x270] sm:$0xff]   ;;  %v2385_v12 = vld [vmem:[%s2901_s1 + $0x368] sm:$0xff]  }
  0x26   : > { %2120 = vmatprep.subr.bf16.mxu1 %v2302_v41  ;;  %v2358_v41 = vld [vmem:[%s2901_s1 + $0x2f0] sm:$0xff]   ;;  %v2386_v13 = vld [vmem:[%s2901_s1 + $0x3e8] sm:$0xff]  }
  0x27   : > { %1392 = vmatmul.mubr.bf16.vlgmr.msra.gmra.mrb[0].mxu0 %v1889_v35  ;;  %v2352_v35 = vld [vmem:[%s2901_s1 + $0x2a0] sm:$0xff]  }
  0x28   : > { %1433 = vmatmul.mubr.bf16.vlgmr.msra.gmra.mrb[0].mxu1 %v1891_v38  ;;  %2099 = vmatpush3.bf16.msra.mxu0 %v2303_v42  ;;  %v2355_v38 = vld [vmem:[%s2901_s1 + $0x228] sm:$0xff]   ;;  %v2359_v42 = vld [vmem:[%s2901_s1 + $0x230] sm:$0xff]  }
  0x29   : > { %2121 = vmatpush3.bf16.msra.mxu1 %v2304_v43  ;;  %2100 = vmatprep.subr.bf16.mxu0 %v2305_v44  ;;  %v2360_v43 = vld [vmem:[%s2901_s1 + $0x2b0] sm:$0xff]   ;;  %v2361_v44 = vld [vmem:[%s2901_s1 + $0x278] sm:$0xff]  }
  0x2a   : > { %2122 = vmatprep.subr.bf16.mxu1 %v2306_v45  ;;  %1473 = vmatprep.mubr.bf16.mxu0 %v1894_v11  ;;  %v2362_v45 = vld [vmem:[%s2901_s1 + $0x2f8] sm:$0xff]   ;;  %v2384_v11 = vld [vmem:[%s2901_s1 + $0x3a0] sm:$0xff]  }
  0x2b   : > { %1514 = vmatprep.mubr.bf16.mxu1 %v1896_v15  ;;  %v2388_v15 = vld [vmem:[%s2901_s1 + $0x3a8] sm:$0xff]  }
  0x2c   : > { %2101 = vmatpush3.bf16.msra.mxu0 %v2307_v46  ;;  %v2363_v46 = vld [vmem:[%s2901_s1 + $0x238] sm:$0xff]  }
  0x2d   : > { %2123 = vmatpush3.bf16.msra.mxu1 %v2308_v47  ;;  %2102 = vmatprep.subr.bf16.mxu0 %v2309_v48  ;;  %v2364_v47 = vld [vmem:[%s2901_s1 + $0x2b8] sm:$0xff]   ;;  %v236_v48 = vld [vmem:[%s2551_s19 + $0x20] sm:$0xff] }
  0x2e   : > { %2124 = vmatprep.subr.bf16.mxu1 %v2310_v49  ;;  %v244_v49 = vld [vmem:[%s2551_s19 + $0x60] sm:$0xff] }
  0x30   : > { %2103 = vmatpush3.bf16.msra.mxu0 %v2311_v50  ;;  %v237_v50 = vld [vmem:[%s2551_s19 + $0x28] sm:$0xff] }
  0x31   : > { %2125 = vmatpush3.bf16.msra.mxu1 %v2312_v51  ;;  %2104 = vmatprep.subr.bf16.mxu0 %v2313_v52  ;;  %v245_v51 = vld [vmem:[%s2551_s19 + $0x68] sm:$0xff]  ;;  %v1897_v52 = vcombine.low %v236_v48, %v244_v49 }
  0x32   : > { %2126 = vmatprep.subr.bf16.mxu1 %v2314_v53  ;;  %v1898_v53 = vcombine.high %v236_v48, %v244_v49 }
  0x34   : > { %2105 = vmatpush3.bf16.msra.mxu0 %v2315_v54  ;;  %v1899_v54 = vcombine.low %v237_v50, %v245_v51 }
  0x35   : > { %2127 = vmatpush3.bf16.msra.mxu1 %v2316_v55  ;;  %2106 = vmatprep.subr.bf16.mxu0 %v2317_v56  ;;  %v1900_v55 = vcombine.high %v237_v50, %v245_v51  ;;  %v2365_v56 = vld [vmem:[%s2901_s1 + $0x340] sm:$0xff]  }
  0x36   : > { %2128 = vmatprep.subr.bf16.mxu1 %v2318_v57  ;;  %v2366_v57 = vld [vmem:[%s2901_s1 + $0x3c0] sm:$0xff]  }
  0x38   : > { %2107 = vmatpush3.bf16.msra.mxu0 %v2319_v58  ;;  %v2367_v58 = vld [vmem:[%s2901_s1 + $0x300] sm:$0xff]  }
  0x39   : > { %2129 = vmatpush3.bf16.msra.mxu1 %v2320_v59  ;;  %2108 = vmatprep.subr.bf16.mxu0 %v2321_v60  ;;  %v2368_v59 = vld [vmem:[%s2901_s1 + $0x380] sm:$0xff]   ;;  %v2369_v60 = vld [vmem:[%s2901_s1 + $0x348] sm:$0xff]  }
  0x3a   : > { %2130 = vmatprep.subr.bf16.mxu1 %v2322_v61  ;;  %v2370_v61 = vld [vmem:[%s2901_s1 + $0x3c8] sm:$0xff]  }
  0x3c   : > { %2109 = vmatpush3.bf16.msra.mxu0 %v2323_v62  ;;  %v2371_v62 = vld [vmem:[%s2901_s1 + $0x308] sm:$0xff]  }
  0x3d   : > { %2131 = vmatpush3.bf16.msra.mxu1 %v2324_v63  ;;  %2110 = vmatprep.subr.bf16.mxu0 %v2325_v0  ;;  %v2372_v63 = vld [vmem:[%s2901_s1 + $0x388] sm:$0xff]   ;;  %v2373_v0 = vld [vmem:[%s2901_s1 + $0x350] sm:$0xff]  }
  0x3e   : > { %2132 = vmatprep.subr.bf16.mxu1 %v2326_v1  ;;  %v2374_v1 = vld [vmem:[%s2901_s1 + $0x3d0] sm:$0xff]  }
  0x40   : > { %2111 = vmatpush3.bf16.msra.mxu0 %v2327_v2  ;;  %v2375_v2 = vld [vmem:[%s2901_s1 + $0x310] sm:$0xff]  }
  0x41   : > { %2133 = vmatpush3.bf16.msra.mxu1 %v2328_v3  ;;  %2112 = vmatprep.subr.bf16.mxu0 %v2329_v4  ;;  %v2376_v3 = vld [vmem:[%s2901_s1 + $0x390] sm:$0xff]   ;;  %v2377_v4 = vld [vmem:[%s2901_s1 + $0x358] sm:$0xff]  }
  0x42   : > { %2134 = vmatprep.subr.bf16.mxu1 %v2330_v5  ;;  %v2378_v5 = vld [vmem:[%s2901_s1 + $0x3d8] sm:$0xff]  }
  0x44   : > { %2113 = vmatpush3.bf16.msra.mxu0 %v2331_v6  ;;  %v2379_v6 = vld [vmem:[%s2901_s1 + $0x318] sm:$0xff]  }
  0x45   : > { %2135 = vmatpush3.bf16.msra.mxu1 %v2332_v7  ;;  %2142 = vmatprep.subr.bf16.mxu0 %v2333_v16  ;;  %v2380_v7 = vld [vmem:[%s2901_s1 + $0x398] sm:$0xff]   ;;  %v2389_v16 = vld [vmem:[%s2901_s1 + $0x370] sm:$0xff]  }
  0x46   : > { %2164 = vmatprep.subr.bf16.mxu1 %v2334_v17  ;;  %v2390_v17 = vld [vmem:[%s2901_s1 + $0x3f0] sm:$0xff]  }
  0x47   : > { %1474 = vmatmul.mubr.bf16.vlgmr.msra.gmra.mrb[4].mxu0 %v1893_v10  ;;  %v2383_v10 = vld [vmem:[%s2901_s1 + $0x320] sm:$0xff]  }
  0x48   : > { %1515 = vmatmul.mubr.bf16.vlgmr.msra.gmra.mrb[4].mxu1 %v1895_v14  ;;  %2143 = vmatpush3.bf16.msra.mxu0 %v2335_v18  ;;  %v2387_v14 = vld [vmem:[%s2901_s1 + $0x328] sm:$0xff]   ;;  %v2391_v18 = vld [vmem:[%s2901_s1 + $0x330] sm:$0xff]  }
  0x49   : > { %2165 = vmatpush3.bf16.msra.mxu1 %v2336_v19  ;;  %2144 = vmatprep.subr.bf16.mxu0 %v2337_v20  ;;  %v2392_v19 = vld [vmem:[%s2901_s1 + $0x3b0] sm:$0xff]   ;;  %v2393_v20 = vld [vmem:[%s2901_s1 + $0x378] sm:$0xff]  }
  0x4a   : > { %2166 = vmatprep.subr.bf16.mxu1 %v2338_v21  ;;  %1555 = vmatprep.mubr.bf16.mxu0 %v1898_v53  ;;  %v2394_v21 = vld [vmem:[%s2901_s1 + $0x3f8] sm:$0xff]  }
  0x4b   : > { %1596 = vmatprep.mubr.bf16.mxu1 %v1900_v55 }
  0x4c   : > { %2145 = vmatpush3.bf16.msra.mxu0 %v2339_v22  ;;  %v2395_v22 = vld [vmem:[%s2901_s1 + $0x338] sm:$0xff]  }
  0x4d   : > { %2167 = vmatpush3.bf16.msra.mxu1 %v2340_v23  ;;  %2146 = vmatprep.subr.bf16.mxu0 %v2341_v24  ;;  %v2396_v23 = vld [vmem:[%s2901_s1 + $0x3b8] sm:$0xff]   ;;  %v238_v24 = vld [vmem:[%s2551_s19 + $0x30] sm:$0xff] }
  0x4e   : > { %2168 = vmatprep.subr.bf16.mxu1 %v2342_v25  ;;  %v246_v25 = vld [vmem:[%s2551_s19 + $0x70] sm:$0xff] }
  0x50   : > { %2147 = vmatpush3.bf16.msra.mxu0 %v2343_v26  ;;  %v239_v26 = vld [vmem:[%s2551_s19 + $0x38] sm:$0xff] }
  0x51   : > { %2169 = vmatpush3.bf16.msra.mxu1 %v2344_v27  ;;  %2148 = vmatprep.subr.bf16.mxu0 %v2345_v28  ;;  %v1901_v27 = vcombine.low %v238_v24, %v246_v25  ;;  %v1902_v28 = vcombine.high %v238_v24, %v246_v25 }
  0x52   : > { %2170 = vmatprep.subr.bf16.mxu1 %v2346_v29  ;;  %v247_v29 = vld [vmem:[%s2551_s19 + $0x78] sm:$0xff] }
  0x54   : > { %2149 = vmatpush3.bf16.msra.mxu0 %v2347_v30  ;;  %v1903_v30 = vcombine.low %v239_v26, %v247_v29 }
  0x55   : > { %2171 = vmatpush3.bf16.msra.mxu1 %v2348_v31  ;;  %2150 = vmatprep.subr.bf16.mxu0 %v2349_v32  ;;  %v1904_v31 = vcombine.high %v239_v26, %v247_v29  ;;  %v2397_v32 = vld [vmem:[%s2903_s3] sm:$0xff]  }
  0x56   : > { %2172 = vmatprep.subr.bf16.mxu1 %v2350_v33  ;;  %v2413_v33 = vmov 0.0  }
  0x58   : > { %2151 = vmatpush3.bf16.msra.mxu0 %v2351_v34  ;;  %v2398_v34 = vld [vmem:[%s2903_s3 + $0x8] sm:$0xff]  }
  0x59   : > { %2173 = vmatpush3.bf16.msra.mxu1 %v2352_v35  ;;  %2152 = vmatprep.subr.bf16.mxu0 %v2353_v36  ;;  %v2399_v35 = vld [vmem:[%s2903_s3 + $0x10] sm:$0xff]   ;;  %v2400_v36 = vld [vmem:[%s2903_s3 + $0x18] sm:$0xff]  }
  0x5a   : > { %2174 = vmatprep.subr.bf16.mxu1 %v2354_v37  ;;  %v2401_v37 = vld [vmem:[%s2903_s3 + $0x20] sm:$0xff]  }
  0x5c   : > { %2153 = vmatpush3.bf16.msra.mxu0 %v2355_v38  ;;  %v2402_v38 = vld [vmem:[%s2903_s3 + $0x28] sm:$0xff]  }
  0x5d   : > { %2175 = vmatpush3.bf16.msra.mxu1 %v2356_v39  ;;  %2154 = vmatprep.subr.bf16.mxu0 %v2357_v40  ;;  %v2403_v39 = vld [vmem:[%s2903_s3 + $0x30] sm:$0xff]   ;;  %v2404_v40 = vld [vmem:[%s2903_s3 + $0x38] sm:$0xff]  }
  0x5e   : > { %2176 = vmatprep.subr.bf16.mxu1 %v2358_v41 }
  0x60   : > { %2155 = vmatpush3.bf16.msra.mxu0 %v2359_v42 }
  0x61   : > { %2177 = vmatpush3.bf16.msra.mxu1 %v2360_v43  ;;  %2156 = vmatprep.subr.bf16.mxu0 %v2361_v44  ;;  %v1888_v43 = vld [vmem:[%s2902_s2] ss:$0 sm:$0xff] }
  0x62   : > { %2178 = vmatprep.subr.bf16.mxu1 %v2362_v45 }
  0x64   : > { %2157 = vmatpush3.bf16.msra.mxu0 %v2363_v46 }
  0x65   : > { %2179 = vmatpush3.bf16.msra.mxu1 %v2364_v47  ;;  %2186 = vmatprep.subr.bf16.mxu0 %v2365_v56 }
  0x66   : > { %2208 = vmatprep.subr.bf16.mxu1 %v2366_v57 }
  0x67   : > { %1556 = vmatmul.mubr.bf16.vlgmr.msra.gmra.mrb[8].mxu0 %v1897_v52 }
  0x68   : > { %1597 = vmatmul.mubr.bf16.vlgmr.msra.gmra.mrb[8].mxu1 %v1899_v54  ;;  %2187 = vmatpush3.bf16.msra.mxu0 %v2367_v58 }
  0x69   : > { %2209 = vmatpush3.bf16.msra.mxu1 %v2368_v59  ;;  %2188 = vmatprep.subr.bf16.mxu0 %v2369_v60 }
  0x6a   : > { %2210 = vmatprep.subr.bf16.mxu1 %v2370_v61  ;;  %1637 = vmatprep.mubr.bf16.mxu0 %v1902_v28 }
  0x6b   : > { %1678 = vmatprep.mubr.bf16.mxu1 %v1904_v31 }
  0x6c   : > { %2189 = vmatpush3.bf16.msra.mxu0 %v2371_v62 }
  0x6d   : > { %2211 = vmatpush3.bf16.msra.mxu1 %v2372_v63  ;;  %2190 = vmatprep.subr.bf16.mxu0 %v2373_v0 }
  0x6e   : > { %2212 = vmatprep.subr.bf16.mxu1 %v2374_v1 }
  0x70   : > { %2191 = vmatpush3.bf16.msra.mxu0 %v2375_v2 }
  0x71   : > { %2213 = vmatpush3.bf16.msra.mxu1 %v2376_v3  ;;  %2192 = vmatprep.subr.bf16.mxu0 %v2377_v4 }
  0x72   : > { %2214 = vmatprep.subr.bf16.mxu1 %v2378_v5 }
  0x74   : > { %2193 = vmatpush3.bf16.msra.mxu0 %v2379_v6 }
  0x75   : > { %2215 = vmatpush3.bf16.msra.mxu1 %v2380_v7  ;;  %2194 = vmatprep.subr.bf16.mxu0 %v2381_v8 }
  0x76   : > { %2216 = vmatprep.subr.bf16.mxu1 %v2382_v9 }
  0x78   : > { %2195 = vmatpush3.bf16.msra.mxu0 %v2383_v10 }
  0x79   : > { %2217 = vmatpush3.bf16.msra.mxu1 %v2384_v11  ;;  %2196 = vmatprep.subr.bf16.mxu0 %v2385_v12 }
  0x7a   : > { %2218 = vmatprep.subr.bf16.mxu1 %v2386_v13 }
  0x7c   : > { %2197 = vmatpush3.bf16.msra.mxu0 %v2387_v14 }
  0x7d   : > { %2219 = vmatpush3.bf16.msra.mxu1 %v2388_v15  ;;  %2198 = vmatprep.subr.bf16.mxu0 %v2389_v16 }
  0x7e   : > { %2220 = vmatprep.subr.bf16.mxu1 %v2390_v17 }
  0x80   : > { %2199 = vmatpush3.bf16.msra.mxu0 %v2391_v18 }
  0x81   : > { %2221 = vmatpush3.bf16.msra.mxu1 %v2392_v19  ;;  %2200 = vmatprep.subr.bf16.mxu0 %v2393_v20 }
  0x82   : > { %2222 = vmatprep.subr.bf16.mxu1 %v2394_v21 }
  0x84   : > { %2201 = vmatpush3.bf16.msra.mxu0 %v2395_v22 }
  0x85   : > { %2223 = vmatpush3.bf16.msra.mxu1 %v2396_v23  ;;  %2239 = vmatprep.subr.bf16.mxu0 %v2413_v33 }
  0x87   : > { %1638 = vmatmul.mubr.bf16.vlgmr.msra.gmra.mrb[12].mxu0 %v1901_v27 }
  0x88   : > { %1679 = vmatmul.mubr.bf16.vlgmr.msra.gmra.mrb[12].mxu1 %v1903_v30  ;;  %2240 = vmatpush3.bf16.msra.mxu0 %v2397_v32 }
  0x89   : > { %2241 = vmatprep.subr.bf16.mxu0 %v2413_v33  ;;  %2255 = vmatprep.mubr.msk.bf16.mxu0 %vm2414_vm0, %v2413_v33 }
  0x8c   : > { %2242 = vmatpush3.bf16.msra.mxu0 %v2398_v34 }
  0x8d   : > { %2243 = vmatprep.subr.bf16.mxu0 %v2413_v33 }
  0x90   : > { %2244 = vmatpush3.bf16.msra.mxu0 %v2399_v35 }
  0x91   : > { %2245 = vmatprep.subr.bf16.mxu0 %v2413_v33 }
  0x94   : > { %2246 = vmatpush3.bf16.msra.mxu0 %v2400_v36 }
  0x95   : > { %2247 = vmatprep.subr.bf16.mxu0 %v2413_v33 }
  0x98   : > { %2248 = vmatpush3.bf16.msra.mxu0 %v2401_v37 }
  0x99   : > { %2249 = vmatprep.subr.bf16.mxu0 %v2413_v33 }
  0x9c   : > { %2250 = vmatpush3.bf16.msra.mxu0 %v2402_v38 }
  0x9d   : > { %2251 = vmatprep.subr.bf16.mxu0 %v2413_v33 }
  0xa0   : > { %2252 = vmatpush3.bf16.msra.mxu0 %v2403_v39 }
  0xa1   : > { %2253 = vmatprep.subr.bf16.mxu0 %v2413_v33 }
  0xa4   : > { %2254 = vmatpush3.bf16.msra.mxu0 %v2404_v40 }
  0xfa   : > { %v2070_v41 = vpop.f32.mrb[0].mxu0 }
  0xfb   : > { %v2092_v42 = vpop.f32.mrb[0].mxu1  ;;  %v2071_v44 = vpop.f32.mrb[1].mxu0 }
  0xfc   : > { %v2072_v45 = vadd.f32 %v2071_v44, %v2070_v41  ;;  %v2093_v46 = vpop.f32.mrb[1].mxu1  ;;  %v2073_v47 = vpop.f32.mrb[2].mxu0 }
  0xfd   : > { %v2094_v48 = vadd.f32 %v2093_v46, %v2092_v42  ;;  %v2095_v49 = vpop.f32.mrb[2].mxu1  ;;  %v2074_v50 = vpop.f32.mrb[3].mxu0 }
  0xfe   : > { %v1394_v51 = vadd.f32 %v2072_v45, %v1888_v43  ;;  %v2075_v52 = vadd.f32 %v2074_v50, %v2073_v47  ;;  %v2096_v53 = vpop.f32.mrb[3].mxu1  ;;  %v2033_v47 = vld [vmem:[%s2904_s4] ss:$0 sm:$0xff] }
  0xff   : > { %v2097_v54 = vadd.f32 %v2096_v53, %v2095_v49 }
 0x100   : > { %v1435_v55 = vadd.f32 %v2094_v48, %v1394_v51  ;;  %v1397_v56 = vadd.f32 %v2075_v52, %v1888_v43 }
 0x102   : > { %v1438_v57 = vadd.f32 %v2097_v54, %v1397_v56 }
 0x11a   : > { %v2114_v58 = vpop.f32.mrb[4].mxu0 }
 0x11b   : > { %v2136_v59 = vpop.f32.mrb[4].mxu1  ;;  %v2115_v60 = vpop.f32.mrb[5].mxu0 }
 0x11c   : > { %v2116_v61 = vadd.f32 %v2115_v60, %v2114_v58  ;;  %v2137_v62 = vpop.f32.mrb[5].mxu1  ;;  %v2117_v63 = vpop.f32.mrb[6].mxu0 }
 0x11d   : > { %v2138_v0 = vadd.f32 %v2137_v62, %v2136_v59  ;;  %v2139_v1 = vpop.f32.mrb[6].mxu1  ;;  %v2118_v2 = vpop.f32.mrb[7].mxu0 }
 0x11e   : > { %v1476_v3 = vadd.f32 %v2116_v61, %v1435_v55  ;;  %v2119_v4 = vadd.f32 %v2118_v2, %v2117_v63  ;;  %v2140_v5 = vpop.f32.mrb[7].mxu1 }
 0x11f   : > { %v2141_v6 = vadd.f32 %v2140_v5, %v2139_v1 }
 0x120   : > { %v1517_v7 = vadd.f32 %v2138_v0, %v1476_v3  ;;  %v1479_v8 = vadd.f32 %v2119_v4, %v1438_v57 }
 0x122   : > { %v1520_v9 = vadd.f32 %v2141_v6, %v1479_v8 }
 0x13a   : > { %v2158_v10 = vpop.f32.mrb[8].mxu0 }
 0x13b   : > { %v2180_v11 = vpop.f32.mrb[8].mxu1  ;;  %v2159_v12 = vpop.f32.mrb[9].mxu0 }
 0x13c   : > { %v2181_v13 = vpop.f32.mrb[9].mxu1  ;;  %v2160_v14 = vadd.f32 %v2159_v12, %v2158_v10  ;;  %v2161_v16 = vpop.f32.mrb[10].mxu0 }
 0x13d   : > { %v2182_v15 = vadd.f32 %v2181_v13, %v2180_v11  ;;  %v2183_v17 = vpop.f32.mrb[10].mxu1  ;;  %v2162_v18 = vpop.f32.mrb[11].mxu0 }
 0x13e   : > { %v2184_v19 = vpop.f32.mrb[11].mxu1  ;;  %v1558_v20 = vadd.f32 %v2160_v14, %v1517_v7  ;;  %v2163_v21 = vadd.f32 %v2162_v18, %v2161_v16 }
 0x13f   : > { %v2185_v22 = vadd.f32 %v2184_v19, %v2183_v17 }
 0x140   : > { %v1599_v23 = vadd.f32 %v2182_v15, %v1558_v20  ;;  %v1561_v24 = vadd.f32 %v2163_v21, %v1520_v9 }
 0x142   : > { %v1602_v25 = vadd.f32 %v2185_v22, %v1561_v24 }
 0x15a   : > { %v2202_v26 = vpop.f32.mrb[12].mxu0 }
 0x15b   : > { %v2224_v27 = vpop.f32.mrb[12].mxu1  ;;  %v2203_v28 = vpop.f32.mrb[13].mxu0 }
 0x15c   : > { %v2204_v29 = vadd.f32 %v2203_v28, %v2202_v26  ;;  %v2225_v30 = vpop.f32.mrb[13].mxu1  ;;  %v2205_v31 = vpop.f32.mrb[14].mxu0 }
 0x15d   : > { %v2226_v32 = vadd.f32 %v2225_v30, %v2224_v27  ;;  %v2227_v33 = vpop.f32.mrb[14].mxu1  ;;  %v2206_v34 = vpop.f32.mrb[15].mxu0 }
 0x15e   : > { %v1640_v35 = vadd.f32 %v2204_v29, %v1599_v23  ;;  %v2207_v36 = vadd.f32 %v2206_v34, %v2205_v31  ;;  %v2228_v37 = vpop.f32.mrb[15].mxu1 }
 0x15f   : > { %v2229_v38 = vadd.f32 %v2228_v37, %v2227_v33 }
 0x160   : > { %v1681_v39 = vadd.f32 %v2226_v32, %v1640_v35  ;;  %v1643_v40 = vadd.f32 %v2207_v36, %v1602_v25 }
 0x162   : > { %v1689_v41 = vmul.f32 0.1, %v1681_v39  ;;  %v1684_v42 = vadd.f32 %v2229_v38, %v1643_v40  ;;  %vm1687_vm1 = vcmp.gt.f32.partialorder %v1681_v39, 0.0 }
 0x164   : > { %vm1688_vm2 = vcmp.gt.f32.partialorder %v1684_v42, 0.0  ;;  %v1690_v43 = vmul.f32 0.1, %v1684_v42  ;;  %v1691_v44 = vsel %vm1687_vm1, %v1681_v39, %v1689_v41 }
 0x166   : > { %v1692_v45 = vsel %vm1688_vm2, %v1684_v42, %v1690_v43 }
 0x167   : > { %v1693_v46 = vpack.c.bf16 %v1692_v45, %v1691_v44 }
 0x169   : > { %2256 = vmatmul.mubr.bf16.vlgmr.msra.gmra.mrb[16].mxu0 %v1693_v46 }
 0x23c   : > { %v1799_v48 = vpop.f32.mrb[16].mxu0 }
 0x23d   : > { %v1800_v49 = vadd.f32 %v2033_v47, %v1799_v48  ;;  %v2257_v50 = vpop.f32.mrb[17].mxu0 }
 0x23e   : > { %v1802_v51 = vpop.f32.mrb[18].mxu0 }
 0x23f   : > { %v1808_v52 = vmul.f32 0.1, %v1800_v49  ;;  %v1803_v53 = vadd.f32 %v2033_v47, %v1802_v51  ;;  %v2258_v54 = vpop.f32.mrb[19].mxu0  ;;  %vm1806_vm3 = vcmp.gt.f32.partialorder %v1800_v49, 0.0 }
 0x241   : > { %vm1807_vm4 = vcmp.gt.f32.partialorder %v1803_v53, 0.0  ;;  %v1809_v55 = vmul.f32 0.1, %v1803_v53  ;;  %v1810_v56 = vsel %vm1806_vm3, %v1800_v49, %v1808_v52 }
 0x243   : > { %v1811_v57 = vsel %vm1807_vm4, %v1803_v53, %v1809_v55 }
 0x244   : > { %v2052_v58 = vpack.c.bf16 %v1811_v57, %v1810_v56 }
 0x246   : > { %2053 = vst [vmem:[%s229_s11] sm:$0xff] %v2052_v58  }
 0x247 PF: > { %s15_s18 = sadd.s32 1, %s2411_s18  }
 0x248   : > { %p12_p4 = scmp.ge.s32.totalorder %s15_s18, 4  }
 0x24a   :  { %14 = sbr.rel (!%p12_p4) target bundleno = 1 (0x1), region = 70 }

// kernel: _lambda_.9
= control target key start
LH: loop header
LB: loop body
LE: loop exit
PB: predicated region body
PF: predicated region fallthrough
CT: control target
= control target key end

     0   :  { %vm2180_vm0 = vmmov 0   ;;  %vm1443_vm2 = vcmask 64512   ;;  %s2685_s1 = inlined_call_operand.vmem [shape: bf16[2048,128], index: 1, kind: input, shape index: {}]   ;;  %s2686_s0 = inlined_call_operand.vmem [shape: bf16[8,2048], index: 0, kind: input, shape index: {}]   ;;  %s2687_s4 = inlined_call_operand.vmem [shape: f32[128,128], index: 4, kind: input, shape index: {}]   ;;  %s2688_s2 = inlined_call_operand.vmem [shape: f32[1,128], index: 2, kind: input, shape index: {}, may-alias: {2,5}]   ;;  %s2689_s3 = inlined_call_operand.vmem [shape: f32[8,8], index: 3, kind: input, shape index: {}]   ;;  %s2690_s5 = inlined_call_operand.vmem [shape: f32[1,128], index: 5, kind: input, shape index: {}, may-alias: {2,5}]   ;;  %s2691_s6 = inlined_call_operand.vmem [shape: f32[8,128], index: 6, kind: output, shape index: {}]  }
   0x1   :  { %v2031_v0 = vld [vmem:[%s2685_s1 + $0x40] sm:$0xff]   ;;  %v2035_v4 = vld [vmem:[%s2685_s1 + $0x48] sm:$0xff]   ;;  %v2039_v8 = vld [vmem:[%s2685_s1 + $0x50] sm:$0xff]  }
   0x2   :  { %v2032_v1 = vld [vmem:[%s2685_s1 + $0xc0] sm:$0xff]   ;;  %1769 = vmatprep.subr.bf16.mxu0 %v2031_v0  ;;  %v2036_v5 = vld [vmem:[%s2685_s1 + $0xc8] sm:$0xff]   ;;  %v2040_v9 = vld [vmem:[%s2685_s1 + $0xd0] sm:$0xff]  }
   0x3   :  { %v2033_v2 = vld [vmem:[%s2685_s1] sm:$0xff]   ;;  %1791 = vmatprep.subr.bf16.mxu1 %v2032_v1  ;;  %v2037_v6 = vld [vmem:[%s2685_s1 + $0x8] sm:$0xff]   ;;  %v2041_v10 = vld [vmem:[%s2685_s1 + $0x10] sm:$0xff]  }
   0x4   :  { %v2034_v3 = vld [vmem:[%s2685_s1 + $0x80] sm:$0xff]   ;;  %1770 = vmatpush3.bf16.msra.mxu0 %v2033_v2  ;;  %v2038_v7 = vld [vmem:[%s2685_s1 + $0x88] sm:$0xff]   ;;  %v2042_v11 = vld [vmem:[%s2685_s1 + $0x90] sm:$0xff]  }
   0x5   :  { %1792 = vmatpush3.bf16.msra.mxu1 %v2034_v3  ;;  %1771 = vmatprep.subr.bf16.mxu0 %v2035_v4  ;;  %v2043_v12 = vld [vmem:[%s2685_s1 + $0x58] sm:$0xff]   ;;  %v2047_v16 = vld [vmem:[%s2685_s1 + $0x60] sm:$0xff]   ;;  %v2051_v20 = vld [vmem:[%s2685_s1 + $0x68] sm:$0xff]  }
   0x6   :  { %1793 = vmatprep.subr.bf16.mxu1 %v2036_v5  ;;  %v2044_v13 = vld [vmem:[%s2685_s1 + $0xd8] sm:$0xff]   ;;  %v2048_v17 = vld [vmem:[%s2685_s1 + $0xe0] sm:$0xff]   ;;  %v2052_v21 = vld [vmem:[%s2685_s1 + $0xe8] sm:$0xff]  }
   0x7   :  { %v2045_v14 = vld [vmem:[%s2685_s1 + $0x18] sm:$0xff]   ;;  %v2049_v18 = vld [vmem:[%s2685_s1 + $0x20] sm:$0xff]   ;;  %v2053_v22 = vld [vmem:[%s2685_s1 + $0x28] sm:$0xff]  }
   0x8   :  { %1772 = vmatpush3.bf16.msra.mxu0 %v2037_v6  ;;  %v2046_v15 = vld [vmem:[%s2685_s1 + $0x98] sm:$0xff]   ;;  %v2050_v19 = vld [vmem:[%s2685_s1 + $0xa0] sm:$0xff]   ;;  %v2054_v23 = vld [vmem:[%s2685_s1 + $0xa8] sm:$0xff]  }
   0x9   :  { %1794 = vmatpush3.bf16.msra.mxu1 %v2038_v7  ;;  %1773 = vmatprep.subr.bf16.mxu0 %v2039_v8  ;;  %v2055_v24 = vld [vmem:[%s2685_s1 + $0x70] sm:$0xff]   ;;  %v2059_v28 = vld [vmem:[%s2685_s1 + $0x78] sm:$0xff]   ;;  %v24_v32 = vld [vmem:[%s2686_s0] sm:$0xff] }
   0xa   :  { %1795 = vmatprep.subr.bf16.mxu1 %v2040_v9  ;;  %v2056_v25 = vld [vmem:[%s2685_s1 + $0xf0] sm:$0xff]   ;;  %v2060_v29 = vld [vmem:[%s2685_s1 + $0xf8] sm:$0xff]   ;;  %v25_v33 = vld [vmem:[%s2686_s0 + $0x8] sm:$0xff]  ;;  %v1622_v34 = vcombine.low %v24_v32, %v24_v32  ;;  %v1623_v35 = vcombine.high %v24_v32, %v24_v32 }
   0xb   :  { %v2057_v26 = vld [vmem:[%s2685_s1 + $0x30] sm:$0xff]   ;;  %v2061_v30 = vld [vmem:[%s2685_s1 + $0x38] sm:$0xff]   ;;  %v1624_v36 = vcombine.low %v25_v33, %v25_v33  ;;  %v1625_v37 = vcombine.high %v25_v33, %v25_v33  ;;  %v2067_v38 = vld [vmem:[%s2685_s1 + $0x140] sm:$0xff]  }
   0xc   :  { %1774 = vmatpush3.bf16.msra.mxu0 %v2041_v10  ;;  %v2058_v27 = vld [vmem:[%s2685_s1 + $0xb0] sm:$0xff]   ;;  %v2062_v31 = vld [vmem:[%s2685_s1 + $0xb8] sm:$0xff]   ;;  %v2068_v39 = vld [vmem:[%s2685_s1 + $0x1c0] sm:$0xff]   ;;  %1151 = vmatprep.mubr.bf16.mxu0 %v1623_v35 }
   0xd   :  { %1796 = vmatpush3.bf16.msra.mxu1 %v2042_v11  ;;  %1775 = vmatprep.subr.bf16.mxu0 %v2043_v12  ;;  %v2069_v40 = vld [vmem:[%s2685_s1 + $0x100] sm:$0xff]   ;;  %v2071_v42 = vld [vmem:[%s2685_s1 + $0x148] sm:$0xff]   ;;  %v2075_v46 = vld [vmem:[%s2685_s1 + $0x150] sm:$0xff]  }
   0xe   :  { %1797 = vmatprep.subr.bf16.mxu1 %v2044_v13  ;;  %1191 = vmatprep.mubr.bf16.mxu1 %v1625_v37  ;;  %v2070_v41 = vld [vmem:[%s2685_s1 + $0x180] sm:$0xff]   ;;  %v2072_v43 = vld [vmem:[%s2685_s1 + $0x1c8] sm:$0xff]   ;;  %v2076_v47 = vld [vmem:[%s2685_s1 + $0x1d0] sm:$0xff]  }
   0xf   :  { %v2073_v44 = vld [vmem:[%s2685_s1 + $0x108] sm:$0xff]   ;;  %v2077_v48 = vld [vmem:[%s2685_s1 + $0x110] sm:$0xff]   ;;  %v2079_v50 = vld [vmem:[%s2685_s1 + $0x158] sm:$0xff]  }
  0x10   :  { %1776 = vmatpush3.bf16.msra.mxu0 %v2045_v14  ;;  %v2074_v45 = vld [vmem:[%s2685_s1 + $0x188] sm:$0xff]   ;;  %v2078_v49 = vld [vmem:[%s2685_s1 + $0x190] sm:$0xff]   ;;  %v2080_v51 = vld [vmem:[%s2685_s1 + $0x1d8] sm:$0xff]  }
  0x11   :  { %1798 = vmatpush3.bf16.msra.mxu1 %v2046_v15  ;;  %1777 = vmatprep.subr.bf16.mxu0 %v2047_v16  ;;  %v2081_v52 = vld [vmem:[%s2685_s1 + $0x118] sm:$0xff]   ;;  %v2083_v54 = vld [vmem:[%s2685_s1 + $0x160] sm:$0xff]   ;;  %v2087_v58 = vld [vmem:[%s2685_s1 + $0x168] sm:$0xff]  }
  0x12   :  { %1799 = vmatprep.subr.bf16.mxu1 %v2048_v17  ;;  %v2082_v53 = vld [vmem:[%s2685_s1 + $0x198] sm:$0xff]   ;;  %v2084_v55 = vld [vmem:[%s2685_s1 + $0x1e0] sm:$0xff]   ;;  %v2088_v59 = vld [vmem:[%s2685_s1 + $0x1e8] sm:$0xff]  }
  0x13   :  { %v2085_v56 = vld [vmem:[%s2685_s1 + $0x120] sm:$0xff]   ;;  %v2089_v60 = vld [vmem:[%s2685_s1 + $0x128] sm:$0xff]   ;;  %v2091_v62 = vld [vmem:[%s2685_s1 + $0x170] sm:$0xff]  }
  0x14   :  { %1778 = vmatpush3.bf16.msra.mxu0 %v2049_v18  ;;  %v2086_v57 = vld [vmem:[%s2685_s1 + $0x1a0] sm:$0xff]   ;;  %v2090_v61 = vld [vmem:[%s2685_s1 + $0x1a8] sm:$0xff]   ;;  %v2092_v63 = vld [vmem:[%s2685_s1 + $0x1f0] sm:$0xff]  }
  0x15   :  { %1800 = vmatpush3.bf16.msra.mxu1 %v2050_v19  ;;  %1779 = vmatprep.subr.bf16.mxu0 %v2051_v20  ;;  %v2093_v0 = vld [vmem:[%s2685_s1 + $0x130] sm:$0xff]   ;;  %v2095_v2 = vld [vmem:[%s2685_s1 + $0x178] sm:$0xff]   ;;  %v2103_v12 = vld [vmem:[%s2685_s1 + $0x240] sm:$0xff]  }
  0x16   :  { %1801 = vmatprep.subr.bf16.mxu1 %v2052_v21  ;;  %v2094_v1 = vld [vmem:[%s2685_s1 + $0x1b0] sm:$0xff]   ;;  %v2096_v3 = vld [vmem:[%s2685_s1 + $0x1f8] sm:$0xff]   ;;  %v2104_v13 = vld [vmem:[%s2685_s1 + $0x2c0] sm:$0xff]  }
  0x17   :  { %v2097_v4 = vld [vmem:[%s2685_s1 + $0x138] sm:$0xff]   ;;  %v26_v6 = vld [vmem:[%s2686_s0 + $0x10] sm:$0xff]  ;;  %v2105_v14 = vld [vmem:[%s2685_s1 + $0x200] sm:$0xff]  }
  0x18   :  { %1780 = vmatpush3.bf16.msra.mxu0 %v2053_v22  ;;  %v2098_v5 = vld [vmem:[%s2685_s1 + $0x1b8] sm:$0xff]   ;;  %v1626_v7 = vcombine.low %v26_v6, %v26_v6  ;;  %v1627_v8 = vcombine.high %v26_v6, %v26_v6  ;;  %v2106_v15 = vld [vmem:[%s2685_s1 + $0x280] sm:$0xff]   ;;  %v2107_v16 = vld [vmem:[%s2685_s1 + $0x248] sm:$0xff]  }
  0x19   :  { %1802 = vmatpush3.bf16.msra.mxu1 %v2054_v23  ;;  %1781 = vmatprep.subr.bf16.mxu0 %v2055_v24  ;;  %v27_v9 = vld [vmem:[%s2686_s0 + $0x18] sm:$0xff]  ;;  %v2108_v17 = vld [vmem:[%s2685_s1 + $0x2c8] sm:$0xff]   ;;  %v2111_v20 = vld [vmem:[%s2685_s1 + $0x250] sm:$0xff]  }
  0x1a   :  { %1803 = vmatprep.subr.bf16.mxu1 %v2056_v25  ;;  %v1628_v10 = vcombine.low %v27_v9, %v27_v9  ;;  %v1629_v11 = vcombine.high %v27_v9, %v27_v9  ;;  %v2109_v18 = vld [vmem:[%s2685_s1 + $0x208] sm:$0xff]   ;;  %v2112_v21 = vld [vmem:[%s2685_s1 + $0x2d0] sm:$0xff]   ;;  %v2115_v24 = vld [vmem:[%s2685_s1 + $0x258] sm:$0xff]  }
  0x1b   :  { %v2110_v19 = vld [vmem:[%s2685_s1 + $0x288] sm:$0xff]   ;;  %v2113_v22 = vld [vmem:[%s2685_s1 + $0x210] sm:$0xff]   ;;  %v2116_v25 = vld [vmem:[%s2685_s1 + $0x2d8] sm:$0xff]  }
  0x1c   :  { %1782 = vmatpush3.bf16.msra.mxu0 %v2057_v26  ;;  %v2114_v23 = vld [vmem:[%s2685_s1 + $0x290] sm:$0xff]   ;;  %v2117_v26 = vld [vmem:[%s2685_s1 + $0x218] sm:$0xff]   ;;  %v2123_v32 = vld [vmem:[%s2685_s1 + $0x268] sm:$0xff]  }
  0x1d   :  { %1804 = vmatpush3.bf16.msra.mxu1 %v2058_v27  ;;  %1783 = vmatprep.subr.bf16.mxu0 %v2059_v28  ;;  %v2118_v27 = vld [vmem:[%s2685_s1 + $0x298] sm:$0xff]   ;;  %v2119_v28 = vld [vmem:[%s2685_s1 + $0x260] sm:$0xff]   ;;  %v2124_v33 = vld [vmem:[%s2685_s1 + $0x2e8] sm:$0xff]  }
  0x1e   :  { %1805 = vmatprep.subr.bf16.mxu1 %v2060_v29  ;;  %v2120_v29 = vld [vmem:[%s2685_s1 + $0x2e0] sm:$0xff]   ;;  %v2126_v35 = vld [vmem:[%s2685_s1 + $0x2a8] sm:$0xff]   ;;  %v2128_v37 = vld [vmem:[%s2685_s1 + $0x2f0] sm:$0xff]  }
  0x1f   :  { %v2159_v6 = vld [vmem:[%s2685_s1 + $0x368] sm:$0xff]  }
  0x20   :  { %1784 = vmatpush3.bf16.msra.mxu0 %v2061_v30  ;;  %v2121_v30 = vld [vmem:[%s2685_s1 + $0x220] sm:$0xff]   ;;  %v2162_v9 = vld [vmem:[%s2685_s1 + $0x3a8] sm:$0xff]  }
  0x21   :  { %1806 = vmatpush3.bf16.msra.mxu1 %v2062_v31  ;;  %1813 = vmatprep.subr.bf16.mxu0 %v2067_v38  ;;  %v2122_v31 = vld [vmem:[%s2685_s1 + $0x2a0] sm:$0xff]   ;;  %v2129_v38 = vld [vmem:[%s2685_s1 + $0x230] sm:$0xff]  }
  0x22   :  { %1835 = vmatprep.subr.bf16.mxu1 %v2068_v39  ;;  %v2130_v39 = vld [vmem:[%s2685_s1 + $0x2b0] sm:$0xff]  }
  0x23   :  { %1152 = vmatmul.mubr.bf16.vlgmr.msra.gmra.mrb[0].mxu0 %v1622_v34  ;;  %v2125_v34 = vld [vmem:[%s2685_s1 + $0x228] sm:$0xff]  }
  0x24   :  { %1192 = vmatmul.mubr.bf16.vlgmr.msra.gmra.mrb[0].mxu1 %v1624_v36  ;;  %1814 = vmatpush3.bf16.msra.mxu0 %v2069_v40  ;;  %v2127_v36 = vld [vmem:[%s2685_s1 + $0x270] sm:$0xff]   ;;  %v2131_v40 = vld [vmem:[%s2685_s1 + $0x278] sm:$0xff]  }
  0x25   :  { %1836 = vmatpush3.bf16.msra.mxu1 %v2070_v41  ;;  %1815 = vmatprep.subr.bf16.mxu0 %v2071_v42  ;;  %v2132_v41 = vld [vmem:[%s2685_s1 + $0x2f8] sm:$0xff]  }
  0x26   :  { %1837 = vmatprep.subr.bf16.mxu1 %v2072_v43  ;;  %1231 = vmatprep.mubr.bf16.mxu0 %v1627_v8  ;;  %v2133_v42 = vld [vmem:[%s2685_s1 + $0x238] sm:$0xff]   ;;  %v2161_v8 = vld [vmem:[%s2685_s1 + $0x328] sm:$0xff]  }
  0x27   :  { %1271 = vmatprep.mubr.bf16.mxu1 %v1629_v11  ;;  %v2134_v43 = vld [vmem:[%s2685_s1 + $0x2b8] sm:$0xff]   ;;  %v2164_v11 = vld [vmem:[%s2685_s1 + $0x3f0] sm:$0xff]  }
  0x28   :  { %1816 = vmatpush3.bf16.msra.mxu0 %v2073_v44  ;;  %v28_v44 = vld [vmem:[%s2686_s0 + $0x20] sm:$0xff] }
  0x29   :  { %1838 = vmatpush3.bf16.msra.mxu1 %v2074_v45  ;;  %1817 = vmatprep.subr.bf16.mxu0 %v2075_v46  ;;  %v29_v45 = vld [vmem:[%s2686_s0 + $0x28] sm:$0xff]  ;;  %v1630_v46 = vcombine.low %v28_v44, %v28_v44 }
  0x2a   :  { %1839 = vmatprep.subr.bf16.mxu1 %v2076_v47  ;;  %v1631_v47 = vcombine.high %v28_v44, %v28_v44 }
  0x2c   :  { %1818 = vmatpush3.bf16.msra.mxu0 %v2077_v48  ;;  %v1632_v48 = vcombine.low %v29_v45, %v29_v45 }
  0x2d   :  { %1840 = vmatpush3.bf16.msra.mxu1 %v2078_v49  ;;  %1819 = vmatprep.subr.bf16.mxu0 %v2079_v50  ;;  %v1633_v49 = vcombine.high %v29_v45, %v29_v45  ;;  %v2139_v50 = vld [vmem:[%s2685_s1 + $0x340] sm:$0xff]  }
  0x2e   :  { %1841 = vmatprep.subr.bf16.mxu1 %v2080_v51  ;;  %v2140_v51 = vld [vmem:[%s2685_s1 + $0x3c0] sm:$0xff]  }
  0x2f   :  { %v1621_v45 = vld [vmem:[%s2688_s2] ss:$0 sm:$0xff] }
  0x30   :  { %1820 = vmatpush3.bf16.msra.mxu0 %v2081_v52  ;;  %v2141_v52 = vld [vmem:[%s2685_s1 + $0x300] sm:$0xff]  }
  0x31   :  { %1842 = vmatpush3.bf16.msra.mxu1 %v2082_v53  ;;  %1821 = vmatprep.subr.bf16.mxu0 %v2083_v54  ;;  %v2142_v53 = vld [vmem:[%s2685_s1 + $0x380] sm:$0xff]   ;;  %v2143_v54 = vld [vmem:[%s2685_s1 + $0x348] sm:$0xff]  }
  0x32   :  { %1843 = vmatprep.subr.bf16.mxu1 %v2084_v55  ;;  %v2144_v55 = vld [vmem:[%s2685_s1 + $0x3c8] sm:$0xff]  }
  0x34   :  { %1822 = vmatpush3.bf16.msra.mxu0 %v2085_v56  ;;  %v2145_v56 = vld [vmem:[%s2685_s1 + $0x308] sm:$0xff]  }
  0x35   :  { %1844 = vmatpush3.bf16.msra.mxu1 %v2086_v57  ;;  %1823 = vmatprep.subr.bf16.mxu0 %v2087_v58  ;;  %v2146_v57 = vld [vmem:[%s2685_s1 + $0x388] sm:$0xff]   ;;  %v2147_v58 = vld [vmem:[%s2685_s1 + $0x350] sm:$0xff]  }
  0x36   :  { %1845 = vmatprep.subr.bf16.mxu1 %v2088_v59  ;;  %v2148_v59 = vld [vmem:[%s2685_s1 + $0x3d0] sm:$0xff]  }
  0x38   :  { %1824 = vmatpush3.bf16.msra.mxu0 %v2089_v60  ;;  %v2149_v60 = vld [vmem:[%s2685_s1 + $0x310] sm:$0xff]  }
  0x39   :  { %1846 = vmatpush3.bf16.msra.mxu1 %v2090_v61  ;;  %1825 = vmatprep.subr.bf16.mxu0 %v2091_v62  ;;  %v2150_v61 = vld [vmem:[%s2685_s1 + $0x390] sm:$0xff]   ;;  %v2151_v62 = vld [vmem:[%s2685_s1 + $0x358] sm:$0xff]  }
  0x3a   :  { %1847 = vmatprep.subr.bf16.mxu1 %v2092_v63  ;;  %v2152_v63 = vld [vmem:[%s2685_s1 + $0x3d8] sm:$0xff]  }
  0x3c   :  { %1826 = vmatpush3.bf16.msra.mxu0 %v2093_v0  ;;  %v2153_v0 = vld [vmem:[%s2685_s1 + $0x318] sm:$0xff]  }
  0x3d   :  { %1848 = vmatpush3.bf16.msra.mxu1 %v2094_v1  ;;  %1827 = vmatprep.subr.bf16.mxu0 %v2095_v2  ;;  %v2154_v1 = vld [vmem:[%s2685_s1 + $0x398] sm:$0xff]   ;;  %v2155_v2 = vld [vmem:[%s2685_s1 + $0x360] sm:$0xff]  }
  0x3e   :  { %1849 = vmatprep.subr.bf16.mxu1 %v2096_v3  ;;  %v2156_v3 = vld [vmem:[%s2685_s1 + $0x3e0] sm:$0xff]  }
  0x40   :  { %1828 = vmatpush3.bf16.msra.mxu0 %v2097_v4  ;;  %v2157_v4 = vld [vmem:[%s2685_s1 + $0x320] sm:$0xff]  }
  0x41   :  { %1850 = vmatpush3.bf16.msra.mxu1 %v2098_v5  ;;  %1857 = vmatprep.subr.bf16.mxu0 %v2103_v12  ;;  %v2158_v5 = vld [vmem:[%s2685_s1 + $0x3a0] sm:$0xff]   ;;  %v2165_v12 = vld [vmem:[%s2685_s1 + $0x330] sm:$0xff]  }
  0x42   :  { %1879 = vmatprep.subr.bf16.mxu1 %v2104_v13  ;;  %v2166_v13 = vld [vmem:[%s2685_s1 + $0x3b0] sm:$0xff]  }
  0x43   :  { %1232 = vmatmul.mubr.bf16.vlgmr.msra.gmra.mrb[4].mxu0 %v1626_v7  ;;  %v2160_v7 = vld [vmem:[%s2685_s1 + $0x3e8] sm:$0xff]  }
  0x44   :  { %1272 = vmatmul.mubr.bf16.vlgmr.msra.gmra.mrb[4].mxu1 %v1628_v10  ;;  %1858 = vmatpush3.bf16.msra.mxu0 %v2105_v14  ;;  %v2163_v10 = vld [vmem:[%s2685_s1 + $0x370] sm:$0xff]   ;;  %v2167_v14 = vld [vmem:[%s2685_s1 + $0x378] sm:$0xff]  }
  0x45   :  { %1880 = vmatpush3.bf16.msra.mxu1 %v2106_v15  ;;  %1859 = vmatprep.subr.bf16.mxu0 %v2107_v16  ;;  %v2168_v15 = vld [vmem:[%s2685_s1 + $0x3f8] sm:$0xff]  }
  0x46   :  { %1881 = vmatprep.subr.bf16.mxu1 %v2108_v17  ;;  %1311 = vmatprep.mubr.bf16.mxu0 %v1631_v47  ;;  %v2169_v16 = vld [vmem:[%s2685_s1 + $0x338] sm:$0xff]  }
  0x47   :  { %1351 = vmatprep.mubr.bf16.mxu1 %v1633_v49  ;;  %v2170_v17 = vld [vmem:[%s2685_s1 + $0x3b8] sm:$0xff]  }
  0x48   :  { %1860 = vmatpush3.bf16.msra.mxu0 %v2109_v18  ;;  %v30_v18 = vld [vmem:[%s2686_s0 + $0x30] sm:$0xff] }
  0x49   :  { %1882 = vmatpush3.bf16.msra.mxu1 %v2110_v19  ;;  %1861 = vmatprep.subr.bf16.mxu0 %v2111_v20  ;;  %v31_v19 = vld [vmem:[%s2686_s0 + $0x38] sm:$0xff]  ;;  %v1634_v20 = vcombine.low %v30_v18, %v30_v18 }
  0x4a   :  { %1883 = vmatprep.subr.bf16.mxu1 %v2112_v21  ;;  %v1635_v21 = vcombine.high %v30_v18, %v30_v18 }
  0x4c   :  { %1862 = vmatpush3.bf16.msra.mxu0 %v2113_v22  ;;  %v1636_v22 = vcombine.low %v31_v19, %v31_v19 }
  0x4d   :  { %1884 = vmatpush3.bf16.msra.mxu1 %v2114_v23  ;;  %1863 = vmatprep.subr.bf16.mxu0 %v2115_v24  ;;  %v1637_v23 = vcombine.high %v31_v19, %v31_v19  ;;  %v2179_v24 = vmov 0.0  }
  0x4e   :  { %1885 = vmatprep.subr.bf16.mxu1 %v2116_v25  ;;  %v2181_v25 = vmov 0.0|0.0  }
  0x50   :  { %1864 = vmatpush3.bf16.msra.mxu0 %v2117_v26  ;;  %v1517_v26 = vld [vmem:[%s2687_s4] sm:$0xff] }
  0x51   :  { %1886 = vmatpush3.bf16.msra.mxu1 %v2118_v27  ;;  %1865 = vmatprep.subr.bf16.mxu0 %v2119_v28  ;;  %v1518_v27 = vld [vmem:[%s2687_s4 + $0x8] sm:$0xff]  ;;  %v1519_v28 = vld [vmem:[%s2687_s4 + $0x10] sm:$0xff] }
  0x52   :  { %1887 = vmatprep.subr.bf16.mxu1 %v2120_v29  ;;  %v2005_v29 = vpack.c.bf16 %v1518_v27, %v1517_v26 }
  0x54   :  { %1866 = vmatpush3.bf16.msra.mxu0 %v2121_v30  ;;  %v1520_v30 = vld [vmem:[%s2687_s4 + $0x18] sm:$0xff] }
  0x55   :  { %1888 = vmatpush3.bf16.msra.mxu1 %v2122_v31  ;;  %1867 = vmatprep.subr.bf16.mxu0 %v2123_v32  ;;  %v2008_v31 = vpack.c.bf16 %v1520_v30, %v1519_v28  ;;  %v1521_v32 = vld [vmem:[%s2687_s4 + $0x20] sm:$0xff] }
  0x56   :  { %1889 = vmatprep.subr.bf16.mxu1 %v2124_v33  ;;  %v1522_v33 = vld [vmem:[%s2687_s4 + $0x28] sm:$0xff] }
  0x58   :  { %1868 = vmatpush3.bf16.msra.mxu0 %v2125_v34  ;;  %v2011_v34 = vpack.c.bf16 %v1522_v33, %v1521_v32 }
  0x59   :  { %1890 = vmatpush3.bf16.msra.mxu1 %v2126_v35  ;;  %1869 = vmatprep.subr.bf16.mxu0 %v2127_v36  ;;  %v1523_v35 = vld [vmem:[%s2687_s4 + $0x30] sm:$0xff]  ;;  %v1524_v36 = vld [vmem:[%s2687_s4 + $0x38] sm:$0xff] }
  0x5a   :  { %1891 = vmatprep.subr.bf16.mxu1 %v2128_v37  ;;  %v2014_v37 = vpack.c.bf16 %v1524_v36, %v1523_v35  ;;  %v1442_v36 = vld [vmem:[%s2689_s3] sm:$0xff] }
  0x5c   :  { %1870 = vmatpush3.bf16.msra.mxu0 %v2129_v38  ;;  %v1525_v38 = vld [vmem:[%s2687_s4 + $0x40] sm:$0xff] }
  0x5d   :  { %1892 = vmatpush3.bf16.msra.mxu1 %v2130_v39  ;;  %1871 = vmatprep.subr.bf16.mxu0 %v2131_v40  ;;  %v1526_v39 = vld [vmem:[%s2687_s4 + $0x48] sm:$0xff] }
  0x5e   :  { %1893 = vmatprep.subr.bf16.mxu1 %v2132_v41  ;;  %v2017_v40 = vpack.c.bf16 %v1526_v39, %v1525_v38  ;;  %v1527_v41 = vld [vmem:[%s2687_s4 + $0x50] sm:$0xff] }
  0x60   :  { %1872 = vmatpush3.bf16.msra.mxu0 %v2133_v42  ;;  %v1528_v42 = vld [vmem:[%s2687_s4 + $0x58] sm:$0xff] }
  0x61   :  { %1894 = vmatpush3.bf16.msra.mxu1 %v2134_v43  ;;  %1901 = vmatprep.subr.bf16.mxu0 %v2139_v50 }
  0x62   :  { %1923 = vmatprep.subr.bf16.mxu1 %v2140_v51 }
  0x63   :  { %1312 = vmatmul.mubr.bf16.vlgmr.msra.gmra.mrb[8].mxu0 %v1630_v46 }
  0x64   :  { %1352 = vmatmul.mubr.bf16.vlgmr.msra.gmra.mrb[8].mxu1 %v1632_v48  ;;  %1902 = vmatpush3.bf16.msra.mxu0 %v2141_v52  ;;  %v2020_v52 = vpack.c.bf16 %v1528_v42, %v1527_v41 }
  0x65   :  { %1924 = vmatpush3.bf16.msra.mxu1 %v2142_v53  ;;  %1903 = vmatprep.subr.bf16.mxu0 %v2143_v54 }
  0x66   :  { %1925 = vmatprep.subr.bf16.mxu1 %v2144_v55  ;;  %1391 = vmatprep.mubr.bf16.mxu0 %v1635_v21  ;;  %v1529_v55 = vld [vmem:[%s2687_s4 + $0x60] sm:$0xff] }
  0x67   :  { %1431 = vmatprep.mubr.bf16.mxu1 %v1637_v23 }
  0x68   :  { %1904 = vmatpush3.bf16.msra.mxu0 %v2145_v56  ;;  %v1530_v56 = vld [vmem:[%s2687_s4 + $0x68] sm:$0xff] }
  0x69   :  { %1926 = vmatpush3.bf16.msra.mxu1 %v2146_v57  ;;  %1905 = vmatprep.subr.bf16.mxu0 %v2147_v58 }
  0x6a   :  { %1927 = vmatprep.subr.bf16.mxu1 %v2148_v59  ;;  %v2023_v59 = vpack.c.bf16 %v1530_v56, %v1529_v55 }
  0x6c   :  { %1906 = vmatpush3.bf16.msra.mxu0 %v2149_v60  ;;  %v1531_v60 = vld [vmem:[%s2687_s4 + $0x70] sm:$0xff] }
  0x6d   :  { %1928 = vmatpush3.bf16.msra.mxu1 %v2150_v61  ;;  %1907 = vmatprep.subr.bf16.mxu0 %v2151_v62  ;;  %v1532_v61 = vld [vmem:[%s2687_s4 + $0x78] sm:$0xff] }
  0x6e   :  { %1929 = vmatprep.subr.bf16.mxu1 %v2152_v63  ;;  %v2026_v62 = vpack.c.bf16 %v1532_v61, %v1531_v60 }
  0x70   :  { %1908 = vmatpush3.bf16.msra.mxu0 %v2153_v0 }
  0x71   :  { %1930 = vmatpush3.bf16.msra.mxu1 %v2154_v1  ;;  %1909 = vmatprep.subr.bf16.mxu0 %v2155_v2 }
  0x72   :  { %1931 = vmatprep.subr.bf16.mxu1 %v2156_v3 }
  0x74   :  { %1910 = vmatpush3.bf16.msra.mxu0 %v2157_v4 }
  0x75   :  { %1932 = vmatpush3.bf16.msra.mxu1 %v2158_v5  ;;  %1911 = vmatprep.subr.bf16.mxu0 %v2159_v6 }
  0x76   :  { %1933 = vmatprep.subr.bf16.mxu1 %v2160_v7 }
  0x78   :  { %1912 = vmatpush3.bf16.msra.mxu0 %v2161_v8 }
  0x79   :  { %1934 = vmatpush3.bf16.msra.mxu1 %v2162_v9  ;;  %1913 = vmatprep.subr.bf16.mxu0 %v2163_v10 }
  0x7a   :  { %1935 = vmatprep.subr.bf16.mxu1 %v2164_v11 }
  0x7c   :  { %1914 = vmatpush3.bf16.msra.mxu0 %v2165_v12 }
  0x7d   :  { %1936 = vmatpush3.bf16.msra.mxu1 %v2166_v13  ;;  %1915 = vmatprep.subr.bf16.mxu0 %v2167_v14 }
  0x7e   :  { %1937 = vmatprep.subr.bf16.mxu1 %v2168_v15 }
  0x80   :  { %1916 = vmatpush3.bf16.msra.mxu0 %v2169_v16 }
  0x81   :  { %1938 = vmatpush3.bf16.msra.mxu1 %v2170_v17  ;;  %1964 = vmatprep.subr.mxu0 %v2179_v24 }
  0x82   :  { %2004 = vmatprep.subr.bf16.mxu1 %v2181_v25 }
  0x83   :  { %1392 = vmatmul.mubr.bf16.vlgmr.msra.gmra.mrb[12].mxu0 %v1634_v20 }
  0x84   :  { %1432 = vmatmul.mubr.bf16.vlgmr.msra.gmra.mrb[12].mxu1 %v1636_v22  ;;  %1966 = vmatprep.mubr.msk.f32.mxu0 %vm2180_vm0, %v2179_v24 }
  0x85   :  { %2001 = vmatprep.mubr.msk.f32.mxu1 %vm2180_vm0, %v2179_v24  ;;  %2006 = vmatpush3.bf16.msra.mxu1 %v2005_v29 }
  0x86   :  { %2007 = vmatprep.subr.bf16.mxu1 %v2181_v25 }
  0x89   :  { %2009 = vmatpush3.bf16.msra.mxu1 %v2008_v31 }
  0x8a   :  { %2010 = vmatprep.subr.bf16.mxu1 %v2181_v25 }
  0x8d   :  { %2012 = vmatpush3.bf16.msra.mxu1 %v2011_v34 }
  0x8e   :  { %2013 = vmatprep.subr.bf16.mxu1 %v2181_v25 }
  0x91   :  { %2015 = vmatpush3.bf16.msra.mxu1 %v2014_v37 }
  0x92   :  { %2016 = vmatprep.subr.bf16.mxu1 %v2181_v25 }
  0x95   :  { %2018 = vmatpush3.bf16.msra.mxu1 %v2017_v40  ;;  %v1767_v40 = vld [vmem:[%s2690_s5] ss:$0 sm:$0xff] }
  0x96   :  { %2019 = vmatprep.subr.bf16.mxu1 %v2181_v25 }
  0x99   :  { %2021 = vmatpush3.bf16.msra.mxu1 %v2020_v52 }
  0x9a   :  { %2022 = vmatprep.subr.bf16.mxu1 %v2181_v25 }
  0x9d   :  { %2024 = vmatpush3.bf16.msra.mxu1 %v2023_v59 }
  0x9e   :  { %2025 = vmatprep.subr.bf16.mxu1 %v2181_v25 }
  0xa1   :  { %2027 = vmatpush3.bf16.msra.mxu1 %v2026_v62 }
  0xf6   :  { %v1785_v43 = vpop.f32.mrb[0].mxu0 }
  0xf7   :  { %v1807_v44 = vpop.f32.mrb[0].mxu1  ;;  %v1786_v46 = vpop.f32.mrb[1].mxu0 }
  0xf8   :  { %v1808_v47 = vpop.f32.mrb[1].mxu1  ;;  %v1787_v48 = vadd.f32 %v1786_v46, %v1785_v43  ;;  %v1788_v50 = vpop.f32.mrb[2].mxu0 }
  0xf9   :  { %v1809_v49 = vadd.f32 %v1808_v47, %v1807_v44  ;;  %v1810_v51 = vpop.f32.mrb[2].mxu1  ;;  %v1789_v53 = vpop.f32.mrb[3].mxu0 }
  0xfa   :  { %v1811_v54 = vpop.f32.mrb[3].mxu1  ;;  %v1154_v57 = vadd.f32 %v1787_v48, %v1621_v45 }
  0xfc   :  { %v1194_v58 = vadd.f32 %v1809_v49, %v1154_v57 }
 0x116   :  { %v1829_v63 = vpop.f32.mrb[4].mxu0 }
 0x117   :  { %v1851_v0 = vpop.f32.mrb[4].mxu1  ;;  %v1830_v1 = vpop.f32.mrb[5].mxu0 }
 0x118   :  { %v1852_v2 = vpop.f32.mrb[5].mxu1  ;;  %v1831_v3 = vadd.f32 %v1830_v1, %v1829_v63  ;;  %v1832_v5 = vpop.f32.mrb[6].mxu0 }
 0x119   :  { %v1853_v4 = vadd.f32 %v1852_v2, %v1851_v0  ;;  %v1854_v6 = vpop.f32.mrb[6].mxu1  ;;  %v1833_v7 = vpop.f32.mrb[7].mxu0 }
 0x11a   :  { %v1855_v8 = vpop.f32.mrb[7].mxu1  ;;  %v1234_v9 = vadd.f32 %v1831_v3, %v1194_v58 }
 0x11c   :  { %v1274_v10 = vadd.f32 %v1853_v4, %v1234_v9 }
 0x136   :  { %v1873_v11 = vpop.f32.mrb[8].mxu0 }
 0x137   :  { %v1895_v12 = vpop.f32.mrb[8].mxu1  ;;  %v1874_v13 = vpop.f32.mrb[9].mxu0 }
 0x138   :  { %v1875_v14 = vadd.f32 %v1874_v13, %v1873_v11  ;;  %v1896_v15 = vpop.f32.mrb[9].mxu1  ;;  %v1876_v16 = vpop.f32.mrb[10].mxu0 }
 0x139   :  { %v1897_v17 = vadd.f32 %v1896_v15, %v1895_v12  ;;  %v1898_v18 = vpop.f32.mrb[10].mxu1  ;;  %v1877_v19 = vpop.f32.mrb[11].mxu0 }
 0x13a   :  { %v1314_v20 = vadd.f32 %v1875_v14, %v1274_v10  ;;  %v1899_v21 = vpop.f32.mrb[11].mxu1 }
 0x13c   :  { %v1354_v22 = vadd.f32 %v1897_v17, %v1314_v20 }
 0x156   :  { %v1917_v23 = vpop.f32.mrb[12].mxu0 }
 0x157   :  { %v1939_v24 = vpop.f32.mrb[12].mxu1  ;;  %v1918_v25 = vpop.f32.mrb[13].mxu0 }
 0x158   :  { %v1919_v26 = vadd.f32 %v1918_v25, %v1917_v23  ;;  %v1940_v27 = vpop.f32.mrb[13].mxu1  ;;  %v1920_v28 = vpop.f32.mrb[14].mxu0 }
 0x159   :  { %v1941_v29 = vadd.f32 %v1940_v27, %v1939_v24  ;;  %v1942_v30 = vpop.f32.mrb[14].mxu1  ;;  %v1921_v31 = vpop.f32.mrb[15].mxu0 }
 0x15a   :  { %v1394_v32 = vadd.f32 %v1919_v26, %v1354_v22  ;;  %v1943_v33 = vpop.f32.mrb[15].mxu1 }
 0x15c   :  { %v1434_v34 = vadd.f32 %v1941_v29, %v1394_v32 }
 0x15e   :  { %v1440_v35 = vmul.f32 0.1, %v1434_v34  ;;  %vm1439_vm1 = vcmp.gt.f32.partialorder %v1434_v34, 0.0 }
 0x160   :  { %v1441_v37 = vsel %vm1439_vm1, %v1434_v34, %v1440_v35 }
 0x161   :  { %1965 = vmatpush3.msra.mxu0 %v1441_v37 }
 0x162   :  { %1967 = vmatmul.mubr.msk.f32.vlgmr.msra.gmra.mrb[16].mxu0 %vm1443_vm2, %v1442_v36 }
 0x235   :  { %v1513_v38 = vpop.f32.mrb[16].mxu0 }
 0x236   :  { %v1968_v39 = vpop.f32.mrb[17].mxu0  ;;  %2002 = vmatmul.mubr.f32.vlgmr.msra.gmra.mrb[16].mxu1 %v1513_v38 }
 0x309   :  { %v1606_v41 = vpop.f32.mrb[16].mxu1 }
 0x30a   :  { %v1607_v42 = vadd.f32 %v1767_v40, %v1606_v41  ;;  %v2003_v43 = vpop.f32.mrb[17].mxu1 }
 0x30c   :  { %v1768_v44 = vmul.f32 -1.442695, %v1607_v42 }
 0x30e   :  { %2175 = vpow2.f32 %v1768_v44 }
 0x318   :  { %v2176_v45 = vpop.eup %2175 }
 0x319   :  { %v1613_v46 = vadd.f32 1.0, %v2176_v45 }
 0x31b   :  { %2177 = vrcp.f32 %v1613_v46 }
 0x325   :  { %v2178_v47 = vpop.eup %2177 }
 0x326   :  { %1616 = vst [vmem:[%s2691_s6] sm:$0xff] %v2178_v47 }

// kernel: _lambda_.8
= control target key start
LH: loop header
LB: loop body
LE: loop exit
PB: predicated region body
PF: predicated region fallthrough
CT: control target
= control target key end

     0   :  { %s2338_s1 = inlined_call_operand.vmem [shape: bf16[2048,128], index: 1, kind: input, shape index: {}]   ;;  %s2339_s0 = inlined_call_operand.vmem [shape: bf16[8,2048], index: 0, kind: input, shape index: {}]   ;;  %s2340_s2 = inlined_call_operand.vmem [shape: f32[1,128], index: 2, kind: input, shape index: {}]   ;;  %s2341_s3 = inlined_call_operand.vmem [shape: bf16[8,128], index: 3, kind: output, shape index: {}]  }
   0x1   :  { %v1760_v0 = vld [vmem:[%s2338_s1 + $0x40] sm:$0xff]   ;;  %v1764_v4 = vld [vmem:[%s2338_s1 + $0x48] sm:$0xff]   ;;  %v1768_v8 = vld [vmem:[%s2338_s1 + $0x50] sm:$0xff]  }
   0x2   :  { %v1761_v1 = vld [vmem:[%s2338_s1 + $0xc0] sm:$0xff]   ;;  %1584 = vmatprep.subr.bf16.mxu0 %v1760_v0  ;;  %v1765_v5 = vld [vmem:[%s2338_s1 + $0xc8] sm:$0xff]   ;;  %v1769_v9 = vld [vmem:[%s2338_s1 + $0xd0] sm:$0xff]  }
   0x3   :  { %v1762_v2 = vld [vmem:[%s2338_s1] sm:$0xff]   ;;  %1606 = vmatprep.subr.bf16.mxu1 %v1761_v1  ;;  %v1766_v6 = vld [vmem:[%s2338_s1 + $0x8] sm:$0xff]   ;;  %v1770_v10 = vld [vmem:[%s2338_s1 + $0x10] sm:$0xff]  }
   0x4   :  { %v1763_v3 = vld [vmem:[%s2338_s1 + $0x80] sm:$0xff]   ;;  %1585 = vmatpush3.bf16.msra.mxu0 %v1762_v2  ;;  %v1767_v7 = vld [vmem:[%s2338_s1 + $0x88] sm:$0xff]   ;;  %v1771_v11 = vld [vmem:[%s2338_s1 + $0x90] sm:$0xff]  }
   0x5   :  { %1607 = vmatpush3.bf16.msra.mxu1 %v1763_v3  ;;  %1586 = vmatprep.subr.bf16.mxu0 %v1764_v4  ;;  %v1772_v12 = vld [vmem:[%s2338_s1 + $0x58] sm:$0xff]   ;;  %v1776_v16 = vld [vmem:[%s2338_s1 + $0x60] sm:$0xff]   ;;  %v1780_v20 = vld [vmem:[%s2338_s1 + $0x68] sm:$0xff]  }
   0x6   :  { %1608 = vmatprep.subr.bf16.mxu1 %v1765_v5  ;;  %v1773_v13 = vld [vmem:[%s2338_s1 + $0xd8] sm:$0xff]   ;;  %v1777_v17 = vld [vmem:[%s2338_s1 + $0xe0] sm:$0xff]   ;;  %v1781_v21 = vld [vmem:[%s2338_s1 + $0xe8] sm:$0xff]  }
   0x7   :  { %v1774_v14 = vld [vmem:[%s2338_s1 + $0x18] sm:$0xff]   ;;  %v1778_v18 = vld [vmem:[%s2338_s1 + $0x20] sm:$0xff]   ;;  %v1782_v22 = vld [vmem:[%s2338_s1 + $0x28] sm:$0xff]  }
   0x8   :  { %1587 = vmatpush3.bf16.msra.mxu0 %v1766_v6  ;;  %v1775_v15 = vld [vmem:[%s2338_s1 + $0x98] sm:$0xff]   ;;  %v1779_v19 = vld [vmem:[%s2338_s1 + $0xa0] sm:$0xff]   ;;  %v1783_v23 = vld [vmem:[%s2338_s1 + $0xa8] sm:$0xff]  }
   0x9   :  { %1609 = vmatpush3.bf16.msra.mxu1 %v1767_v7  ;;  %1588 = vmatprep.subr.bf16.mxu0 %v1768_v8  ;;  %v1784_v24 = vld [vmem:[%s2338_s1 + $0x70] sm:$0xff]   ;;  %v1788_v28 = vld [vmem:[%s2338_s1 + $0x78] sm:$0xff]   ;;  %v15_v32 = vld [vmem:[%s2339_s0] sm:$0xff] }
   0xa   :  { %1610 = vmatprep.subr.bf16.mxu1 %v1769_v9  ;;  %v1785_v25 = vld [vmem:[%s2338_s1 + $0xf0] sm:$0xff]   ;;  %v1789_v29 = vld [vmem:[%s2338_s1 + $0xf8] sm:$0xff]   ;;  %v16_v33 = vld [vmem:[%s2339_s0 + $0x8] sm:$0xff]  ;;  %v1440_v34 = vcombine.low %v15_v32, %v15_v32  ;;  %v1441_v35 = vcombine.high %v15_v32, %v15_v32 }
   0xb   :  { %v1786_v26 = vld [vmem:[%s2338_s1 + $0x30] sm:$0xff]   ;;  %v1790_v30 = vld [vmem:[%s2338_s1 + $0x38] sm:$0xff]   ;;  %v1442_v36 = vcombine.low %v16_v33, %v16_v33  ;;  %v1443_v37 = vcombine.high %v16_v33, %v16_v33  ;;  %v1796_v38 = vld [vmem:[%s2338_s1 + $0x140] sm:$0xff]  }
   0xc   :  { %1589 = vmatpush3.bf16.msra.mxu0 %v1770_v10  ;;  %v1787_v27 = vld [vmem:[%s2338_s1 + $0xb0] sm:$0xff]   ;;  %v1791_v31 = vld [vmem:[%s2338_s1 + $0xb8] sm:$0xff]   ;;  %v1797_v39 = vld [vmem:[%s2338_s1 + $0x1c0] sm:$0xff]   ;;  %1142 = vmatprep.mubr.bf16.mxu0 %v1441_v35 }
   0xd   :  { %1611 = vmatpush3.bf16.msra.mxu1 %v1771_v11  ;;  %1590 = vmatprep.subr.bf16.mxu0 %v1772_v12  ;;  %v1798_v40 = vld [vmem:[%s2338_s1 + $0x100] sm:$0xff]   ;;  %v1800_v42 = vld [vmem:[%s2338_s1 + $0x148] sm:$0xff]   ;;  %v1804_v46 = vld [vmem:[%s2338_s1 + $0x150] sm:$0xff]  }
   0xe   :  { %1612 = vmatprep.subr.bf16.mxu1 %v1773_v13  ;;  %1182 = vmatprep.mubr.bf16.mxu1 %v1443_v37  ;;  %v1799_v41 = vld [vmem:[%s2338_s1 + $0x180] sm:$0xff]   ;;  %v1801_v43 = vld [vmem:[%s2338_s1 + $0x1c8] sm:$0xff]   ;;  %v1805_v47 = vld [vmem:[%s2338_s1 + $0x1d0] sm:$0xff]  }
   0xf   :  { %v1802_v44 = vld [vmem:[%s2338_s1 + $0x108] sm:$0xff]   ;;  %v1806_v48 = vld [vmem:[%s2338_s1 + $0x110] sm:$0xff]   ;;  %v1808_v50 = vld [vmem:[%s2338_s1 + $0x158] sm:$0xff]  }
  0x10   :  { %1591 = vmatpush3.bf16.msra.mxu0 %v1774_v14  ;;  %v1803_v45 = vld [vmem:[%s2338_s1 + $0x188] sm:$0xff]   ;;  %v1807_v49 = vld [vmem:[%s2338_s1 + $0x190] sm:$0xff]   ;;  %v1809_v51 = vld [vmem:[%s2338_s1 + $0x1d8] sm:$0xff]  }
  0x11   :  { %1613 = vmatpush3.bf16.msra.mxu1 %v1775_v15  ;;  %1592 = vmatprep.subr.bf16.mxu0 %v1776_v16  ;;  %v1810_v52 = vld [vmem:[%s2338_s1 + $0x118] sm:$0xff]   ;;  %v1812_v54 = vld [vmem:[%s2338_s1 + $0x160] sm:$0xff]   ;;  %v1816_v58 = vld [vmem:[%s2338_s1 + $0x168] sm:$0xff]  }
  0x12   :  { %1614 = vmatprep.subr.bf16.mxu1 %v1777_v17  ;;  %v1811_v53 = vld [vmem:[%s2338_s1 + $0x198] sm:$0xff]   ;;  %v1813_v55 = vld [vmem:[%s2338_s1 + $0x1e0] sm:$0xff]   ;;  %v1817_v59 = vld [vmem:[%s2338_s1 + $0x1e8] sm:$0xff]  }
  0x13   :  { %v1814_v56 = vld [vmem:[%s2338_s1 + $0x120] sm:$0xff]   ;;  %v1818_v60 = vld [vmem:[%s2338_s1 + $0x128] sm:$0xff]   ;;  %v1820_v62 = vld [vmem:[%s2338_s1 + $0x170] sm:$0xff]  }
  0x14   :  { %1593 = vmatpush3.bf16.msra.mxu0 %v1778_v18  ;;  %v1815_v57 = vld [vmem:[%s2338_s1 + $0x1a0] sm:$0xff]   ;;  %v1819_v61 = vld [vmem:[%s2338_s1 + $0x1a8] sm:$0xff]   ;;  %v1821_v63 = vld [vmem:[%s2338_s1 + $0x1f0] sm:$0xff]  }
  0x15   :  { %1615 = vmatpush3.bf16.msra.mxu1 %v1779_v19  ;;  %1594 = vmatprep.subr.bf16.mxu0 %v1780_v20  ;;  %v1822_v0 = vld [vmem:[%s2338_s1 + $0x130] sm:$0xff]   ;;  %v1824_v2 = vld [vmem:[%s2338_s1 + $0x178] sm:$0xff]   ;;  %v1832_v12 = vld [vmem:[%s2338_s1 + $0x240] sm:$0xff]  }
  0x16   :  { %1616 = vmatprep.subr.bf16.mxu1 %v1781_v21  ;;  %v1823_v1 = vld [vmem:[%s2338_s1 + $0x1b0] sm:$0xff]   ;;  %v1825_v3 = vld [vmem:[%s2338_s1 + $0x1f8] sm:$0xff]   ;;  %v1833_v13 = vld [vmem:[%s2338_s1 + $0x2c0] sm:$0xff]  }
  0x17   :  { %v1826_v4 = vld [vmem:[%s2338_s1 + $0x138] sm:$0xff]   ;;  %v17_v6 = vld [vmem:[%s2339_s0 + $0x10] sm:$0xff]  ;;  %v1834_v14 = vld [vmem:[%s2338_s1 + $0x200] sm:$0xff]  }
  0x18   :  { %1595 = vmatpush3.bf16.msra.mxu0 %v1782_v22  ;;  %v1827_v5 = vld [vmem:[%s2338_s1 + $0x1b8] sm:$0xff]   ;;  %v1444_v7 = vcombine.low %v17_v6, %v17_v6  ;;  %v1445_v8 = vcombine.high %v17_v6, %v17_v6  ;;  %v1835_v15 = vld [vmem:[%s2338_s1 + $0x280] sm:$0xff]   ;;  %v1836_v16 = vld [vmem:[%s2338_s1 + $0x248] sm:$0xff]  }
  0x19   :  { %1617 = vmatpush3.bf16.msra.mxu1 %v1783_v23  ;;  %1596 = vmatprep.subr.bf16.mxu0 %v1784_v24  ;;  %v18_v9 = vld [vmem:[%s2339_s0 + $0x18] sm:$0xff]  ;;  %v1837_v17 = vld [vmem:[%s2338_s1 + $0x2c8] sm:$0xff]   ;;  %v1840_v20 = vld [vmem:[%s2338_s1 + $0x250] sm:$0xff]  }
  0x1a   :  { %1618 = vmatprep.subr.bf16.mxu1 %v1785_v25  ;;  %v1446_v10 = vcombine.low %v18_v9, %v18_v9  ;;  %v1447_v11 = vcombine.high %v18_v9, %v18_v9  ;;  %v1838_v18 = vld [vmem:[%s2338_s1 + $0x208] sm:$0xff]   ;;  %v1841_v21 = vld [vmem:[%s2338_s1 + $0x2d0] sm:$0xff]   ;;  %v1844_v24 = vld [vmem:[%s2338_s1 + $0x258] sm:$0xff]  }
  0x1b   :  { %v1839_v19 = vld [vmem:[%s2338_s1 + $0x288] sm:$0xff]   ;;  %v1842_v22 = vld [vmem:[%s2338_s1 + $0x210] sm:$0xff]   ;;  %v1845_v25 = vld [vmem:[%s2338_s1 + $0x2d8] sm:$0xff]  }
  0x1c   :  { %1597 = vmatpush3.bf16.msra.mxu0 %v1786_v26  ;;  %v1843_v23 = vld [vmem:[%s2338_s1 + $0x290] sm:$0xff]   ;;  %v1846_v26 = vld [vmem:[%s2338_s1 + $0x218] sm:$0xff]   ;;  %v1852_v32 = vld [vmem:[%s2338_s1 + $0x268] sm:$0xff]  }
  0x1d   :  { %1619 = vmatpush3.bf16.msra.mxu1 %v1787_v27  ;;  %1598 = vmatprep.subr.bf16.mxu0 %v1788_v28  ;;  %v1847_v27 = vld [vmem:[%s2338_s1 + $0x298] sm:$0xff]   ;;  %v1848_v28 = vld [vmem:[%s2338_s1 + $0x260] sm:$0xff]   ;;  %v1853_v33 = vld [vmem:[%s2338_s1 + $0x2e8] sm:$0xff]  }
  0x1e   :  { %1620 = vmatprep.subr.bf16.mxu1 %v1789_v29  ;;  %v1849_v29 = vld [vmem:[%s2338_s1 + $0x2e0] sm:$0xff]   ;;  %v1855_v35 = vld [vmem:[%s2338_s1 + $0x2a8] sm:$0xff]   ;;  %v1857_v37 = vld [vmem:[%s2338_s1 + $0x2f0] sm:$0xff]  }
  0x1f   :  { %v1888_v6 = vld [vmem:[%s2338_s1 + $0x368] sm:$0xff]  }
  0x20   :  { %1599 = vmatpush3.bf16.msra.mxu0 %v1790_v30  ;;  %v1850_v30 = vld [vmem:[%s2338_s1 + $0x220] sm:$0xff]   ;;  %v1891_v9 = vld [vmem:[%s2338_s1 + $0x3a8] sm:$0xff]  }
  0x21   :  { %1621 = vmatpush3.bf16.msra.mxu1 %v1791_v31  ;;  %1628 = vmatprep.subr.bf16.mxu0 %v1796_v38  ;;  %v1851_v31 = vld [vmem:[%s2338_s1 + $0x2a0] sm:$0xff]   ;;  %v1858_v38 = vld [vmem:[%s2338_s1 + $0x230] sm:$0xff]  }
  0x22   :  { %1650 = vmatprep.subr.bf16.mxu1 %v1797_v39  ;;  %v1859_v39 = vld [vmem:[%s2338_s1 + $0x2b0] sm:$0xff]  }
  0x23   :  { %1143 = vmatmul.mubr.bf16.vlgmr.msra.gmra.mrb[0].mxu0 %v1440_v34  ;;  %v1854_v34 = vld [vmem:[%s2338_s1 + $0x228] sm:$0xff]  }
  0x24   :  { %1183 = vmatmul.mubr.bf16.vlgmr.msra.gmra.mrb[0].mxu1 %v1442_v36  ;;  %1629 = vmatpush3.bf16.msra.mxu0 %v1798_v40  ;;  %v1856_v36 = vld [vmem:[%s2338_s1 + $0x270] sm:$0xff]   ;;  %v1860_v40 = vld [vmem:[%s2338_s1 + $0x278] sm:$0xff]  }
  0x25   :  { %1651 = vmatpush3.bf16.msra.mxu1 %v1799_v41  ;;  %1630 = vmatprep.subr.bf16.mxu0 %v1800_v42  ;;  %v1861_v41 = vld [vmem:[%s2338_s1 + $0x2f8] sm:$0xff]  }
  0x26   :  { %1652 = vmatprep.subr.bf16.mxu1 %v1801_v43  ;;  %1222 = vmatprep.mubr.bf16.mxu0 %v1445_v8  ;;  %v1862_v42 = vld [vmem:[%s2338_s1 + $0x238] sm:$0xff]   ;;  %v1890_v8 = vld [vmem:[%s2338_s1 + $0x328] sm:$0xff]  }
  0x27   :  { %1262 = vmatprep.mubr.bf16.mxu1 %v1447_v11  ;;  %v1863_v43 = vld [vmem:[%s2338_s1 + $0x2b8] sm:$0xff]   ;;  %v1893_v11 = vld [vmem:[%s2338_s1 + $0x3f0] sm:$0xff]  }
  0x28   :  { %1631 = vmatpush3.bf16.msra.mxu0 %v1802_v44  ;;  %v19_v44 = vld [vmem:[%s2339_s0 + $0x20] sm:$0xff] }
  0x29   :  { %1653 = vmatpush3.bf16.msra.mxu1 %v1803_v45  ;;  %1632 = vmatprep.subr.bf16.mxu0 %v1804_v46  ;;  %v20_v45 = vld [vmem:[%s2339_s0 + $0x28] sm:$0xff]  ;;  %v1448_v46 = vcombine.low %v19_v44, %v19_v44 }
  0x2a   :  { %1654 = vmatprep.subr.bf16.mxu1 %v1805_v47  ;;  %v1449_v47 = vcombine.high %v19_v44, %v19_v44 }
  0x2c   :  { %1633 = vmatpush3.bf16.msra.mxu0 %v1806_v48  ;;  %v1450_v48 = vcombine.low %v20_v45, %v20_v45 }
  0x2d   :  { %1655 = vmatpush3.bf16.msra.mxu1 %v1807_v49  ;;  %1634 = vmatprep.subr.bf16.mxu0 %v1808_v50  ;;  %v1451_v49 = vcombine.high %v20_v45, %v20_v45  ;;  %v1868_v50 = vld [vmem:[%s2338_s1 + $0x340] sm:$0xff]  }
  0x2e   :  { %1656 = vmatprep.subr.bf16.mxu1 %v1809_v51  ;;  %v1869_v51 = vld [vmem:[%s2338_s1 + $0x3c0] sm:$0xff]  }
  0x30   :  { %1635 = vmatpush3.bf16.msra.mxu0 %v1810_v52  ;;  %v1870_v52 = vld [vmem:[%s2338_s1 + $0x300] sm:$0xff]  }
  0x31   :  { %1657 = vmatpush3.bf16.msra.mxu1 %v1811_v53  ;;  %1636 = vmatprep.subr.bf16.mxu0 %v1812_v54  ;;  %v1871_v53 = vld [vmem:[%s2338_s1 + $0x380] sm:$0xff]   ;;  %v1872_v54 = vld [vmem:[%s2338_s1 + $0x348] sm:$0xff]  }
  0x32   :  { %1658 = vmatprep.subr.bf16.mxu1 %v1813_v55  ;;  %v1873_v55 = vld [vmem:[%s2338_s1 + $0x3c8] sm:$0xff]  }
  0x34   :  { %1637 = vmatpush3.bf16.msra.mxu0 %v1814_v56  ;;  %v1874_v56 = vld [vmem:[%s2338_s1 + $0x308] sm:$0xff]  }
  0x35   :  { %1659 = vmatpush3.bf16.msra.mxu1 %v1815_v57  ;;  %1638 = vmatprep.subr.bf16.mxu0 %v1816_v58  ;;  %v1875_v57 = vld [vmem:[%s2338_s1 + $0x388] sm:$0xff]   ;;  %v1876_v58 = vld [vmem:[%s2338_s1 + $0x350] sm:$0xff]  }
  0x36   :  { %1660 = vmatprep.subr.bf16.mxu1 %v1817_v59  ;;  %v1877_v59 = vld [vmem:[%s2338_s1 + $0x3d0] sm:$0xff]  }
  0x38   :  { %1639 = vmatpush3.bf16.msra.mxu0 %v1818_v60  ;;  %v1878_v60 = vld [vmem:[%s2338_s1 + $0x310] sm:$0xff]  }
  0x39   :  { %1661 = vmatpush3.bf16.msra.mxu1 %v1819_v61  ;;  %1640 = vmatprep.subr.bf16.mxu0 %v1820_v62  ;;  %v1879_v61 = vld [vmem:[%s2338_s1 + $0x390] sm:$0xff]   ;;  %v1880_v62 = vld [vmem:[%s2338_s1 + $0x358] sm:$0xff]  }
  0x3a   :  { %1662 = vmatprep.subr.bf16.mxu1 %v1821_v63  ;;  %v1881_v63 = vld [vmem:[%s2338_s1 + $0x3d8] sm:$0xff]  }
  0x3c   :  { %1641 = vmatpush3.bf16.msra.mxu0 %v1822_v0  ;;  %v1882_v0 = vld [vmem:[%s2338_s1 + $0x318] sm:$0xff]  }
  0x3d   :  { %1663 = vmatpush3.bf16.msra.mxu1 %v1823_v1  ;;  %1642 = vmatprep.subr.bf16.mxu0 %v1824_v2  ;;  %v1883_v1 = vld [vmem:[%s2338_s1 + $0x398] sm:$0xff]   ;;  %v1884_v2 = vld [vmem:[%s2338_s1 + $0x360] sm:$0xff]  }
  0x3e   :  { %1664 = vmatprep.subr.bf16.mxu1 %v1825_v3  ;;  %v1885_v3 = vld [vmem:[%s2338_s1 + $0x3e0] sm:$0xff]  }
  0x40   :  { %1643 = vmatpush3.bf16.msra.mxu0 %v1826_v4  ;;  %v1886_v4 = vld [vmem:[%s2338_s1 + $0x320] sm:$0xff]  }
  0x41   :  { %1665 = vmatpush3.bf16.msra.mxu1 %v1827_v5  ;;  %1672 = vmatprep.subr.bf16.mxu0 %v1832_v12  ;;  %v1887_v5 = vld [vmem:[%s2338_s1 + $0x3a0] sm:$0xff]   ;;  %v1894_v12 = vld [vmem:[%s2338_s1 + $0x330] sm:$0xff]  }
  0x42   :  { %1694 = vmatprep.subr.bf16.mxu1 %v1833_v13  ;;  %v1895_v13 = vld [vmem:[%s2338_s1 + $0x3b0] sm:$0xff]  }
  0x43   :  { %1223 = vmatmul.mubr.bf16.vlgmr.msra.gmra.mrb[4].mxu0 %v1444_v7  ;;  %v1889_v7 = vld [vmem:[%s2338_s1 + $0x3e8] sm:$0xff]  }
  0x44   :  { %1263 = vmatmul.mubr.bf16.vlgmr.msra.gmra.mrb[4].mxu1 %v1446_v10  ;;  %1673 = vmatpush3.bf16.msra.mxu0 %v1834_v14  ;;  %v1892_v10 = vld [vmem:[%s2338_s1 + $0x370] sm:$0xff]   ;;  %v1896_v14 = vld [vmem:[%s2338_s1 + $0x378] sm:$0xff]  }
  0x45   :  { %1695 = vmatpush3.bf16.msra.mxu1 %v1835_v15  ;;  %1674 = vmatprep.subr.bf16.mxu0 %v1836_v16  ;;  %v1897_v15 = vld [vmem:[%s2338_s1 + $0x3f8] sm:$0xff]  }
  0x46   :  { %1696 = vmatprep.subr.bf16.mxu1 %v1837_v17  ;;  %1302 = vmatprep.mubr.bf16.mxu0 %v1449_v47  ;;  %v1898_v16 = vld [vmem:[%s2338_s1 + $0x338] sm:$0xff]  }
  0x47   :  { %1342 = vmatprep.mubr.bf16.mxu1 %v1451_v49  ;;  %v1899_v17 = vld [vmem:[%s2338_s1 + $0x3b8] sm:$0xff]  }
  0x48   :  { %1675 = vmatpush3.bf16.msra.mxu0 %v1838_v18  ;;  %v21_v18 = vld [vmem:[%s2339_s0 + $0x30] sm:$0xff] }
  0x49   :  { %1697 = vmatpush3.bf16.msra.mxu1 %v1839_v19  ;;  %1676 = vmatprep.subr.bf16.mxu0 %v1840_v20  ;;  %v22_v19 = vld [vmem:[%s2339_s0 + $0x38] sm:$0xff]  ;;  %v1452_v20 = vcombine.low %v21_v18, %v21_v18 }
  0x4a   :  { %1698 = vmatprep.subr.bf16.mxu1 %v1841_v21  ;;  %v1453_v21 = vcombine.high %v21_v18, %v21_v18 }
  0x4c   :  { %1677 = vmatpush3.bf16.msra.mxu0 %v1842_v22  ;;  %v1454_v22 = vcombine.low %v22_v19, %v22_v19 }
  0x4d   :  { %1699 = vmatpush3.bf16.msra.mxu1 %v1843_v23  ;;  %1678 = vmatprep.subr.bf16.mxu0 %v1844_v24  ;;  %v1455_v23 = vcombine.high %v22_v19, %v22_v19 }
  0x4e   :  { %1700 = vmatprep.subr.bf16.mxu1 %v1845_v25 }
  0x50   :  { %1679 = vmatpush3.bf16.msra.mxu0 %v1846_v26  ;;  %v1439_v26 = vld [vmem:[%s2340_s2] ss:$0 sm:$0xff] }
  0x51   :  { %1701 = vmatpush3.bf16.msra.mxu1 %v1847_v27  ;;  %1680 = vmatprep.subr.bf16.mxu0 %v1848_v28 }
  0x52   :  { %1702 = vmatprep.subr.bf16.mxu1 %v1849_v29 }
  0x54   :  { %1681 = vmatpush3.bf16.msra.mxu0 %v1850_v30 }
  0x55   :  { %1703 = vmatpush3.bf16.msra.mxu1 %v1851_v31  ;;  %1682 = vmatprep.subr.bf16.mxu0 %v1852_v32 }
  0x56   :  { %1704 = vmatprep.subr.bf16.mxu1 %v1853_v33 }
  0x58   :  { %1683 = vmatpush3.bf16.msra.mxu0 %v1854_v34 }
  0x59   :  { %1705 = vmatpush3.bf16.msra.mxu1 %v1855_v35  ;;  %1684 = vmatprep.subr.bf16.mxu0 %v1856_v36 }
  0x5a   :  { %1706 = vmatprep.subr.bf16.mxu1 %v1857_v37 }
  0x5c   :  { %1685 = vmatpush3.bf16.msra.mxu0 %v1858_v38 }
  0x5d   :  { %1707 = vmatpush3.bf16.msra.mxu1 %v1859_v39  ;;  %1686 = vmatprep.subr.bf16.mxu0 %v1860_v40 }
  0x5e   :  { %1708 = vmatprep.subr.bf16.mxu1 %v1861_v41 }
  0x60   :  { %1687 = vmatpush3.bf16.msra.mxu0 %v1862_v42 }
  0x61   :  { %1709 = vmatpush3.bf16.msra.mxu1 %v1863_v43  ;;  %1716 = vmatprep.subr.bf16.mxu0 %v1868_v50 }
  0x62   :  { %1738 = vmatprep.subr.bf16.mxu1 %v1869_v51 }
  0x63   :  { %1303 = vmatmul.mubr.bf16.vlgmr.msra.gmra.mrb[8].mxu0 %v1448_v46 }
  0x64   :  { %1343 = vmatmul.mubr.bf16.vlgmr.msra.gmra.mrb[8].mxu1 %v1450_v48  ;;  %1717 = vmatpush3.bf16.msra.mxu0 %v1870_v52 }
  0x65   :  { %1739 = vmatpush3.bf16.msra.mxu1 %v1871_v53  ;;  %1718 = vmatprep.subr.bf16.mxu0 %v1872_v54 }
  0x66   :  { %1740 = vmatprep.subr.bf16.mxu1 %v1873_v55  ;;  %1382 = vmatprep.mubr.bf16.mxu0 %v1453_v21 }
  0x67   :  { %1422 = vmatprep.mubr.bf16.mxu1 %v1455_v23 }
  0x68   :  { %1719 = vmatpush3.bf16.msra.mxu0 %v1874_v56 }
  0x69   :  { %1741 = vmatpush3.bf16.msra.mxu1 %v1875_v57  ;;  %1720 = vmatprep.subr.bf16.mxu0 %v1876_v58 }
  0x6a   :  { %1742 = vmatprep.subr.bf16.mxu1 %v1877_v59 }
  0x6c   :  { %1721 = vmatpush3.bf16.msra.mxu0 %v1878_v60 }
  0x6d   :  { %1743 = vmatpush3.bf16.msra.mxu1 %v1879_v61  ;;  %1722 = vmatprep.subr.bf16.mxu0 %v1880_v62 }
  0x6e   :  { %1744 = vmatprep.subr.bf16.mxu1 %v1881_v63 }
  0x70   :  { %1723 = vmatpush3.bf16.msra.mxu0 %v1882_v0 }
  0x71   :  { %1745 = vmatpush3.bf16.msra.mxu1 %v1883_v1  ;;  %1724 = vmatprep.subr.bf16.mxu0 %v1884_v2 }
  0x72   :  { %1746 = vmatprep.subr.bf16.mxu1 %v1885_v3 }
  0x74   :  { %1725 = vmatpush3.bf16.msra.mxu0 %v1886_v4 }
  0x75   :  { %1747 = vmatpush3.bf16.msra.mxu1 %v1887_v5  ;;  %1726 = vmatprep.subr.bf16.mxu0 %v1888_v6 }
  0x76   :  { %1748 = vmatprep.subr.bf16.mxu1 %v1889_v7 }
  0x78   :  { %1727 = vmatpush3.bf16.msra.mxu0 %v1890_v8 }
  0x79   :  { %1749 = vmatpush3.bf16.msra.mxu1 %v1891_v9  ;;  %1728 = vmatprep.subr.bf16.mxu0 %v1892_v10 }
  0x7a   :  { %1750 = vmatprep.subr.bf16.mxu1 %v1893_v11 }
  0x7c   :  { %1729 = vmatpush3.bf16.msra.mxu0 %v1894_v12 }
  0x7d   :  { %1751 = vmatpush3.bf16.msra.mxu1 %v1895_v13  ;;  %1730 = vmatprep.subr.bf16.mxu0 %v1896_v14 }
  0x7e   :  { %1752 = vmatprep.subr.bf16.mxu1 %v1897_v15 }
  0x80   :  { %1731 = vmatpush3.bf16.msra.mxu0 %v1898_v16 }
  0x81   :  { %1753 = vmatpush3.bf16.msra.mxu1 %v1899_v17 }
  0x83   :  { %1383 = vmatmul.mubr.bf16.vlgmr.msra.gmra.mrb[12].mxu0 %v1452_v20 }
  0x84   :  { %1423 = vmatmul.mubr.bf16.vlgmr.msra.gmra.mrb[12].mxu1 %v1454_v22 }
  0xf6   :  { %v1600_v24 = vpop.f32.mrb[0].mxu0 }
  0xf7   :  { %v1622_v25 = vpop.f32.mrb[0].mxu1  ;;  %v1601_v27 = vpop.f32.mrb[1].mxu0 }
  0xf8   :  { %v1623_v28 = vpop.f32.mrb[1].mxu1  ;;  %v1602_v29 = vadd.f32 %v1601_v27, %v1600_v24  ;;  %v1603_v31 = vpop.f32.mrb[2].mxu0 }
  0xf9   :  { %v1624_v30 = vadd.f32 %v1623_v28, %v1622_v25  ;;  %v1625_v32 = vpop.f32.mrb[2].mxu1  ;;  %v1604_v33 = vpop.f32.mrb[3].mxu0 }
  0xfa   :  { %v1626_v34 = vpop.f32.mrb[3].mxu1  ;;  %v1145_v35 = vadd.f32 %v1602_v29, %v1439_v26 }
  0xfc   :  { %v1185_v36 = vadd.f32 %v1624_v30, %v1145_v35 }
 0x116   :  { %v1644_v37 = vpop.f32.mrb[4].mxu0 }
 0x117   :  { %v1666_v38 = vpop.f32.mrb[4].mxu1  ;;  %v1645_v39 = vpop.f32.mrb[5].mxu0 }
 0x118   :  { %v1667_v40 = vpop.f32.mrb[5].mxu1  ;;  %v1646_v41 = vadd.f32 %v1645_v39, %v1644_v37  ;;  %v1647_v43 = vpop.f32.mrb[6].mxu0 }
 0x119   :  { %v1668_v42 = vadd.f32 %v1667_v40, %v1666_v38  ;;  %v1669_v44 = vpop.f32.mrb[6].mxu1  ;;  %v1648_v45 = vpop.f32.mrb[7].mxu0 }
 0x11a   :  { %v1670_v46 = vpop.f32.mrb[7].mxu1  ;;  %v1225_v47 = vadd.f32 %v1646_v41, %v1185_v36 }
 0x11c   :  { %v1265_v48 = vadd.f32 %v1668_v42, %v1225_v47 }
 0x136   :  { %v1688_v49 = vpop.f32.mrb[8].mxu0 }
 0x137   :  { %v1710_v50 = vpop.f32.mrb[8].mxu1  ;;  %v1689_v51 = vpop.f32.mrb[9].mxu0 }
 0x138   :  { %v1690_v52 = vadd.f32 %v1689_v51, %v1688_v49  ;;  %v1711_v53 = vpop.f32.mrb[9].mxu1  ;;  %v1691_v54 = vpop.f32.mrb[10].mxu0 }
 0x139   :  { %v1712_v55 = vadd.f32 %v1711_v53, %v1710_v50  ;;  %v1713_v56 = vpop.f32.mrb[10].mxu1  ;;  %v1692_v57 = vpop.f32.mrb[11].mxu0 }
 0x13a   :  { %v1305_v58 = vadd.f32 %v1690_v52, %v1265_v48  ;;  %v1714_v59 = vpop.f32.mrb[11].mxu1 }
 0x13c   :  { %v1345_v60 = vadd.f32 %v1712_v55, %v1305_v58 }
 0x156   :  { %v1732_v61 = vpop.f32.mrb[12].mxu0 }
 0x157   :  { %v1754_v62 = vpop.f32.mrb[12].mxu1  ;;  %v1733_v63 = vpop.f32.mrb[13].mxu0 }
 0x158   :  { %v1734_v0 = vadd.f32 %v1733_v63, %v1732_v61  ;;  %v1755_v1 = vpop.f32.mrb[13].mxu1  ;;  %v1735_v2 = vpop.f32.mrb[14].mxu0 }
 0x159   :  { %v1756_v3 = vadd.f32 %v1755_v1, %v1754_v62  ;;  %v1757_v4 = vpop.f32.mrb[14].mxu1  ;;  %v1736_v5 = vpop.f32.mrb[15].mxu0 }
 0x15a   :  { %v1385_v6 = vadd.f32 %v1734_v0, %v1345_v60  ;;  %v1758_v7 = vpop.f32.mrb[15].mxu1 }
 0x15c   :  { %v1425_v8 = vadd.f32 %v1756_v3, %v1385_v6 }
 0x15e   :  { %vm1430_vm0 = vcmp.gt.f32.partialorder %v1425_v8, 0.0  ;;  %v1431_v9 = vmul.f32 0.1, %v1425_v8 }
 0x160   :  { %v1432_v10 = vsel %vm1430_vm0, %v1425_v8, %v1431_v9 }
 0x161   :  { %v1433_v11 = vpack.c.bf16 %v1432_v10, %v1432_v10 }
 0x163   :  { %1434 = vst [vmem:[%s2341_s3] sm:$0xf] %v1433_v11 }

</bundles_post_ra>
